<compile_context>
chip_gen: v6e
topology: v6e:2x2x1
jax: 0.10.0
libtpu: 0.0.40
codegen_flags: <defaults>
</compile_context>

<pallas_src>
import jax
import jax.numpy as jnp
from jax.experimental import pallas as pl
from jax.experimental.pallas import tpu as pltpu


# ----------------------------- tiling / spec helpers -----------------------------

_VMEM_LIMIT = 32 * 1024 * 1024   # explicit scoped-VMEM ceiling (safe on v5e/v6e/v7x)
_VMEM_BUDGET = 8 * 1024 * 1024   # byte budget for the streamed (row-tiled) buffers


def _round_up(x, m):
    return ((x + m - 1) // m) * m


def _pick_bm(m, lane_widths):
    """Row-tile size from a VMEM byte budget: f32, lanes padded to 128, x2 for double
    buffering, rounded to a multiple of 8, capped at 4096.  If everything fits in one
    tile, split into two so both v7x TensorCores get work (neutral on v5e/v6e)."""
    if m <= 8:
        return m
    padded = sum(_round_up(max(int(w), 1), 128) for w in lane_widths)
    per_row = 4 * padded * 2
    bm = max(8, (min(_VMEM_BUDGET // max(per_row, 1), 4096, m) // 8) * 8)
    if bm >= m and m >= 16:
        bm = _round_up((m + 1) // 2, 8)
    return min(bm, m)


def _row_spec(bm, c):
    return pl.BlockSpec((bm, c), lambda i: (i, 0))


def _bcast2(a, b):
    return pl.BlockSpec((a, b), lambda i: (0, 0))


def _cparams():
    return pltpu.CompilerParams(dimension_semantics=("parallel",),
                                vmem_limit_bytes=_VMEM_LIMIT)


def _im2col(x, kh, kw, sh, sw, ph, pw):
    """x: (N,H,W,C) NHWC -> patches (N*Ho*Wo, kh*kw*C), column order (ki, kj, c)."""
    N, H, W, C = x.shape
    xp = jnp.pad(x, ((0, 0), (ph, ph), (pw, pw), (0, 0)))
    Ho = (H + 2 * ph - kh) // sh + 1
    Wo = (W + 2 * pw - kw) // sw + 1
    cols = [xp[:, i:i + sh * Ho:sh, j:j + sw * Wo:sw, :]
            for i in range(kh) for j in range(kw)]
    patches = jnp.concatenate(cols, axis=-1).reshape(N * Ho * Wo, kh * kw * C)
    return patches, Ho, Wo


# ----------------------------- Pallas kernels -----------------------------

def _stem_kernel(p_ref, w_ref, s_ref, b_ref, o_ref):
    # conv1 (as matmul) -> norm1 -> relu1, fused.
    y = jnp.dot(p_ref[...], w_ref[...], preferred_element_type=jnp.float32)
    o_ref[...] = jnp.maximum(y * s_ref[...] + b_ref[...], 0.0)


def _maxpool9_kernel(*refs):
    # running max over the 9 shifted window slices (inputs are post-ReLU, >= 0).
    o_ref = refs[9]
    m = refs[0][...]
    for i in range(1, 9):
        m = jnp.maximum(m, refs[i][...])
    o_ref[...] = m


def _bottleneck_kernel(x_ref, s1_ref, b1_ref, w1_ref, s2_ref, b2_ref, o_ref):
    # norm1+relu1 -> 1x1 conv (one large-K dot over the full feature slab) -> norm2+relu2.
    h = jnp.maximum(x_ref[...] * s1_ref[...] + b1_ref[...], 0.0)
    y = jnp.dot(h, w1_ref[...], preferred_element_type=jnp.float32)
    o_ref[...] = jnp.maximum(y * s2_ref[...] + b2_ref[...], 0.0)


def _conv3x3_kernel(*refs):
    # 3x3 conv as 9 tap dots accumulated in-register; weight kept as one (9*Cb, G)
    # operand and sliced per tap with sublane-aligned static slices.
    taps = refs[0:9]
    w_ref = refs[9]
    o_ref = refs[10]
    cb = taps[0].shape[-1]
    acc = jnp.dot(taps[0][...], w_ref[0:cb, :], preferred_element_type=jnp.float32)
    for t in range(1, 9):
        acc = acc + jnp.dot(taps[t][...], w_ref[t * cb:(t + 1) * cb, :],
                            preferred_element_type=jnp.float32)
    o_ref[...] = acc


def _transition_kernel(d0_ref, d1_ref, d2_ref, d3_ref, s_ref, b_ref, w_ref, o_ref):
    # norm+relu on the 4 decimated slices, average (== 2x2 avgpool), then 1x1 conv.
    s = s_ref[...]
    b = b_ref[...]
    pooled = (jnp.maximum(d0_ref[...] * s + b, 0.0)
              + jnp.maximum(d1_ref[...] * s + b, 0.0)
              + jnp.maximum(d2_ref[...] * s + b, 0.0)
              + jnp.maximum(d3_ref[...] * s + b, 0.0)) * 0.25
    o_ref[...] = jnp.dot(pooled, w_ref[...], preferred_element_type=jnp.float32)


def _head_kernel(x_ref, s_ref, b_ref, w_ref, fb_ref, o_ref):
    # norm5 + relu + adaptive avg pool (1,1) + Linear, one image per grid step.
    h = jnp.maximum(x_ref[...] * s_ref[...] + b_ref[...], 0.0)      # (HW, C)
    p = jnp.mean(h, axis=0, keepdims=True)                           # (1, C)
    o_ref[...] = jnp.dot(p, w_ref[...], preferred_element_type=jnp.float32) + fb_ref[...]


# ----------------------------- fused stage wrappers -----------------------------

def stem_forward(x_nhwc, w1, n1_scale, n1_bias, k, stride):
    """conv1 (k x k, stride, pad k//2) + norm1 + relu1, fused."""
    patches, Ho, Wo = _im2col(x_nhwc, k, k, stride[0], stride[1], k // 2, k // 2)
    M, K = patches.shape
    Cout = w1.shape[1]
    bm = _pick_bm(M, [K, Cout])
    y = pl.pallas_call(
        _stem_kernel,
        grid=(pl.cdiv(M, bm),),
        in_specs=[_row_spec(bm, K), _bcast2(K, Cout),
                  _bcast2(1, Cout), _bcast2(1, Cout)],
        out_specs=_row_spec(bm, Cout),
        out_shape=jax.ShapeDtypeStruct((M, Cout), jnp.float32),
        compiler_params=_cparams(),
        cost_estimate=pl.CostEstimate(
            flops=2 * M * K * Cout, transcendentals=0,
            bytes_accessed=4 * (M * K + K * Cout + 2 * Cout + M * Cout)),
    )(patches, w1, n1_scale.reshape(1, -1), n1_bias.reshape(1, -1))
    return y, Ho, Wo


def maxpool_3x3s2p1(y2, N, H, W):
    """MaxPool2d(kernel_size=3, stride=2, padding=1) on post-ReLU (>=0) features."""
    C = y2.shape[1]
    x = y2.reshape(N, H, W, C)
    k, s, p = 3, 2, 1
    # Values are post-ReLU (>= 0), so zero padding matches PyTorch's -inf padding.
    xp = jnp.pad(x, ((0, 0), (p, p), (p, p), (0, 0)))
    Ho = (H + 2 * p - k) // s + 1
    Wo = (W + 2 * p - k) // s + 1
    Mo = N * Ho * Wo
    slices = [xp[:, i:i + s * Ho:s, j:j + s * Wo:s, :].reshape(Mo, C)
              for i in range(k) for j in range(k)]
    bm = _pick_bm(Mo, [C] * 10)
    out = pl.pallas_call(
        _maxpool9_kernel,
        grid=(pl.cdiv(Mo, bm),),
        in_specs=[_row_spec(bm, C)] * 9,
        out_specs=_row_spec(bm, C),
        out_shape=jax.ShapeDtypeStruct((Mo, C), jnp.float32),
        compiler_params=_cparams(),
    )(*slices)
    return out, Ho, Wo


def dense_layer(x, N, H, W, p):
    """One _DenseLayer on the lane-dense feature slab x (M, C_in).
    Kernel A: norm1+relu1 + 1x1 conv (single large-K dot) + norm2+relu2.
    Kernel B: 3x3 conv (stride 1, pad 1) as 9 tap dots accumulated in-kernel.
    Returns the new concatenated slab (M, C_in + growth)."""
    M, Cin = x.shape
    Cb = p["w1"].shape[1]
    G = p["w2"].shape[1]

    bm = _pick_bm(M, [Cin, Cb])
    h2 = pl.pallas_call(
        _bottleneck_kernel,
        grid=(pl.cdiv(M, bm),),
        in_specs=[_row_spec(bm, Cin), _bcast2(1, Cin), _bcast2(1, Cin),
                  _bcast2(Cin, Cb), _bcast2(1, Cb), _bcast2(1, Cb)],
        out_specs=_row_spec(bm, Cb),
        out_shape=jax.ShapeDtypeStruct((M, Cb), jnp.float32),
        compiler_params=_cparams(),
        cost_estimate=pl.CostEstimate(
            flops=2 * M * Cin * Cb, transcendentals=0,
            bytes_accessed=4 * (M * Cin + Cin * Cb + M * Cb + 2 * Cin + 2 * Cb)),
    )(x, p["n1_scale"].reshape(1, -1), p["n1_bias"].reshape(1, -1),
      p["w1"], p["n2_scale"].reshape(1, -1), p["n2_bias"].reshape(1, -1))

    # 3x3 conv: zero padding is exact since relu2 was already applied above.
    h4 = h2.reshape(N, H, W, Cb)
    hp = jnp.pad(h4, ((0, 0), (1, 1), (1, 1), (0, 0)))
    taps = [hp[:, i:i + H, j:j + W, :].reshape(M, Cb)
            for i in range(3) for j in range(3)]

    bm2 = _pick_bm(M, [Cb] * 9 + [G])
    new = pl.pallas_call(
        _conv3x3_kernel,
        grid=(pl.cdiv(M, bm2),),
        in_specs=[_row_spec(bm2, Cb)] * 9 + [_bcast2(9 * Cb, G)],
        out_specs=_row_spec(bm2, G),
        out_shape=jax.ShapeDtypeStruct((M, G), jnp.float32),
        compiler_params=_cparams(),
        cost_estimate=pl.CostEstimate(
            flops=2 * M * 9 * Cb * G, transcendentals=0,
            bytes_accessed=4 * (9 * M * Cb + 9 * Cb * G + M * G)),
    )(*taps, p["w2"])
    # TODO(synk): drop_rate > 0 not implemented (config uses drop_rate=0 -> identity).
    # Lane-dense concat once per layer (torch.cat([x, new_features], 1)).
    return jnp.concatenate([x, new], axis=1)


def transition(x, N, H, W, p):
    """_Transition: norm + relu + 1x1 conv + AvgPool(2,2), one fused kernel.
    The avg-pool is commuted before the bias-free 1x1 conv (both linear / spatially
    pointwise -> mathematically identical, 4x less matmul work)."""
    M, C = x.shape
    Cout = p["w"].shape[1]
    x4 = x.reshape(N, H, W, C)
    He, We = (H // 2) * 2, (W // 2) * 2          # floor, matching AvgPool2d(2,2)
    x4 = x4[:, :He, :We, :]
    Ho, Wo = He // 2, We // 2
    Mo = N * Ho * Wo
    dec = [x4[:, i::2, j::2, :].reshape(Mo, C) for i in range(2) for j in range(2)]

    bm = _pick_bm(Mo, [C] * 4 + [Cout])
    out = pl.pallas_call(
        _transition_kernel,
        grid=(pl.cdiv(Mo, bm),),
        in_specs=[_row_spec(bm, C)] * 4
                 + [_bcast2(1, C), _bcast2(1, C), _bcast2(C, Cout)],
        out_specs=_row_spec(bm, Cout),
        out_shape=jax.ShapeDtypeStruct((Mo, Cout), jnp.float32),
        compiler_params=_cparams(),
        cost_estimate=pl.CostEstimate(
            flops=2 * Mo * C * Cout, transcendentals=0,
            bytes_accessed=4 * (4 * Mo * C + C * Cout + Mo * Cout + 2 * C)),
    )(*dec, p["n_scale"].reshape(1, -1), p["n_bias"].reshape(1, -1), p["w"])
    return out, Ho, Wo


def head(x, N, H, W, params, num_classes):
    """norm5 + relu + adaptive avg pool to (1,1) + classifier, one image per grid step."""
    M, C = x.shape
    HW = H * W
    x3 = x.reshape(N, HW, C)
    out = pl.pallas_call(
        _head_kernel,
        grid=(N,),
        in_specs=[pl.BlockSpec((None, HW, C), lambda i: (i, 0, 0)),
                  _bcast2(1, C), _bcast2(1, C),
                  _bcast2(C, num_classes), _bcast2(1, num_classes)],
        out_specs=pl.BlockSpec((None, 1, num_classes), lambda i: (i, 0, 0)),
        out_shape=jax.ShapeDtypeStruct((N, 1, num_classes), jnp.float32),
        compiler_params=_cparams(),
        cost_estimate=pl.CostEstimate(
            flops=2 * N * C * num_classes, transcendentals=0,
            bytes_accessed=4 * (N * HW * C + C * num_classes + N * num_classes)),
    )(x3, params["norm5_scale"].reshape(1, -1), params["norm5_bias"].reshape(1, -1),
      params["fc_w"], params["fc_b"].reshape(1, -1))
    return out.reshape(N, num_classes)


# ----------------------------- parameters -----------------------------

def _bn_affine(c, eps=1e-5):
    # Module init: gamma=1, beta=0; running stats mean=0, var=1 (inference-mode folding).
    # For trained weights, recompute scale/bias from the real running stats.
    gamma = jnp.ones((c,), jnp.float32)
    beta = jnp.zeros((c,), jnp.float32)
    mean = jnp.zeros((c,), jnp.float32)
    var = jnp.ones((c,), jnp.float32)
    scale = gamma / jnp.sqrt(var + eps)
    bias = beta - mean * scale
    return scale, bias


def init_params(key, cfg):
    keys = iter(jax.random.split(key, 256))

    def conv_w(cout, cin, kh, kw):
        # kaiming_normal_(mode='fan_out'): std = sqrt(2 / (cout * kh * kw))
        fan_out = cout * kh * kw
        std = (2.0 / fan_out) ** 0.5
        w = jax.random.normal(next(keys), (kh, kw, cin, cout), jnp.float32) * std
        return w.reshape(kh * kw * cin, cout)      # rows ordered (ki, kj, cin)

    growth = cfg["growth_rate"]
    bn_size = cfg["bn_size"]
    nif = cfg["num_init_features"]
    k1 = cfg["conv1_t_size"]

    params = {}
    params["conv1"] = conv_w(nif, cfg["num_channels"], k1, k1)
    params["norm1"] = _bn_affine(nif)

    num_features = nif
    blocks, transitions = [], []
    for bi, num_layers in enumerate(cfg["block_config"]):
        layers = []
        for li in range(num_layers):
            cin = num_features + li * growth
            n1 = _bn_affine(cin)
            n2 = _bn_affine(bn_size * growth)
            layers.append(dict(
                n1_scale=n1[0], n1_bias=n1[1],
                w1=conv_w(bn_size * growth, cin, 1, 1),
                n2_scale=n2[0], n2_bias=n2[1],
                w2=conv_w(growth, bn_size * growth, 3, 3),
            ))
        blocks.append(layers)
        num_features += num_layers * growth
        if bi != len(cfg["block_config"]) - 1:
            nt = _bn_affine(num_features)
            transitions.append(dict(
                n_scale=nt[0], n_bias=nt[1],
                w=conv_w(num_features // 2, num_features, 1, 1),
            ))
            num_features //= 2
    params["blocks"] = blocks
    params["transitions"] = transitions
    params["norm5_scale"], params["norm5_bias"] = _bn_affine(num_features)
    params["fc_w"] = jax.random.normal(
        next(keys), (num_features, cfg["num_classes"]), jnp.float32) * (1.0 / num_features) ** 0.5
    params["fc_b"] = jnp.zeros((cfg["num_classes"],), jnp.float32)  # nn.init.constant_(bias, 0)
    return params


# ----------------------------- forward pass -----------------------------

def densenet_forward(params, x_nchw, cfg):
    x = jnp.transpose(x_nchw, (0, 2, 3, 1)).astype(jnp.float32)  # NCHW -> NHWC
    N = x.shape[0]
    k1 = cfg["conv1_t_size"]

    # stem: conv1 (stride (conv1_t_stride, 2), pad k//2) + norm1 + relu1 (fused), maxpool
    y, H, W = stem_forward(x, params["conv1"], params["norm1"][0], params["norm1"][1],
                           k1, (cfg["conv1_t_stride"], 2))
    if not cfg["no_max_pool"]:
        y, H, W = maxpool_3x3s2p1(y, N, H, W)

    # dense blocks: features carried as one lane-dense (M, C) slab
    feat = y
    for bi, block in enumerate(params["blocks"]):
        for layer in block:
            feat = dense_layer(feat, N, H, W, layer)
        if bi != len(params["blocks"]) - 1:
            feat, H, W = transition(feat, N, H, W, params["transitions"][bi])

    out = head(feat, N, H, W, params, cfg["num_classes"])
    # final_convolution_layer is None in this configuration -> identity
    return out


# ----------------------------- main -----------------------------

if __name__ == "__main__":
    CFG = dict(
        num_channels=4,
        num_dimensions=2,          # 2D variant (Conv2d / BatchNorm2d / *Pool2d)
        conv1_t_size=7,
        conv1_t_stride=1,
        no_max_pool=False,
        growth_rate=8,
        block_config=(2, 2),
        num_init_features=8,
        bn_size=2,
        drop_rate=0.0,
        num_classes=10,
        final_convolution_layer=None,
    )

    key = jax.random.PRNGKey(0)
    pkey, xkey = jax.random.split(key)
    params = init_params(pkey, CFG)

    # PyTorch-style NCHW input
    x = jax.random.normal(xkey, (2, CFG["num_channels"], 16, 16), jnp.float32)

    fwd = jax.jit(lambda p, a: densenet_forward(p, a, CFG))
    out = fwd(params, x)
    out = jax.block_until_ready(out)

    assert out.shape == (2, CFG["num_classes"]), out.shape
    assert bool(jnp.all(jnp.isfinite(out)))
    print("KERNEL_OK")
</pallas_src>

<mosaic_0001>
module attributes {stable_mosaic.version = 11 : i64} {
  func.func @_stem_kernel(%arg0: i32, %arg1: memref<128x196xf32, #tpu.memory_space<vmem>>, %arg2: memref<196x8xf32, #tpu.memory_space<vmem>>, %arg3: memref<1x8xf32, #tpu.memory_space<vmem>>, %arg4: memref<1x8xf32, #tpu.memory_space<vmem>>, %arg5: memref<128x8xf32, #tpu.memory_space<vmem>>) attributes {dimension_semantics = [#tpu.dimension_semantics<parallel>], iteration_bounds = array<i64: 2>, scalar_prefetch = 0 : i64, scratch_operands = 0 : i64, tpu.core_type = #tpu.core_type<tc>, window_params = [{transform_indices = @transform_0, window_bounds = array<i64: 128, 196>}, {pipeline_mode = #tpu.pipeline_mode<synchronous>, transform_indices = @transform_1, window_bounds = array<i64: 196, 8>}, {pipeline_mode = #tpu.pipeline_mode<synchronous>, transform_indices = @transform_2, window_bounds = array<i64: 1, 8>}, {pipeline_mode = #tpu.pipeline_mode<synchronous>, transform_indices = @transform_3, window_bounds = array<i64: 1, 8>}, {transform_indices = @transform_4, window_bounds = array<i64: 128, 8>}]} {
    %c0 = arith.constant 0 : index
    %c0_0 = arith.constant 0 : index
    %0 = vector.load %arg1[%c0, %c0_0] : memref<128x196xf32, #tpu.memory_space<vmem>>, vector<128x196xf32>
    %c0_1 = arith.constant 0 : index
    %c0_2 = arith.constant 0 : index
    %1 = vector.load %arg2[%c0_1, %c0_2] : memref<196x8xf32, #tpu.memory_space<vmem>>, vector<196x8xf32>
    %cst = arith.constant dense<0.000000e+00> : vector<128x8xf32>
    %2 = tpu.matmul %0, %1, %cst {dimension_numbers = #tpu.dot_dimension_numbers<[1], [0], [0], [1], [0, 0, 1, 1], [], []>} : vector<128x196xf32>, vector<196x8xf32>, vector<128x8xf32> -> vector<128x8xf32>
    %c0_3 = arith.constant 0 : index
    %c0_4 = arith.constant 0 : index
    %3 = vector.load %arg3[%c0_3, %c0_4] : memref<1x8xf32, #tpu.memory_space<vmem>>, vector<1x8xf32>
    %4 = vector.broadcast %3 : vector<1x8xf32> to vector<128x8xf32>
    %5 = arith.mulf %2, %4 : vector<128x8xf32>
    %c0_5 = arith.constant 0 : index
    %c0_6 = arith.constant 0 : index
    %6 = vector.load %arg4[%c0_5, %c0_6] : memref<1x8xf32, #tpu.memory_space<vmem>>, vector<1x8xf32>
    %7 = vector.broadcast %6 : vector<1x8xf32> to vector<128x8xf32>
    %8 = arith.addf %5, %7 : vector<128x8xf32>
    %cst_7 = arith.constant 0.000000e+00 : f32
    %9 = vector.broadcast %cst_7 : f32 to vector<128x8xf32>
    %10 = arith.maximumf %8, %9 : vector<128x8xf32>
    %c0_8 = arith.constant 0 : index
    %c0_9 = arith.constant 0 : index
    %11 = vector.load %arg5[%c0_8, %c0_9] : memref<128x8xf32, #tpu.memory_space<vmem>>, vector<128x8xf32>
    tpu.vector_store %arg5[%c0_8, %c0_9], %10 {strides = array<i32>} : memref<128x8xf32, #tpu.memory_space<vmem>>, vector<128x8xf32>,
    return
  }
  func.func @transform_0(%arg0: i32) -> (i32, i32) {
    %c0_i32 = arith.constant 0 : i32
    %c0_i32_0 = arith.constant 0 : i32
    return %arg0, %c0_i32 : i32, i32
  }
  func.func @transform_1(%arg0: i32) -> (i32, i32) {
    %c0_i32 = arith.constant 0 : i32
    %c0_i32_0 = arith.constant 0 : i32
    %c0_i32_1 = arith.constant 0 : i32
    return %c0_i32, %c0_i32_0 : i32, i32
  }
  func.func @transform_2(%arg0: i32) -> (i32, i32) {
    %c0_i32 = arith.constant 0 : i32
    %c0_i32_0 = arith.constant 0 : i32
    %c0_i32_1 = arith.constant 0 : i32
    return %c0_i32, %c0_i32_0 : i32, i32
  }
  func.func @transform_3(%arg0: i32) -> (i32, i32) {
    %c0_i32 = arith.constant 0 : i32
    %c0_i32_0 = arith.constant 0 : i32
    %c0_i32_1 = arith.constant 0 : i32
    return %c0_i32, %c0_i32_0 : i32, i32
  }
  func.func @transform_4(%arg0: i32) -> (i32, i32) {
    %c0_i32 = arith.constant 0 : i32
    %c0_i32_0 = arith.constant 0 : i32
    return %arg0, %c0_i32 : i32, i32
  }
}

module attributes {stable_mosaic.version = 11 : i64} {
  func.func @_maxpool9_kernel(%arg0: i32, %arg1: memref<32x8xf32, #tpu.memory_space<vmem>>, %arg2: memref<32x8xf32, #tpu.memory_space<vmem>>, %arg3: memref<32x8xf32, #tpu.memory_space<vmem>>, %arg4: memref<32x8xf32, #tpu.memory_space<vmem>>, %arg5: memref<32x8xf32, #tpu.memory_space<vmem>>, %arg6: memref<32x8xf32, #tpu.memory_space<vmem>>, %arg7: memref<32x8xf32, #tpu.memory_space<vmem>>, %arg8: memref<32x8xf32, #tpu.memory_space<vmem>>, %arg9: memref<32x8xf32, #tpu.memory_space<vmem>>, %arg10: memref<32x8xf32, #tpu.memory_space<vmem>>) attributes {dimension_semantics = [#tpu.dimension_semantics<parallel>], iteration_bounds = array<i64: 2>, scalar_prefetch = 0 : i64, scratch_operands = 0 : i64, tpu.core_type = #tpu.core_type<tc>, window_params = [{transform_indices = @transform_0, window_bounds = array<i64: 32, 8>}, {transform_indices = @transform_1, window_bounds = array<i64: 32, 8>}, {transform_indices = @transform_2, window_bounds = array<i64: 32, 8>}, {transform_indices = @transform_3, window_bounds = array<i64: 32, 8>}, {transform_indices = @transform_4, window_bounds = array<i64: 32, 8>}, {transform_indices = @transform_5, window_bounds = array<i64: 32, 8>}, {transform_indices = @transform_6, window_bounds = array<i64: 32, 8>}, {transform_indices = @transform_7, window_bounds = array<i64: 32, 8>}, {transform_indices = @transform_8, window_bounds = array<i64: 32, 8>}, {transform_indices = @transform_9, window_bounds = array<i64: 32, 8>}]} {
    %c0 = arith.constant 0 : index
    %c0_0 = arith.constant 0 : index
    %0 = vector.load %arg1[%c0, %c0_0] : memref<32x8xf32, #tpu.memory_space<vmem>>, vector<32x8xf32>
    %c0_1 = arith.constant 0 : index
    %c0_2 = arith.constant 0 : index
    %1 = vector.load %arg2[%c0_1, %c0_2] : memref<32x8xf32, #tpu.memory_space<vmem>>, vector<32x8xf32>
    %2 = arith.maximumf %0, %1 : vector<32x8xf32>
    %c0_3 = arith.constant 0 : index
    %c0_4 = arith.constant 0 : index
    %3 = vector.load %arg3[%c0_3, %c0_4] : memref<32x8xf32, #tpu.memory_space<vmem>>, vector<32x8xf32>
    %4 = arith.maximumf %2, %3 : vector<32x8xf32>
    %c0_5 = arith.constant 0 : index
    %c0_6 = arith.constant 0 : index
    %5 = vector.load %arg4[%c0_5, %c0_6] : memref<32x8xf32, #tpu.memory_space<vmem>>, vector<32x8xf32>
    %6 = arith.maximumf %4, %5 : vector<32x8xf32>
    %c0_7 = arith.constant 0 : index
    %c0_8 = arith.constant 0 : index
    %7 = vector.load %arg5[%c0_7, %c0_8] : memref<32x8xf32, #tpu.memory_space<vmem>>, vector<32x8xf32>
    %8 = arith.maximumf %6, %7 : vector<32x8xf32>
    %c0_9 = arith.constant 0 : index
    %c0_10 = arith.constant 0 : index
    %9 = vector.load %arg6[%c0_9, %c0_10] : memref<32x8xf32, #tpu.memory_space<vmem>>, vector<32x8xf32>
    %10 = arith.maximumf %8, %9 : vector<32x8xf32>
    %c0_11 = arith.constant 0 : index
    %c0_12 = arith.constant 0 : index
    %11 = vector.load %arg7[%c0_11, %c0_12] : memref<32x8xf32, #tpu.memory_space<vmem>>, vector<32x8xf32>
    %12 = arith.maximumf %10, %11 : vector<32x8xf32>
    %c0_13 = arith.constant 0 : index
    %c0_14 = arith.constant 0 : index
    %13 = vector.load %arg8[%c0_13, %c0_14] : memref<32x8xf32, #tpu.memory_space<vmem>>, vector<32x8xf32>
    %14 = arith.maximumf %12, %13 : vector<32x8xf32>
    %c0_15 = arith.constant 0 : index
    %c0_16 = arith.constant 0 : index
    %15 = vector.load %arg9[%c0_15, %c0_16] : memref<32x8xf32, #tpu.memory_space<vmem>>, vector<32x8xf32>
    %16 = arith.maximumf %14, %15 : vector<32x8xf32>
    %c0_17 = arith.constant 0 : index
    %c0_18 = arith.constant 0 : index
    %17 = vector.load %arg10[%c0_17, %c0_18] : memref<32x8xf32, #tpu.memory_space<vmem>>, vector<32x8xf32>
    tpu.vector_store %arg10[%c0_17, %c0_18], %16 {strides = array<i32>} : memref<32x8xf32, #tpu.memory_space<vmem>>, vector<32x8xf32>,
    return
  }
  func.func @transform_0(%arg0: i32) -> (i32, i32) {
    %c0_i32 = arith.constant 0 : i32
    %c0_i32_0 = arith.constant 0 : i32
    return %arg0, %c0_i32 : i32, i32
  }
  func.func @transform_1(%arg0: i32) -> (i32, i32) {
    %c0_i32 = arith.constant 0 : i32
    %c0_i32_0 = arith.constant 0 : i32
    return %arg0, %c0_i32 : i32, i32
  }
  func.func @transform_2(%arg0: i32) -> (i32, i32) {
    %c0_i32 = arith.constant 0 : i32
    %c0_i32_0 = arith.constant 0 : i32
    return %arg0, %c0_i32 : i32, i32
  }
  func.func @transform_3(%arg0: i32) -> (i32, i32) {
    %c0_i32 = arith.constant 0 : i32
    %c0_i32_0 = arith.constant 0 : i32
    return %arg0, %c0_i32 : i32, i32
  }
  func.func @transform_4(%arg0: i32) -> (i32, i32) {
    %c0_i32 = arith.constant 0 : i32
    %c0_i32_0 = arith.constant 0 : i32
    return %arg0, %c0_i32 : i32, i32
  }
  func.func @transform_5(%arg0: i32) -> (i32, i32) {
    %c0_i32 = arith.constant 0 : i32
    %c0_i32_0 = arith.constant 0 : i32
    return %arg0, %c0_i32 : i32, i32
  }
  func.func @transform_6(%arg0: i32) -> (i32, i32) {
    %c0_i32 = arith.constant 0 : i32
    %c0_i32_0 = arith.constant 0 : i32
    return %arg0, %c0_i32 : i32, i32
  }
  func.func @transform_7(%arg0: i32) -> (i32, i32) {
    %c0_i32 = arith.constant 0 : i32
    %c0_i32_0 = arith.constant 0 : i32
    return %arg0, %c0_i32 : i32, i32
  }
  func.func @transform_8(%arg0: i32) -> (i32, i32) {
    %c0_i32 = arith.constant 0 : i32
    %c0_i32_0 = arith.constant 0 : i32
    return %arg0, %c0_i32 : i32, i32
  }
  func.func @transform_9(%arg0: i32) -> (i32, i32) {
    %c0_i32 = arith.constant 0 : i32
    %c0_i32_0 = arith.constant 0 : i32
    return %arg0, %c0_i32 : i32, i32
  }
}

module attributes {stable_mosaic.version = 11 : i64} {
  func.func @_bottleneck_kernel(%arg0: i32, %arg1: memref<32x8xf32, #tpu.memory_space<vmem>>, %arg2: memref<1x8xf32, #tpu.memory_space<vmem>>, %arg3: memref<1x8xf32, #tpu.memory_space<vmem>>, %arg4: memref<8x16xf32, #tpu.memory_space<vmem>>, %arg5: memref<1x16xf32, #tpu.memory_space<vmem>>, %arg6: memref<1x16xf32, #tpu.memory_space<vmem>>, %arg7: memref<32x16xf32, #tpu.memory_space<vmem>>) attributes {dimension_semantics = [#tpu.dimension_semantics<parallel>], iteration_bounds = array<i64: 2>, scalar_prefetch = 0 : i64, scratch_operands = 0 : i64, tpu.core_type = #tpu.core_type<tc>, window_params = [{transform_indices = @transform_0, window_bounds = array<i64: 32, 8>}, {pipeline_mode = #tpu.pipeline_mode<synchronous>, transform_indices = @transform_1, window_bounds = array<i64: 1, 8>}, {pipeline_mode = #tpu.pipeline_mode<synchronous>, transform_indices = @transform_2, window_bounds = array<i64: 1, 8>}, {pipeline_mode = #tpu.pipeline_mode<synchronous>, transform_indices = @transform_3, window_bounds = array<i64: 8, 16>}, {pipeline_mode = #tpu.pipeline_mode<synchronous>, transform_indices = @transform_4, window_bounds = array<i64: 1, 16>}, {pipeline_mode = #tpu.pipeline_mode<synchronous>, transform_indices = @transform_5, window_bounds = array<i64: 1, 16>}, {transform_indices = @transform_6, window_bounds = array<i64: 32, 16>}]} {
    %c0 = arith.constant 0 : index
    %c0_0 = arith.constant 0 : index
    %0 = vector.load %arg1[%c0, %c0_0] : memref<32x8xf32, #tpu.memory_space<vmem>>, vector<32x8xf32>
    %c0_1 = arith.constant 0 : index
    %c0_2 = arith.constant 0 : index
    %1 = vector.load %arg2[%c0_1, %c0_2] : memref<1x8xf32, #tpu.memory_space<vmem>>, vector<1x8xf32>
    %2 = vector.broadcast %1 : vector<1x8xf32> to vector<32x8xf32>
    %3 = arith.mulf %0, %2 : vector<32x8xf32>
    %c0_3 = arith.constant 0 : index
    %c0_4 = arith.constant 0 : index
    %4 = vector.load %arg3[%c0_3, %c0_4] : memref<1x8xf32, #tpu.memory_space<vmem>>, vector<1x8xf32>
    %5 = vector.broadcast %4 : vector<1x8xf32> to vector<32x8xf32>
    %6 = arith.addf %3, %5 : vector<32x8xf32>
    %cst = arith.constant 0.000000e+00 : f32
    %7 = vector.broadcast %cst : f32 to vector<32x8xf32>
    %8 = arith.maximumf %6, %7 : vector<32x8xf32>
    %c0_5 = arith.constant 0 : index
    %c0_6 = arith.constant 0 : index
    %9 = vector.load %arg4[%c0_5, %c0_6] : memref<8x16xf32, #tpu.memory_space<vmem>>, vector<8x16xf32>
    %cst_7 = arith.constant dense<0.000000e+00> : vector<32x16xf32>
    %10 = tpu.matmul %8, %9, %cst_7 {dimension_numbers = #tpu.dot_dimension_numbers<[1], [0], [0], [1], [0, 0, 1, 1], [], []>} : vector<32x8xf32>, vector<8x16xf32>, vector<32x16xf32> -> vector<32x16xf32>
    %c0_8 = arith.constant 0 : index
    %c0_9 = arith.constant 0 : index
    %11 = vector.load %arg5[%c0_8, %c0_9] : memref<1x16xf32, #tpu.memory_space<vmem>>, vector<1x16xf32>
    %12 = vector.broadcast %11 : vector<1x16xf32> to vector<32x16xf32>
    %13 = arith.mulf %10, %12 : vector<32x16xf32>
    %c0_10 = arith.constant 0 : index
    %c0_11 = arith.constant 0 : index
    %14 = vector.load %arg6[%c0_10, %c0_11] : memref<1x16xf32, #tpu.memory_space<vmem>>, vector<1x16xf32>
    %15 = vector.broadcast %14 : vector<1x16xf32> to vector<32x16xf32>
    %16 = arith.addf %13, %15 : vector<32x16xf32>
    %cst_12 = arith.constant 0.000000e+00 : f32
    %17 = vector.broadcast %cst_12 : f32 to vector<32x16xf32>
    %18 = arith.maximumf %16, %17 : vector<32x16xf32>
    %c0_13 = arith.constant 0 : index
    %c0_14 = arith.constant 0 : index
    %19 = vector.load %arg7[%c0_13, %c0_14] : memref<32x16xf32, #tpu.memory_space<vmem>>, vector<32x16xf32>
    tpu.vector_store %arg7[%c0_13, %c0_14], %18 {strides = array<i32>} : memref<32x16xf32, #tpu.memory_space<vmem>>, vector<32x16xf32>,
    return
  }
  func.func @transform_0(%arg0: i32) -> (i32, i32) {
    %c0_i32 = arith.constant 0 : i32
    %c0_i32_0 = arith.constant 0 : i32
    return %arg0, %c0_i32 : i32, i32
  }
  func.func @transform_1(%arg0: i32) -> (i32, i32) {
    %c0_i32 = arith.constant 0 : i32
    %c0_i32_0 = arith.constant 0 : i32
    %c0_i32_1 = arith.constant 0 : i32
    return %c0_i32, %c0_i32_0 : i32, i32
  }
  func.func @transform_2(%arg0: i32) -> (i32, i32) {
    %c0_i32 = arith.constant 0 : i32
    %c0_i32_0 = arith.constant 0 : i32
    %c0_i32_1 = arith.constant 0 : i32
    return %c0_i32, %c0_i32_0 : i32, i32
  }
  func.func @transform_3(%arg0: i32) -> (i32, i32) {
    %c0_i32 = arith.constant 0 : i32
    %c0_i32_0 = arith.constant 0 : i32
    %c0_i32_1 = arith.constant 0 : i32
    return %c0_i32, %c0_i32_0 : i32, i32
  }
  func.func @transform_4(%arg0: i32) -> (i32, i32) {
    %c0_i32 = arith.constant 0 : i32
    %c0_i32_0 = arith.constant 0 : i32
    %c0_i32_1 = arith.constant 0 : i32
    return %c0_i32, %c0_i32_0 : i32, i32
  }
  func.func @transform_5(%arg0: i32) -> (i32, i32) {
    %c0_i32 = arith.constant 0 : i32
    %c0_i32_0 = arith.constant 0 : i32
    %c0_i32_1 = arith.constant 0 : i32
    return %c0_i32, %c0_i32_0 : i32, i32
  }
  func.func @transform_6(%arg0: i32) -> (i32, i32) {
    %c0_i32 = arith.constant 0 : i32
    %c0_i32_0 = arith.constant 0 : i32
    return %arg0, %c0_i32 : i32, i32
  }
}

module attributes {stable_mosaic.version = 11 : i64} {
  func.func @_bottleneck_kernel(%arg0: i32, %arg1: memref<32x16xf32, #tpu.memory_space<vmem>>, %arg2: memref<1x16xf32, #tpu.memory_space<vmem>>, %arg3: memref<1x16xf32, #tpu.memory_space<vmem>>, %arg4: memref<16x16xf32, #tpu.memory_space<vmem>>, %arg5: memref<1x16xf32, #tpu.memory_space<vmem>>, %arg6: memref<1x16xf32, #tpu.memory_space<vmem>>, %arg7: memref<32x16xf32, #tpu.memory_space<vmem>>) attributes {dimension_semantics = [#tpu.dimension_semantics<parallel>], iteration_bounds = array<i64: 2>, scalar_prefetch = 0 : i64, scratch_operands = 0 : i64, tpu.core_type = #tpu.core_type<tc>, window_params = [{transform_indices = @transform_0, window_bounds = array<i64: 32, 16>}, {pipeline_mode = #tpu.pipeline_mode<synchronous>, transform_indices = @transform_1, window_bounds = array<i64: 1, 16>}, {pipeline_mode = #tpu.pipeline_mode<synchronous>, transform_indices = @transform_2, window_bounds = array<i64: 1, 16>}, {pipeline_mode = #tpu.pipeline_mode<synchronous>, transform_indices = @transform_3, window_bounds = array<i64: 16, 16>}, {pipeline_mode = #tpu.pipeline_mode<synchronous>, transform_indices = @transform_4, window_bounds = array<i64: 1, 16>}, {pipeline_mode = #tpu.pipeline_mode<synchronous>, transform_indices = @transform_5, window_bounds = array<i64: 1, 16>}, {transform_indices = @transform_6, window_bounds = array<i64: 32, 16>}]} {
    %c0 = arith.constant 0 : index
    %c0_0 = arith.constant 0 : index
    %0 = vector.load %arg1[%c0, %c0_0] : memref<32x16xf32, #tpu.memory_space<vmem>>, vector<32x16xf32>
    %c0_1 = arith.constant 0 : index
    %c0_2 = arith.constant 0 : index
    %1 = vector.load %arg2[%c0_1, %c0_2] : memref<1x16xf32, #tpu.memory_space<vmem>>, vector<1x16xf32>
    %2 = vector.broadcast %1 : vector<1x16xf32> to vector<32x16xf32>
    %3 = arith.mulf %0, %2 : vector<32x16xf32>
    %c0_3 = arith.constant 0 : index
    %c0_4 = arith.constant 0 : index
    %4 = vector.load %arg3[%c0_3, %c0_4] : memref<1x16xf32, #tpu.memory_space<vmem>>, vector<1x16xf32>
    %5 = vector.broadcast %4 : vector<1x16xf32> to vector<32x16xf32>
    %6 = arith.addf %3, %5 : vector<32x16xf32>
    %cst = arith.constant 0.000000e+00 : f32
    %7 = vector.broadcast %cst : f32 to vector<32x16xf32>
    %8 = arith.maximumf %6, %7 : vector<32x16xf32>
    %c0_5 = arith.constant 0 : index
    %c0_6 = arith.constant 0 : index
    %9 = vector.load %arg4[%c0_5, %c0_6] : memref<16x16xf32, #tpu.memory_space<vmem>>, vector<16x16xf32>
    %cst_7 = arith.constant dense<0.000000e+00> : vector<32x16xf32>
    %10 = tpu.matmul %8, %9, %cst_7 {dimension_numbers = #tpu.dot_dimension_numbers<[1], [0], [0], [1], [0, 0, 1, 1], [], []>} : vector<32x16xf32>, vector<16x16xf32>, vector<32x16xf32> -> vector<32x16xf32>
    %c0_8 = arith.constant 0 : index
    %c0_9 = arith.constant 0 : index
    %11 = vector.load %arg5[%c0_8, %c0_9] : memref<1x16xf32, #tpu.memory_space<vmem>>, vector<1x16xf32>
    %12 = vector.broadcast %11 : vector<1x16xf32> to vector<32x16xf32>
    %13 = arith.mulf %10, %12 : vector<32x16xf32>
    %c0_10 = arith.constant 0 : index
    %c0_11 = arith.constant 0 : index
    %14 = vector.load %arg6[%c0_10, %c0_11] : memref<1x16xf32, #tpu.memory_space<vmem>>, vector<1x16xf32>
    %15 = vector.broadcast %14 : vector<1x16xf32> to vector<32x16xf32>
    %16 = arith.addf %13, %15 : vector<32x16xf32>
    %cst_12 = arith.constant 0.000000e+00 : f32
    %17 = vector.broadcast %cst_12 : f32 to vector<32x16xf32>
    %18 = arith.maximumf %16, %17 : vector<32x16xf32>
    %c0_13 = arith.constant 0 : index
    %c0_14 = arith.constant 0 : index
    %19 = vector.load %arg7[%c0_13, %c0_14] : memref<32x16xf32, #tpu.memory_space<vmem>>, vector<32x16xf32>
    tpu.vector_store %arg7[%c0_13, %c0_14], %18 {strides = array<i32>} : memref<32x16xf32, #tpu.memory_space<vmem>>, vector<32x16xf32>,
    return
  }
  func.func @transform_0(%arg0: i32) -> (i32, i32) {
    %c0_i32 = arith.constant 0 : i32
    %c0_i32_0 = arith.constant 0 : i32
    return %arg0, %c0_i32 : i32, i32
  }
  func.func @transform_1(%arg0: i32) -> (i32, i32) {
    %c0_i32 = arith.constant 0 : i32
    %c0_i32_0 = arith.constant 0 : i32
    %c0_i32_1 = arith.constant 0 : i32
    return %c0_i32, %c0_i32_0 : i32, i32
  }
  func.func @transform_2(%arg0: i32) -> (i32, i32) {
    %c0_i32 = arith.constant 0 : i32
    %c0_i32_0 = arith.constant 0 : i32
    %c0_i32_1 = arith.constant 0 : i32
    return %c0_i32, %c0_i32_0 : i32, i32
  }
  func.func @transform_3(%arg0: i32) -> (i32, i32) {
    %c0_i32 = arith.constant 0 : i32
    %c0_i32_0 = arith.constant 0 : i32
    %c0_i32_1 = arith.constant 0 : i32
    return %c0_i32, %c0_i32_0 : i32, i32
  }
  func.func @transform_4(%arg0: i32) -> (i32, i32) {
    %c0_i32 = arith.constant 0 : i32
    %c0_i32_0 = arith.constant 0 : i32
    %c0_i32_1 = arith.constant 0 : i32
    return %c0_i32, %c0_i32_0 : i32, i32
  }
  func.func @transform_5(%arg0: i32) -> (i32, i32) {
    %c0_i32 = arith.constant 0 : i32
    %c0_i32_0 = arith.constant 0 : i32
    %c0_i32_1 = arith.constant 0 : i32
    return %c0_i32, %c0_i32_0 : i32, i32
  }
  func.func @transform_6(%arg0: i32) -> (i32, i32) {
    %c0_i32 = arith.constant 0 : i32
    %c0_i32_0 = arith.constant 0 : i32
    return %arg0, %c0_i32 : i32, i32
  }
}

module attributes {stable_mosaic.version = 11 : i64} {
  func.func @_conv3x3_kernel(%arg0: i32, %arg1: memref<32x16xf32, #tpu.memory_space<vmem>>, %arg2: memref<32x16xf32, #tpu.memory_space<vmem>>, %arg3: memref<32x16xf32, #tpu.memory_space<vmem>>, %arg4: memref<32x16xf32, #tpu.memory_space<vmem>>, %arg5: memref<32x16xf32, #tpu.memory_space<vmem>>, %arg6: memref<32x16xf32, #tpu.memory_space<vmem>>, %arg7: memref<32x16xf32, #tpu.memory_space<vmem>>, %arg8: memref<32x16xf32, #tpu.memory_space<vmem>>, %arg9: memref<32x16xf32, #tpu.memory_space<vmem>>, %arg10: memref<144x8xf32, #tpu.memory_space<vmem>>, %arg11: memref<32x8xf32, #tpu.memory_space<vmem>>) attributes {dimension_semantics = [#tpu.dimension_semantics<parallel>], iteration_bounds = array<i64: 2>, scalar_prefetch = 0 : i64, scratch_operands = 0 : i64, tpu.core_type = #tpu.core_type<tc>, window_params = [{transform_indices = @transform_0, window_bounds = array<i64: 32, 16>}, {transform_indices = @transform_1, window_bounds = array<i64: 32, 16>}, {transform_indices = @transform_2, window_bounds = array<i64: 32, 16>}, {transform_indices = @transform_3, window_bounds = array<i64: 32, 16>}, {transform_indices = @transform_4, window_bounds = array<i64: 32, 16>}, {transform_indices = @transform_5, window_bounds = array<i64: 32, 16>}, {transform_indices = @transform_6, window_bounds = array<i64: 32, 16>}, {transform_indices = @transform_7, window_bounds = array<i64: 32, 16>}, {transform_indices = @transform_8, window_bounds = array<i64: 32, 16>}, {pipeline_mode = #tpu.pipeline_mode<synchronous>, transform_indices = @transform_9, window_bounds = array<i64: 144, 8>}, {transform_indices = @transform_10, window_bounds = array<i64: 32, 8>}]} {
    %c0 = arith.constant 0 : index
    %c0_0 = arith.constant 0 : index
    %0 = vector.load %arg1[%c0, %c0_0] : memref<32x16xf32, #tpu.memory_space<vmem>>, vector<32x16xf32>
    %c0_1 = arith.constant 0 : index
    %c0_2 = arith.constant 0 : index
    %1 = vector.load %arg10[%c0_1, %c0_2] : memref<144x8xf32, #tpu.memory_space<vmem>>, vector<16x8xf32>
    %cst = arith.constant dense<0.000000e+00> : vector<32x8xf32>
    %2 = tpu.matmul %0, %1, %cst {dimension_numbers = #tpu.dot_dimension_numbers<[1], [0], [0], [1], [0, 0, 1, 1], [], []>} : vector<32x16xf32>, vector<16x8xf32>, vector<32x8xf32> -> vector<32x8xf32>
    %c0_3 = arith.constant 0 : index
    %c0_4 = arith.constant 0 : index
    %3 = vector.load %arg2[%c0_3, %c0_4] : memref<32x16xf32, #tpu.memory_space<vmem>>, vector<32x16xf32>
    %c16 = arith.constant 16 : index
    %c0_5 = arith.constant 0 : index
    %4 = vector.load %arg10[%c16, %c0_5] : memref<144x8xf32, #tpu.memory_space<vmem>>, vector<16x8xf32>
    %cst_6 = arith.constant dense<0.000000e+00> : vector<32x8xf32>
    %5 = tpu.matmul %3, %4, %cst_6 {dimension_numbers = #tpu.dot_dimension_numbers<[1], [0], [0], [1], [0, 0, 1, 1], [], []>} : vector<32x16xf32>, vector<16x8xf32>, vector<32x8xf32> -> vector<32x8xf32>
    %6 = arith.addf %2, %5 : vector<32x8xf32>
    %c0_7 = arith.constant 0 : index
    %c0_8 = arith.constant 0 : index
    %7 = vector.load %arg3[%c0_7, %c0_8] : memref<32x16xf32, #tpu.memory_space<vmem>>, vector<32x16xf32>
    %c32 = arith.constant 32 : index
    %c0_9 = arith.constant 0 : index
    %8 = vector.load %arg10[%c32, %c0_9] : memref<144x8xf32, #tpu.memory_space<vmem>>, vector<16x8xf32>
    %cst_10 = arith.constant dense<0.000000e+00> : vector<32x8xf32>
    %9 = tpu.matmul %7, %8, %cst_10 {dimension_numbers = #tpu.dot_dimension_numbers<[1], [0], [0], [1], [0, 0, 1, 1], [], []>} : vector<32x16xf32>, vector<16x8xf32>, vector<32x8xf32> -> vector<32x8xf32>
    %10 = arith.addf %6, %9 : vector<32x8xf32>
    %c0_11 = arith.constant 0 : index
    %c0_12 = arith.constant 0 : index
    %11 = vector.load %arg4[%c0_11, %c0_12] : memref<32x16xf32, #tpu.memory_space<vmem>>, vector<32x16xf32>
    %c48 = arith.constant 48 : index
    %c0_13 = arith.constant 0 : index
    %12 = vector.load %arg10[%c48, %c0_13] : memref<144x8xf32, #tpu.memory_space<vmem>>, vector<16x8xf32>
    %cst_14 = arith.constant dense<0.000000e+00> : vector<32x8xf32>
    %13 = tpu.matmul %11, %12, %cst_14 {dimension_numbers = #tpu.dot_dimension_numbers<[1], [0], [0], [1], [0, 0, 1, 1], [], []>} : vector<32x16xf32>, vector<16x8xf32>, vector<32x8xf32> -> vector<32x8xf32>
    %14 = arith.addf %10, %13 : vector<32x8xf32>
    %c0_15 = arith.constant 0 : index
    %c0_16 = arith.constant 0 : index
    %15 = vector.load %arg5[%c0_15, %c0_16] : memref<32x16xf32, #tpu.memory_space<vmem>>, vector<32x16xf32>
    %c64 = arith.constant 64 : index
    %c0_17 = arith.constant 0 : index
    %16 = vector.load %arg10[%c64, %c0_17] : memref<144x8xf32, #tpu.memory_space<vmem>>, vector<16x8xf32>
    %cst_18 = arith.constant dense<0.000000e+00> : vector<32x8xf32>
    %17 = tpu.matmul %15, %16, %cst_18 {dimension_numbers = #tpu.dot_dimension_numbers<[1], [0], [0], [1], [0, 0, 1, 1], [], []>} : vector<32x16xf32>, vector<16x8xf32>, vector<32x8xf32> -> vector<32x8xf32>
    %18 = arith.addf %14, %17 : vector<32x8xf32>
    %c0_19 = arith.constant 0 : index
    %c0_20 = arith.constant 0 : index
    %19 = vector.load %arg6[%c0_19, %c0_20] : memref<32x16xf32, #tpu.memory_space<vmem>>, vector<32x16xf32>
    %c80 = arith.constant 80 : index
    %c0_21 = arith.constant 0 : index
    %20 = vector.load %arg10[%c80, %c0_21] : memref<144x8xf32, #tpu.memory_space<vmem>>, vector<16x8xf32>
    %cst_22 = arith.constant dense<0.000000e+00> : vector<32x8xf32>
    %21 = tpu.matmul %19, %20, %cst_22 {dimension_numbers = #tpu.dot_dimension_numbers<[1], [0], [0], [1], [0, 0, 1, 1], [], []>} : vector<32x16xf32>, vector<16x8xf32>, vector<32x8xf32> -> vector<32x8xf32>
    %22 = arith.addf %18, %21 : vector<32x8xf32>
    %c0_23 = arith.constant 0 : index
    %c0_24 = arith.constant 0 : index
    %23 = vector.load %arg7[%c0_23, %c0_24] : memref<32x16xf32, #tpu.memory_space<vmem>>, vector<32x16xf32>
    %c96 = arith.constant 96 : index
    %c0_25 = arith.constant 0 : index
    %24 = vector.load %arg10[%c96, %c0_25] : memref<144x8xf32, #tpu.memory_space<vmem>>, vector<16x8xf32>
    %cst_26 = arith.constant dense<0.000000e+00> : vector<32x8xf32>
    %25 = tpu.matmul %23, %24, %cst_26 {dimension_numbers = #tpu.dot_dimension_numbers<[1], [0], [0], [1], [0, 0, 1, 1], [], []>} : vector<32x16xf32>, vector<16x8xf32>, vector<32x8xf32> -> vector<32x8xf32>
    %26 = arith.addf %22, %25 : vector<32x8xf32>
    %c0_27 = arith.constant 0 : index
    %c0_28 = arith.constant 0 : index
    %27 = vector.load %arg8[%c0_27, %c0_28] : memref<32x16xf32, #tpu.memory_space<vmem>>, vector<32x16xf32>
    %c112 = arith.constant 112 : index
    %c0_29 = arith.constant 0 : index
    %28 = vector.load %arg10[%c112, %c0_29] : memref<144x8xf32, #tpu.memory_space<vmem>>, vector<16x8xf32>
    %cst_30 = arith.constant dense<0.000000e+00> : vector<32x8xf32>
    %29 = tpu.matmul %27, %28, %cst_30 {dimension_numbers = #tpu.dot_dimension_numbers<[1], [0], [0], [1], [0, 0, 1, 1], [], []>} : vector<32x16xf32>, vector<16x8xf32>, vector<32x8xf32> -> vector<32x8xf32>
    %30 = arith.addf %26, %29 : vector<32x8xf32>
    %c0_31 = arith.constant 0 : index
    %c0_32 = arith.constant 0 : index
    %31 = vector.load %arg9[%c0_31, %c0_32] : memref<32x16xf32, #tpu.memory_space<vmem>>, vector<32x16xf32>
    %c128 = arith.constant 128 : index
    %c0_33 = arith.constant 0 : index
    %32 = vector.load %arg10[%c128, %c0_33] : memref<144x8xf32, #tpu.memory_space<vmem>>, vector<16x8xf32>
    %cst_34 = arith.constant dense<0.000000e+00> : vector<32x8xf32>
    %33 = tpu.matmul %31, %32, %cst_34 {dimension_numbers = #tpu.dot_dimension_numbers<[1], [0], [0], [1], [0, 0, 1, 1], [], []>} : vector<32x16xf32>, vector<16x8xf32>, vector<32x8xf32> -> vector<32x8xf32>
    %34 = arith.addf %30, %33 : vector<32x8xf32>
    %c0_35 = arith.constant 0 : index
    %c0_36 = arith.constant 0 : index
    %35 = vector.load %arg11[%c0_35, %c0_36] : memref<32x8xf32, #tpu.memory_space<vmem>>, vector<32x8xf32>
    tpu.vector_store %arg11[%c0_35, %c0_36], %34 {strides = array<i32>} : memref<32x8xf32, #tpu.memory_space<vmem>>, vector<32x8xf32>,
    return
  }
  func.func @transform_0(%arg0: i32) -> (i32, i32) {
    %c0_i32 = arith.constant 0 : i32
    %c0_i32_0 = arith.constant 0 : i32
    return %arg0, %c0_i32 : i32, i32
  }
  func.func @transform_1(%arg0: i32) -> (i32, i32) {
    %c0_i32 = arith.constant 0 : i32
    %c0_i32_0 = arith.constant 0 : i32
    return %arg0, %c0_i32 : i32, i32
  }
  func.func @transform_2(%arg0: i32) -> (i32, i32) {
    %c0_i32 = arith.constant 0 : i32
    %c0_i32_0 = arith.constant 0 : i32
    return %arg0, %c0_i32 : i32, i32
  }
  func.func @transform_3(%arg0: i32) -> (i32, i32) {
    %c0_i32 = arith.constant 0 : i32
    %c0_i32_0 = arith.constant 0 : i32
    return %arg0, %c0_i32 : i32, i32
  }
  func.func @transform_4(%arg0: i32) -> (i32, i32) {
    %c0_i32 = arith.constant 0 : i32
    %c0_i32_0 = arith.constant 0 : i32
    return %arg0, %c0_i32 : i32, i32
  }
  func.func @transform_5(%arg0: i32) -> (i32, i32) {
    %c0_i32 = arith.constant 0 : i32
    %c0_i32_0 = arith.constant 0 : i32
    return %arg0, %c0_i32 : i32, i32
  }
  func.func @transform_6(%arg0: i32) -> (i32, i32) {
    %c0_i32 = arith.constant 0 : i32
    %c0_i32_0 = arith.constant 0 : i32
    return %arg0, %c0_i32 : i32, i32
  }
  func.func @transform_7(%arg0: i32) -> (i32, i32) {
    %c0_i32 = arith.constant 0 : i32
    %c0_i32_0 = arith.constant 0 : i32
    return %arg0, %c0_i32 : i32, i32
  }
  func.func @transform_8(%arg0: i32) -> (i32, i32) {
    %c0_i32 = arith.constant 0 : i32
    %c0_i32_0 = arith.constant 0 : i32
    return %arg0, %c0_i32 : i32, i32
  }
  func.func @transform_9(%arg0: i32) -> (i32, i32) {
    %c0_i32 = arith.constant 0 : i32
    %c0_i32_0 = arith.constant 0 : i32
    %c0_i32_1 = arith.constant 0 : i32
    return %c0_i32, %c0_i32_0 : i32, i32
  }
  func.func @transform_10(%arg0: i32) -> (i32, i32) {
    %c0_i32 = arith.constant 0 : i32
    %c0_i32_0 = arith.constant 0 : i32
    return %arg0, %c0_i32 : i32, i32
  }
}

module attributes {stable_mosaic.version = 11 : i64} {
  func.func @_transition_kernel(%arg0: i32, %arg1: memref<8x24xf32, #tpu.memory_space<vmem>>, %arg2: memref<8x24xf32, #tpu.memory_space<vmem>>, %arg3: memref<8x24xf32, #tpu.memory_space<vmem>>, %arg4: memref<8x24xf32, #tpu.memory_space<vmem>>, %arg5: memref<1x24xf32, #tpu.memory_space<vmem>>, %arg6: memref<1x24xf32, #tpu.memory_space<vmem>>, %arg7: memref<24x12xf32, #tpu.memory_space<vmem>>, %arg8: memref<8x12xf32, #tpu.memory_space<vmem>>) attributes {dimension_semantics = [#tpu.dimension_semantics<parallel>], iteration_bounds = array<i64: 2>, scalar_prefetch = 0 : i64, scratch_operands = 0 : i64, tpu.core_type = #tpu.core_type<tc>, window_params = [{transform_indices = @transform_0, window_bounds = array<i64: 8, 24>}, {transform_indices = @transform_1, window_bounds = array<i64: 8, 24>}, {transform_indices = @transform_2, window_bounds = array<i64: 8, 24>}, {transform_indices = @transform_3, window_bounds = array<i64: 8, 24>}, {pipeline_mode = #tpu.pipeline_mode<synchronous>, transform_indices = @transform_4, window_bounds = array<i64: 1, 24>}, {pipeline_mode = #tpu.pipeline_mode<synchronous>, transform_indices = @transform_5, window_bounds = array<i64: 1, 24>}, {pipeline_mode = #tpu.pipeline_mode<synchronous>, transform_indices = @transform_6, window_bounds = array<i64: 24, 12>}, {transform_indices = @transform_7, window_bounds = array<i64: 8, 12>}]} {
    %c0 = arith.constant 0 : index
    %c0_0 = arith.constant 0 : index
    %0 = vector.load %arg5[%c0, %c0_0] : memref<1x24xf32, #tpu.memory_space<vmem>>, vector<1x24xf32>
    %c0_1 = arith.constant 0 : index
    %c0_2 = arith.constant 0 : index
    %1 = vector.load %arg6[%c0_1, %c0_2] : memref<1x24xf32, #tpu.memory_space<vmem>>, vector<1x24xf32>
    %c0_3 = arith.constant 0 : index
    %c0_4 = arith.constant 0 : index
    %2 = vector.load %arg1[%c0_3, %c0_4] : memref<8x24xf32, #tpu.memory_space<vmem>>, vector<8x24xf32>
    %3 = vector.broadcast %0 : vector<1x24xf32> to vector<8x24xf32>
    %4 = arith.mulf %2, %3 : vector<8x24xf32>
    %5 = vector.broadcast %1 : vector<1x24xf32> to vector<8x24xf32>
    %6 = arith.addf %4, %5 : vector<8x24xf32>
    %cst = arith.constant 0.000000e+00 : f32
    %7 = vector.broadcast %cst : f32 to vector<8x24xf32>
    %8 = arith.maximumf %6, %7 : vector<8x24xf32>
    %c0_5 = arith.constant 0 : index
    %c0_6 = arith.constant 0 : index
    %9 = vector.load %arg2[%c0_5, %c0_6] : memref<8x24xf32, #tpu.memory_space<vmem>>, vector<8x24xf32>
    %10 = vector.broadcast %0 : vector<1x24xf32> to vector<8x24xf32>
    %11 = arith.mulf %9, %10 : vector<8x24xf32>
    %12 = vector.broadcast %1 : vector<1x24xf32> to vector<8x24xf32>
    %13 = arith.addf %11, %12 : vector<8x24xf32>
    %cst_7 = arith.constant 0.000000e+00 : f32
    %14 = vector.broadcast %cst_7 : f32 to vector<8x24xf32>
    %15 = arith.maximumf %13, %14 : vector<8x24xf32>
    %16 = arith.addf %8, %15 : vector<8x24xf32>
    %c0_8 = arith.constant 0 : index
    %c0_9 = arith.constant 0 : index
    %17 = vector.load %arg3[%c0_8, %c0_9] : memref<8x24xf32, #tpu.memory_space<vmem>>, vector<8x24xf32>
    %18 = vector.broadcast %0 : vector<1x24xf32> to vector<8x24xf32>
    %19 = arith.mulf %17, %18 : vector<8x24xf32>
    %20 = vector.broadcast %1 : vector<1x24xf32> to vector<8x24xf32>
    %21 = arith.addf %19, %20 : vector<8x24xf32>
    %cst_10 = arith.constant 0.000000e+00 : f32
    %22 = vector.broadcast %cst_10 : f32 to vector<8x24xf32>
    %23 = arith.maximumf %21, %22 : vector<8x24xf32>
    %24 = arith.addf %16, %23 : vector<8x24xf32>
    %c0_11 = arith.constant 0 : index
    %c0_12 = arith.constant 0 : index
    %25 = vector.load %arg4[%c0_11, %c0_12] : memref<8x24xf32, #tpu.memory_space<vmem>>, vector<8x24xf32>
    %26 = vector.broadcast %0 : vector<1x24xf32> to vector<8x24xf32>
    %27 = arith.mulf %25, %26 : vector<8x24xf32>
    %28 = vector.broadcast %1 : vector<1x24xf32> to vector<8x24xf32>
    %29 = arith.addf %27, %28 : vector<8x24xf32>
    %cst_13 = arith.constant 0.000000e+00 : f32
    %30 = vector.broadcast %cst_13 : f32 to vector<8x24xf32>
    %31 = arith.maximumf %29, %30 : vector<8x24xf32>
    %32 = arith.addf %24, %31 : vector<8x24xf32>
    %cst_14 = arith.constant 2.500000e-01 : f32
    %33 = vector.broadcast %cst_14 : f32 to vector<8x24xf32>
    %34 = arith.mulf %32, %33 : vector<8x24xf32>
    %c0_15 = arith.constant 0 : index
    %c0_16 = arith.constant 0 : index
    %35 = vector.load %arg7[%c0_15, %c0_16] : memref<24x12xf32, #tpu.memory_space<vmem>>, vector<24x12xf32>
    %cst_17 = arith.constant dense<0.000000e+00> : vector<8x12xf32>
    %36 = tpu.matmul %34, %35, %cst_17 {dimension_numbers = #tpu.dot_dimension_numbers<[1], [0], [0], [1], [0, 0, 1, 1], [], []>} : vector<8x24xf32>, vector<24x12xf32>, vector<8x12xf32> -> vector<8x12xf32>
    %c0_18 = arith.constant 0 : index
    %c0_19 = arith.constant 0 : index
    %37 = vector.load %arg8[%c0_18, %c0_19] : memref<8x12xf32, #tpu.memory_space<vmem>>, vector<8x12xf32>
    tpu.vector_store %arg8[%c0_18, %c0_19], %36 {strides = array<i32>} : memref<8x12xf32, #tpu.memory_space<vmem>>, vector<8x12xf32>,
    return
  }
  func.func @transform_0(%arg0: i32) -> (i32, i32) {
    %c0_i32 = arith.constant 0 : i32
    %c0_i32_0 = arith.constant 0 : i32
    return %arg0, %c0_i32 : i32, i32
  }
  func.func @transform_1(%arg0: i32) -> (i32, i32) {
    %c0_i32 = arith.constant 0 : i32
    %c0_i32_0 = arith.constant 0 : i32
    return %arg0, %c0_i32 : i32, i32
  }
  func.func @transform_2(%arg0: i32) -> (i32, i32) {
    %c0_i32 = arith.constant 0 : i32
    %c0_i32_0 = arith.constant 0 : i32
    return %arg0, %c0_i32 : i32, i32
  }
  func.func @transform_3(%arg0: i32) -> (i32, i32) {
    %c0_i32 = arith.constant 0 : i32
    %c0_i32_0 = arith.constant 0 : i32
    return %arg0, %c0_i32 : i32, i32
  }
  func.func @transform_4(%arg0: i32) -> (i32, i32) {
    %c0_i32 = arith.constant 0 : i32
    %c0_i32_0 = arith.constant 0 : i32
    %c0_i32_1 = arith.constant 0 : i32
    return %c0_i32, %c0_i32_0 : i32, i32
  }
  func.func @transform_5(%arg0: i32) -> (i32, i32) {
    %c0_i32 = arith.constant 0 : i32
    %c0_i32_0 = arith.constant 0 : i32
    %c0_i32_1 = arith.constant 0 : i32
    return %c0_i32, %c0_i32_0 : i32, i32
  }
  func.func @transform_6(%arg0: i32) -> (i32, i32) {
    %c0_i32 = arith.constant 0 : i32
    %c0_i32_0 = arith.constant 0 : i32
    %c0_i32_1 = arith.constant 0 : i32
    return %c0_i32, %c0_i32_0 : i32, i32
  }
  func.func @transform_7(%arg0: i32) -> (i32, i32) {
    %c0_i32 = arith.constant 0 : i32
    %c0_i32_0 = arith.constant 0 : i32
    return %arg0, %c0_i32 : i32, i32
  }
}

module attributes {stable_mosaic.version = 11 : i64} {
  func.func @_bottleneck_kernel(%arg0: i32, %arg1: memref<8x12xf32, #tpu.memory_space<vmem>>, %arg2: memref<1x12xf32, #tpu.memory_space<vmem>>, %arg3: memref<1x12xf32, #tpu.memory_space<vmem>>, %arg4: memref<12x16xf32, #tpu.memory_space<vmem>>, %arg5: memref<1x16xf32, #tpu.memory_space<vmem>>, %arg6: memref<1x16xf32, #tpu.memory_space<vmem>>, %arg7: memref<8x16xf32, #tpu.memory_space<vmem>>) attributes {dimension_semantics = [#tpu.dimension_semantics<parallel>], iteration_bounds = array<i64: 2>, scalar_prefetch = 0 : i64, scratch_operands = 0 : i64, tpu.core_type = #tpu.core_type<tc>, window_params = [{transform_indices = @transform_0, window_bounds = array<i64: 8, 12>}, {pipeline_mode = #tpu.pipeline_mode<synchronous>, transform_indices = @transform_1, window_bounds = array<i64: 1, 12>}, {pipeline_mode = #tpu.pipeline_mode<synchronous>, transform_indices = @transform_2, window_bounds = array<i64: 1, 12>}, {pipeline_mode = #tpu.pipeline_mode<synchronous>, transform_indices = @transform_3, window_bounds = array<i64: 12, 16>}, {pipeline_mode = #tpu.pipeline_mode<synchronous>, transform_indices = @transform_4, window_bounds = array<i64: 1, 16>}, {pipeline_mode = #tpu.pipeline_mode<synchronous>, transform_indices = @transform_5, window_bounds = array<i64: 1, 16>}, {transform_indices = @transform_6, window_bounds = array<i64: 8, 16>}]} {
    %c0 = arith.constant 0 : index
    %c0_0 = arith.constant 0 : index
    %0 = vector.load %arg1[%c0, %c0_0] : memref<8x12xf32, #tpu.memory_space<vmem>>, vector<8x12xf32>
    %c0_1 = arith.constant 0 : index
    %c0_2 = arith.constant 0 : index
    %1 = vector.load %arg2[%c0_1, %c0_2] : memref<1x12xf32, #tpu.memory_space<vmem>>, vector<1x12xf32>
    %2 = vector.broadcast %1 : vector<1x12xf32> to vector<8x12xf32>
    %3 = arith.mulf %0, %2 : vector<8x12xf32>
    %c0_3 = arith.constant 0 : index
    %c0_4 = arith.constant 0 : index
    %4 = vector.load %arg3[%c0_3, %c0_4] : memref<1x12xf32, #tpu.memory_space<vmem>>, vector<1x12xf32>
    %5 = vector.broadcast %4 : vector<1x12xf32> to vector<8x12xf32>
    %6 = arith.addf %3, %5 : vector<8x12xf32>
    %cst = arith.constant 0.000000e+00 : f32
    %7 = vector.broadcast %cst : f32 to vector<8x12xf32>
    %8 = arith.maximumf %6, %7 : vector<8x12xf32>
    %c0_5 = arith.constant 0 : index
    %c0_6 = arith.constant 0 : index
    %9 = vector.load %arg4[%c0_5, %c0_6] : memref<12x16xf32, #tpu.memory_space<vmem>>, vector<12x16xf32>
    %cst_7 = arith.constant dense<0.000000e+00> : vector<8x16xf32>
    %10 = tpu.matmul %8, %9, %cst_7 {dimension_numbers = #tpu.dot_dimension_numbers<[1], [0], [0], [1], [0, 0, 1, 1], [], []>} : vector<8x12xf32>, vector<12x16xf32>, vector<8x16xf32> -> vector<8x16xf32>
    %c0_8 = arith.constant 0 : index
    %c0_9 = arith.constant 0 : index
    %11 = vector.load %arg5[%c0_8, %c0_9] : memref<1x16xf32, #tpu.memory_space<vmem>>, vector<1x16xf32>
    %12 = vector.broadcast %11 : vector<1x16xf32> to vector<8x16xf32>
    %13 = arith.mulf %10, %12 : vector<8x16xf32>
    %c0_10 = arith.constant 0 : index
    %c0_11 = arith.constant 0 : index
    %14 = vector.load %arg6[%c0_10, %c0_11] : memref<1x16xf32, #tpu.memory_space<vmem>>, vector<1x16xf32>
    %15 = vector.broadcast %14 : vector<1x16xf32> to vector<8x16xf32>
    %16 = arith.addf %13, %15 : vector<8x16xf32>
    %cst_12 = arith.constant 0.000000e+00 : f32
    %17 = vector.broadcast %cst_12 : f32 to vector<8x16xf32>
    %18 = arith.maximumf %16, %17 : vector<8x16xf32>
    %c0_13 = arith.constant 0 : index
    %c0_14 = arith.constant 0 : index
    %19 = vector.load %arg7[%c0_13, %c0_14] : memref<8x16xf32, #tpu.memory_space<vmem>>, vector<8x16xf32>
    tpu.vector_store %arg7[%c0_13, %c0_14], %18 {strides = array<i32>} : memref<8x16xf32, #tpu.memory_space<vmem>>, vector<8x16xf32>,
    return
  }
  func.func @transform_0(%arg0: i32) -> (i32, i32) {
    %c0_i32 = arith.constant 0 : i32
    %c0_i32_0 = arith.constant 0 : i32
    return %arg0, %c0_i32 : i32, i32
  }
  func.func @transform_1(%arg0: i32) -> (i32, i32) {
    %c0_i32 = arith.constant 0 : i32
    %c0_i32_0 = arith.constant 0 : i32
    %c0_i32_1 = arith.constant 0 : i32
    return %c0_i32, %c0_i32_0 : i32, i32
  }
  func.func @transform_2(%arg0: i32) -> (i32, i32) {
    %c0_i32 = arith.constant 0 : i32
    %c0_i32_0 = arith.constant 0 : i32
    %c0_i32_1 = arith.constant 0 : i32
    return %c0_i32, %c0_i32_0 : i32, i32
  }
  func.func @transform_3(%arg0: i32) -> (i32, i32) {
    %c0_i32 = arith.constant 0 : i32
    %c0_i32_0 = arith.constant 0 : i32
    %c0_i32_1 = arith.constant 0 : i32
    return %c0_i32, %c0_i32_0 : i32, i32
  }
  func.func @transform_4(%arg0: i32) -> (i32, i32) {
    %c0_i32 = arith.constant 0 : i32
    %c0_i32_0 = arith.constant 0 : i32
    %c0_i32_1 = arith.constant 0 : i32
    return %c0_i32, %c0_i32_0 : i32, i32
  }
  func.func @transform_5(%arg0: i32) -> (i32, i32) {
    %c0_i32 = arith.constant 0 : i32
    %c0_i32_0 = arith.constant 0 : i32
    %c0_i32_1 = arith.constant 0 : i32
    return %c0_i32, %c0_i32_0 : i32, i32
  }
  func.func @transform_6(%arg0: i32) -> (i32, i32) {
    %c0_i32 = arith.constant 0 : i32
    %c0_i32_0 = arith.constant 0 : i32
    return %arg0, %c0_i32 : i32, i32
  }
}

module attributes {stable_mosaic.version = 11 : i64} {
  func.func @_conv3x3_kernel(%arg0: i32, %arg1: memref<8x16xf32, #tpu.memory_space<vmem>>, %arg2: memref<8x16xf32, #tpu.memory_space<vmem>>, %arg3: memref<8x16xf32, #tpu.memory_space<vmem>>, %arg4: memref<8x16xf32, #tpu.memory_space<vmem>>, %arg5: memref<8x16xf32, #tpu.memory_space<vmem>>, %arg6: memref<8x16xf32, #tpu.memory_space<vmem>>, %arg7: memref<8x16xf32, #tpu.memory_space<vmem>>, %arg8: memref<8x16xf32, #tpu.memory_space<vmem>>, %arg9: memref<8x16xf32, #tpu.memory_space<vmem>>, %arg10: memref<144x8xf32, #tpu.memory_space<vmem>>, %arg11: memref<8x8xf32, #tpu.memory_space<vmem>>) attributes {dimension_semantics = [#tpu.dimension_semantics<parallel>], iteration_bounds = array<i64: 2>, scalar_prefetch = 0 : i64, scratch_operands = 0 : i64, tpu.core_type = #tpu.core_type<tc>, window_params = [{transform_indices = @transform_0, window_bounds = array<i64: 8, 16>}, {transform_indices = @transform_1, window_bounds = array<i64: 8, 16>}, {transform_indices = @transform_2, window_bounds = array<i64: 8, 16>}, {transform_indices = @transform_3, window_bounds = array<i64: 8, 16>}, {transform_indices = @transform_4, window_bounds = array<i64: 8, 16>}, {transform_indices = @transform_5, window_bounds = array<i64: 8, 16>}, {transform_indices = @transform_6, window_bounds = array<i64: 8, 16>}, {transform_indices = @transform_7, window_bounds = array<i64: 8, 16>}, {transform_indices = @transform_8, window_bounds = array<i64: 8, 16>}, {pipeline_mode = #tpu.pipeline_mode<synchronous>, transform_indices = @transform_9, window_bounds = array<i64: 144, 8>}, {transform_indices = @transform_10, window_bounds = array<i64: 8, 8>}]} {
    %c0 = arith.constant 0 : index
    %c0_0 = arith.constant 0 : index
    %0 = vector.load %arg1[%c0, %c0_0] : memref<8x16xf32, #tpu.memory_space<vmem>>, vector<8x16xf32>
    %c0_1 = arith.constant 0 : index
    %c0_2 = arith.constant 0 : index
    %1 = vector.load %arg10[%c0_1, %c0_2] : memref<144x8xf32, #tpu.memory_space<vmem>>, vector<16x8xf32>
    %cst = arith.constant dense<0.000000e+00> : vector<8x8xf32>
    %2 = tpu.matmul %0, %1, %cst {dimension_numbers = #tpu.dot_dimension_numbers<[1], [0], [0], [1], [0, 0, 1, 1], [], []>} : vector<8x16xf32>, vector<16x8xf32>, vector<8x8xf32> -> vector<8x8xf32>
    %c0_3 = arith.constant 0 : index
    %c0_4 = arith.constant 0 : index
    %3 = vector.load %arg2[%c0_3, %c0_4] : memref<8x16xf32, #tpu.memory_space<vmem>>, vector<8x16xf32>
    %c16 = arith.constant 16 : index
    %c0_5 = arith.constant 0 : index
    %4 = vector.load %arg10[%c16, %c0_5] : memref<144x8xf32, #tpu.memory_space<vmem>>, vector<16x8xf32>
    %cst_6 = arith.constant dense<0.000000e+00> : vector<8x8xf32>
    %5 = tpu.matmul %3, %4, %cst_6 {dimension_numbers = #tpu.dot_dimension_numbers<[1], [0], [0], [1], [0, 0, 1, 1], [], []>} : vector<8x16xf32>, vector<16x8xf32>, vector<8x8xf32> -> vector<8x8xf32>
    %6 = arith.addf %2, %5 : vector<8x8xf32>
    %c0_7 = arith.constant 0 : index
    %c0_8 = arith.constant 0 : index
    %7 = vector.load %arg3[%c0_7, %c0_8] : memref<8x16xf32, #tpu.memory_space<vmem>>, vector<8x16xf32>
    %c32 = arith.constant 32 : index
    %c0_9 = arith.constant 0 : index
    %8 = vector.load %arg10[%c32, %c0_9] : memref<144x8xf32, #tpu.memory_space<vmem>>, vector<16x8xf32>
    %cst_10 = arith.constant dense<0.000000e+00> : vector<8x8xf32>
    %9 = tpu.matmul %7, %8, %cst_10 {dimension_numbers = #tpu.dot_dimension_numbers<[1], [0], [0], [1], [0, 0, 1, 1], [], []>} : vector<8x16xf32>, vector<16x8xf32>, vector<8x8xf32> -> vector<8x8xf32>
    %10 = arith.addf %6, %9 : vector<8x8xf32>
    %c0_11 = arith.constant 0 : index
    %c0_12 = arith.constant 0 : index
    %11 = vector.load %arg4[%c0_11, %c0_12] : memref<8x16xf32, #tpu.memory_space<vmem>>, vector<8x16xf32>
    %c48 = arith.constant 48 : index
    %c0_13 = arith.constant 0 : index
    %12 = vector.load %arg10[%c48, %c0_13] : memref<144x8xf32, #tpu.memory_space<vmem>>, vector<16x8xf32>
    %cst_14 = arith.constant dense<0.000000e+00> : vector<8x8xf32>
    %13 = tpu.matmul %11, %12, %cst_14 {dimension_numbers = #tpu.dot_dimension_numbers<[1], [0], [0], [1], [0, 0, 1, 1], [], []>} : vector<8x16xf32>, vector<16x8xf32>, vector<8x8xf32> -> vector<8x8xf32>
    %14 = arith.addf %10, %13 : vector<8x8xf32>
    %c0_15 = arith.constant 0 : index
    %c0_16 = arith.constant 0 : index
    %15 = vector.load %arg5[%c0_15, %c0_16] : memref<8x16xf32, #tpu.memory_space<vmem>>, vector<8x16xf32>
    %c64 = arith.constant 64 : index
    %c0_17 = arith.constant 0 : index
    %16 = vector.load %arg10[%c64, %c0_17] : memref<144x8xf32, #tpu.memory_space<vmem>>, vector<16x8xf32>
    %cst_18 = arith.constant dense<0.000000e+00> : vector<8x8xf32>
    %17 = tpu.matmul %15, %16, %cst_18 {dimension_numbers = #tpu.dot_dimension_numbers<[1], [0], [0], [1], [0, 0, 1, 1], [], []>} : vector<8x16xf32>, vector<16x8xf32>, vector<8x8xf32> -> vector<8x8xf32>
    %18 = arith.addf %14, %17 : vector<8x8xf32>
    %c0_19 = arith.constant 0 : index
    %c0_20 = arith.constant 0 : index
    %19 = vector.load %arg6[%c0_19, %c0_20] : memref<8x16xf32, #tpu.memory_space<vmem>>, vector<8x16xf32>
    %c80 = arith.constant 80 : index
    %c0_21 = arith.constant 0 : index
    %20 = vector.load %arg10[%c80, %c0_21] : memref<144x8xf32, #tpu.memory_space<vmem>>, vector<16x8xf32>
    %cst_22 = arith.constant dense<0.000000e+00> : vector<8x8xf32>
    %21 = tpu.matmul %19, %20, %cst_22 {dimension_numbers = #tpu.dot_dimension_numbers<[1], [0], [0], [1], [0, 0, 1, 1], [], []>} : vector<8x16xf32>, vector<16x8xf32>, vector<8x8xf32> -> vector<8x8xf32>
    %22 = arith.addf %18, %21 : vector<8x8xf32>
    %c0_23 = arith.constant 0 : index
    %c0_24 = arith.constant 0 : index
    %23 = vector.load %arg7[%c0_23, %c0_24] : memref<8x16xf32, #tpu.memory_space<vmem>>, vector<8x16xf32>
    %c96 = arith.constant 96 : index
    %c0_25 = arith.constant 0 : index
    %24 = vector.load %arg10[%c96, %c0_25] : memref<144x8xf32, #tpu.memory_space<vmem>>, vector<16x8xf32>
    %cst_26 = arith.constant dense<0.000000e+00> : vector<8x8xf32>
    %25 = tpu.matmul %23, %24, %cst_26 {dimension_numbers = #tpu.dot_dimension_numbers<[1], [0], [0], [1], [0, 0, 1, 1], [], []>} : vector<8x16xf32>, vector<16x8xf32>, vector<8x8xf32> -> vector<8x8xf32>
    %26 = arith.addf %22, %25 : vector<8x8xf32>
    %c0_27 = arith.constant 0 : index
    %c0_28 = arith.constant 0 : index
    %27 = vector.load %arg8[%c0_27, %c0_28] : memref<8x16xf32, #tpu.memory_space<vmem>>, vector<8x16xf32>
    %c112 = arith.constant 112 : index
    %c0_29 = arith.constant 0 : index
    %28 = vector.load %arg10[%c112, %c0_29] : memref<144x8xf32, #tpu.memory_space<vmem>>, vector<16x8xf32>
    %cst_30 = arith.constant dense<0.000000e+00> : vector<8x8xf32>
    %29 = tpu.matmul %27, %28, %cst_30 {dimension_numbers = #tpu.dot_dimension_numbers<[1], [0], [0], [1], [0, 0, 1, 1], [], []>} : vector<8x16xf32>, vector<16x8xf32>, vector<8x8xf32> -> vector<8x8xf32>
    %30 = arith.addf %26, %29 : vector<8x8xf32>
    %c0_31 = arith.constant 0 : index
    %c0_32 = arith.constant 0 : index
    %31 = vector.load %arg9[%c0_31, %c0_32] : memref<8x16xf32, #tpu.memory_space<vmem>>, vector<8x16xf32>
    %c128 = arith.constant 128 : index
    %c0_33 = arith.constant 0 : index
    %32 = vector.load %arg10[%c128, %c0_33] : memref<144x8xf32, #tpu.memory_space<vmem>>, vector<16x8xf32>
    %cst_34 = arith.constant dense<0.000000e+00> : vector<8x8xf32>
    %33 = tpu.matmul %31, %32, %cst_34 {dimension_numbers = #tpu.dot_dimension_numbers<[1], [0], [0], [1], [0, 0, 1, 1], [], []>} : vector<8x16xf32>, vector<16x8xf32>, vector<8x8xf32> -> vector<8x8xf32>
    %34 = arith.addf %30, %33 : vector<8x8xf32>
    %c0_35 = arith.constant 0 : index
    %c0_36 = arith.constant 0 : index
    %35 = vector.load %arg11[%c0_35, %c0_36] : memref<8x8xf32, #tpu.memory_space<vmem>>, vector<8x8xf32>
    tpu.vector_store %arg11[%c0_35, %c0_36], %34 {strides = array<i32>} : memref<8x8xf32, #tpu.memory_space<vmem>>, vector<8x8xf32>,
    return
  }
  func.func @transform_0(%arg0: i32) -> (i32, i32) {
    %c0_i32 = arith.constant 0 : i32
    %c0_i32_0 = arith.constant 0 : i32
    return %arg0, %c0_i32 : i32, i32
  }
  func.func @transform_1(%arg0: i32) -> (i32, i32) {
    %c0_i32 = arith.constant 0 : i32
    %c0_i32_0 = arith.constant 0 : i32
    return %arg0, %c0_i32 : i32, i32
  }
  func.func @transform_2(%arg0: i32) -> (i32, i32) {
    %c0_i32 = arith.constant 0 : i32
    %c0_i32_0 = arith.constant 0 : i32
    return %arg0, %c0_i32 : i32, i32
  }
  func.func @transform_3(%arg0: i32) -> (i32, i32) {
    %c0_i32 = arith.constant 0 : i32
    %c0_i32_0 = arith.constant 0 : i32
    return %arg0, %c0_i32 : i32, i32
  }
  func.func @transform_4(%arg0: i32) -> (i32, i32) {
    %c0_i32 = arith.constant 0 : i32
    %c0_i32_0 = arith.constant 0 : i32
    return %arg0, %c0_i32 : i32, i32
  }
  func.func @transform_5(%arg0: i32) -> (i32, i32) {
    %c0_i32 = arith.constant 0 : i32
    %c0_i32_0 = arith.constant 0 : i32
    return %arg0, %c0_i32 : i32, i32
  }
  func.func @transform_6(%arg0: i32) -> (i32, i32) {
    %c0_i32 = arith.constant 0 : i32
    %c0_i32_0 = arith.constant 0 : i32
    return %arg0, %c0_i32 : i32, i32
  }
  func.func @transform_7(%arg0: i32) -> (i32, i32) {
    %c0_i32 = arith.constant 0 : i32
    %c0_i32_0 = arith.constant 0 : i32
    return %arg0, %c0_i32 : i32, i32
  }
  func.func @transform_8(%arg0: i32) -> (i32, i32) {
    %c0_i32 = arith.constant 0 : i32
    %c0_i32_0 = arith.constant 0 : i32
    return %arg0, %c0_i32 : i32, i32
  }
  func.func @transform_9(%arg0: i32) -> (i32, i32) {
    %c0_i32 = arith.constant 0 : i32
    %c0_i32_0 = arith.constant 0 : i32
    %c0_i32_1 = arith.constant 0 : i32
    return %c0_i32, %c0_i32_0 : i32, i32
  }
  func.func @transform_10(%arg0: i32) -> (i32, i32) {
    %c0_i32 = arith.constant 0 : i32
    %c0_i32_0 = arith.constant 0 : i32
    return %arg0, %c0_i32 : i32, i32
  }
}

module attributes {stable_mosaic.version = 11 : i64} {
  func.func @_bottleneck_kernel(%arg0: i32, %arg1: memref<8x20xf32, #tpu.memory_space<vmem>>, %arg2: memref<1x20xf32, #tpu.memory_space<vmem>>, %arg3: memref<1x20xf32, #tpu.memory_space<vmem>>, %arg4: memref<20x16xf32, #tpu.memory_space<vmem>>, %arg5: memref<1x16xf32, #tpu.memory_space<vmem>>, %arg6: memref<1x16xf32, #tpu.memory_space<vmem>>, %arg7: memref<8x16xf32, #tpu.memory_space<vmem>>) attributes {dimension_semantics = [#tpu.dimension_semantics<parallel>], iteration_bounds = array<i64: 2>, scalar_prefetch = 0 : i64, scratch_operands = 0 : i64, tpu.core_type = #tpu.core_type<tc>, window_params = [{transform_indices = @transform_0, window_bounds = array<i64: 8, 20>}, {pipeline_mode = #tpu.pipeline_mode<synchronous>, transform_indices = @transform_1, window_bounds = array<i64: 1, 20>}, {pipeline_mode = #tpu.pipeline_mode<synchronous>, transform_indices = @transform_2, window_bounds = array<i64: 1, 20>}, {pipeline_mode = #tpu.pipeline_mode<synchronous>, transform_indices = @transform_3, window_bounds = array<i64: 20, 16>}, {pipeline_mode = #tpu.pipeline_mode<synchronous>, transform_indices = @transform_4, window_bounds = array<i64: 1, 16>}, {pipeline_mode = #tpu.pipeline_mode<synchronous>, transform_indices = @transform_5, window_bounds = array<i64: 1, 16>}, {transform_indices = @transform_6, window_bounds = array<i64: 8, 16>}]} {
    %c0 = arith.constant 0 : index
    %c0_0 = arith.constant 0 : index
    %0 = vector.load %arg1[%c0, %c0_0] : memref<8x20xf32, #tpu.memory_space<vmem>>, vector<8x20xf32>
    %c0_1 = arith.constant 0 : index
    %c0_2 = arith.constant 0 : index
    %1 = vector.load %arg2[%c0_1, %c0_2] : memref<1x20xf32, #tpu.memory_space<vmem>>, vector<1x20xf32>
    %2 = vector.broadcast %1 : vector<1x20xf32> to vector<8x20xf32>
    %3 = arith.mulf %0, %2 : vector<8x20xf32>
    %c0_3 = arith.constant 0 : index
    %c0_4 = arith.constant 0 : index
    %4 = vector.load %arg3[%c0_3, %c0_4] : memref<1x20xf32, #tpu.memory_space<vmem>>, vector<1x20xf32>
    %5 = vector.broadcast %4 : vector<1x20xf32> to vector<8x20xf32>
    %6 = arith.addf %3, %5 : vector<8x20xf32>
    %cst = arith.constant 0.000000e+00 : f32
    %7 = vector.broadcast %cst : f32 to vector<8x20xf32>
    %8 = arith.maximumf %6, %7 : vector<8x20xf32>
    %c0_5 = arith.constant 0 : index
    %c0_6 = arith.constant 0 : index
    %9 = vector.load %arg4[%c0_5, %c0_6] : memref<20x16xf32, #tpu.memory_space<vmem>>, vector<20x16xf32>
    %cst_7 = arith.constant dense<0.000000e+00> : vector<8x16xf32>
    %10 = tpu.matmul %8, %9, %cst_7 {dimension_numbers = #tpu.dot_dimension_numbers<[1], [0], [0], [1], [0, 0, 1, 1], [], []>} : vector<8x20xf32>, vector<20x16xf32>, vector<8x16xf32> -> vector<8x16xf32>
    %c0_8 = arith.constant 0 : index
    %c0_9 = arith.constant 0 : index
    %11 = vector.load %arg5[%c0_8, %c0_9] : memref<1x16xf32, #tpu.memory_space<vmem>>, vector<1x16xf32>
    %12 = vector.broadcast %11 : vector<1x16xf32> to vector<8x16xf32>
    %13 = arith.mulf %10, %12 : vector<8x16xf32>
    %c0_10 = arith.constant 0 : index
    %c0_11 = arith.constant 0 : index
    %14 = vector.load %arg6[%c0_10, %c0_11] : memref<1x16xf32, #tpu.memory_space<vmem>>, vector<1x16xf32>
    %15 = vector.broadcast %14 : vector<1x16xf32> to vector<8x16xf32>
    %16 = arith.addf %13, %15 : vector<8x16xf32>
    %cst_12 = arith.constant 0.000000e+00 : f32
    %17 = vector.broadcast %cst_12 : f32 to vector<8x16xf32>
    %18 = arith.maximumf %16, %17 : vector<8x16xf32>
    %c0_13 = arith.constant 0 : index
    %c0_14 = arith.constant 0 : index
    %19 = vector.load %arg7[%c0_13, %c0_14] : memref<8x16xf32, #tpu.memory_space<vmem>>, vector<8x16xf32>
    tpu.vector_store %arg7[%c0_13, %c0_14], %18 {strides = array<i32>} : memref<8x16xf32, #tpu.memory_space<vmem>>, vector<8x16xf32>,
    return
  }
  func.func @transform_0(%arg0: i32) -> (i32, i32) {
    %c0_i32 = arith.constant 0 : i32
    %c0_i32_0 = arith.constant 0 : i32
    return %arg0, %c0_i32 : i32, i32
  }
  func.func @transform_1(%arg0: i32) -> (i32, i32) {
    %c0_i32 = arith.constant 0 : i32
    %c0_i32_0 = arith.constant 0 : i32
    %c0_i32_1 = arith.constant 0 : i32
    return %c0_i32, %c0_i32_0 : i32, i32
  }
  func.func @transform_2(%arg0: i32) -> (i32, i32) {
    %c0_i32 = arith.constant 0 : i32
    %c0_i32_0 = arith.constant 0 : i32
    %c0_i32_1 = arith.constant 0 : i32
    return %c0_i32, %c0_i32_0 : i32, i32
  }
  func.func @transform_3(%arg0: i32) -> (i32, i32) {
    %c0_i32 = arith.constant 0 : i32
    %c0_i32_0 = arith.constant 0 : i32
    %c0_i32_1 = arith.constant 0 : i32
    return %c0_i32, %c0_i32_0 : i32, i32
  }
  func.func @transform_4(%arg0: i32) -> (i32, i32) {
    %c0_i32 = arith.constant 0 : i32
    %c0_i32_0 = arith.constant 0 : i32
    %c0_i32_1 = arith.constant 0 : i32
    return %c0_i32, %c0_i32_0 : i32, i32
  }
  func.func @transform_5(%arg0: i32) -> (i32, i32) {
    %c0_i32 = arith.constant 0 : i32
    %c0_i32_0 = arith.constant 0 : i32
    %c0_i32_1 = arith.constant 0 : i32
    return %c0_i32, %c0_i32_0 : i32, i32
  }
  func.func @transform_6(%arg0: i32) -> (i32, i32) {
    %c0_i32 = arith.constant 0 : i32
    %c0_i32_0 = arith.constant 0 : i32
    return %arg0, %c0_i32 : i32, i32
  }
}

module attributes {stable_mosaic.version = 11 : i64} {
  func.func @_head_kernel(%arg0: i32, %arg1: memref<1x8x28xf32, #tpu.memory_space<vmem>>, %arg2: memref<1x28xf32, #tpu.memory_space<vmem>>, %arg3: memref<1x28xf32, #tpu.memory_space<vmem>>, %arg4: memref<28x10xf32, #tpu.memory_space<vmem>>, %arg5: memref<1x10xf32, #tpu.memory_space<vmem>>, %arg6: memref<1x1x10xf32, #tpu.memory_space<vmem>>) attributes {dimension_semantics = [#tpu.dimension_semantics<parallel>], iteration_bounds = array<i64: 2>, scalar_prefetch = 0 : i64, scratch_operands = 0 : i64, tpu.core_type = #tpu.core_type<tc>, window_params = [{transform_indices = @transform_0, window_bounds = array<i64: 1, 8, 28>}, {pipeline_mode = #tpu.pipeline_mode<synchronous>, transform_indices = @transform_1, window_bounds = array<i64: 1, 28>}, {pipeline_mode = #tpu.pipeline_mode<synchronous>, transform_indices = @transform_2, window_bounds = array<i64: 1, 28>}, {pipeline_mode = #tpu.pipeline_mode<synchronous>, transform_indices = @transform_3, window_bounds = array<i64: 28, 10>}, {pipeline_mode = #tpu.pipeline_mode<synchronous>, transform_indices = @transform_4, window_bounds = array<i64: 1, 10>}, {transform_indices = @transform_5, window_bounds = array<i64: 1, 1, 10>}]} {
    %c0 = arith.constant 0 : index
    %c0_0 = arith.constant 0 : index
    %c0_1 = arith.constant 0 : index
    %0 = vector.load %arg1[%c0, %c0_0, %c0_1] : memref<1x8x28xf32, #tpu.memory_space<vmem>>, vector<1x8x28xf32>
    %1 = vector.shape_cast %0 : vector<1x8x28xf32> to vector<8x28xf32>
    %c0_2 = arith.constant 0 : index
    %c0_3 = arith.constant 0 : index
    %2 = vector.load %arg2[%c0_2, %c0_3] : memref<1x28xf32, #tpu.memory_space<vmem>>, vector<1x28xf32>
    %3 = vector.broadcast %2 : vector<1x28xf32> to vector<8x28xf32>
    %4 = arith.mulf %1, %3 : vector<8x28xf32>
    %c0_4 = arith.constant 0 : index
    %c0_5 = arith.constant 0 : index
    %5 = vector.load %arg3[%c0_4, %c0_5] : memref<1x28xf32, #tpu.memory_space<vmem>>, vector<1x28xf32>
    %6 = vector.broadcast %5 : vector<1x28xf32> to vector<8x28xf32>
    %7 = arith.addf %4, %6 : vector<8x28xf32>
    %cst = arith.constant 0.000000e+00 : f32
    %8 = vector.broadcast %cst : f32 to vector<8x28xf32>
    %9 = arith.maximumf %7, %8 : vector<8x28xf32>
    %cst_6 = arith.constant dense<0.000000e+00> : vector<28xf32>
    %10 = vector.multi_reduction <add>, %9, %cst_6 [0] : vector<8x28xf32> to vector<28xf32>
    %11 = vector.shape_cast %10 : vector<28xf32> to vector<1x28xf32>
    %cst_7 = arith.constant 8.000000e+00 : f32
    %12 = vector.broadcast %cst_7 : f32 to vector<1x28xf32>
    %13 = arith.divf %11, %12 : vector<1x28xf32>
    %c0_8 = arith.constant 0 : index
    %c0_9 = arith.constant 0 : index
    %14 = vector.load %arg4[%c0_8, %c0_9] : memref<28x10xf32, #tpu.memory_space<vmem>>, vector<28x10xf32>
    %cst_10 = arith.constant dense<0.000000e+00> : vector<1x10xf32>
    %15 = tpu.matmul %13, %14, %cst_10 {dimension_numbers = #tpu.dot_dimension_numbers<[1], [0], [0], [1], [0, 0, 1, 1], [], []>} : vector<1x28xf32>, vector<28x10xf32>, vector<1x10xf32> -> vector<1x10xf32>
    %c0_11 = arith.constant 0 : index
    %c0_12 = arith.constant 0 : index
    %16 = vector.load %arg5[%c0_11, %c0_12] : memref<1x10xf32, #tpu.memory_space<vmem>>, vector<1x10xf32>
    %17 = arith.addf %15, %16 : vector<1x10xf32>
    %c0_13 = arith.constant 0 : index
    %c0_14 = arith.constant 0 : index
    %c0_15 = arith.constant 0 : index
    %18 = vector.load %arg6[%c0_13, %c0_14, %c0_15] : memref<1x1x10xf32, #tpu.memory_space<vmem>>, vector<1x1x10xf32>
    %19 = vector.shape_cast %18 : vector<1x1x10xf32> to vector<1x10xf32>
    %20 = vector.shape_cast %17 : vector<1x10xf32> to vector<1x1x10xf32>
    tpu.vector_store %arg6[%c0_13, %c0_14, %c0_15], %20 {strides = array<i32>} : memref<1x1x10xf32, #tpu.memory_space<vmem>>, vector<1x1x10xf32>,
    return
  }
  func.func @transform_0(%arg0: i32) -> (i32, i32, i32) {
    %c0_i32 = arith.constant 0 : i32
    %c0_i32_0 = arith.constant 0 : i32
    %c0_i32_1 = arith.constant 0 : i32
    return %arg0, %c0_i32, %c0_i32_0 : i32, i32, i32
  }
  func.func @transform_1(%arg0: i32) -> (i32, i32) {
    %c0_i32 = arith.constant 0 : i32
    %c0_i32_0 = arith.constant 0 : i32
    %c0_i32_1 = arith.constant 0 : i32
    return %c0_i32, %c0_i32_0 : i32, i32
  }
  func.func @transform_2(%arg0: i32) -> (i32, i32) {
    %c0_i32 = arith.constant 0 : i32
    %c0_i32_0 = arith.constant 0 : i32
    %c0_i32_1 = arith.constant 0 : i32
    return %c0_i32, %c0_i32_0 : i32, i32
  }
  func.func @transform_3(%arg0: i32) -> (i32, i32) {
    %c0_i32 = arith.constant 0 : i32
    %c0_i32_0 = arith.constant 0 : i32
    %c0_i32_1 = arith.constant 0 : i32
    return %c0_i32, %c0_i32_0 : i32, i32
  }
  func.func @transform_4(%arg0: i32) -> (i32, i32) {
    %c0_i32 = arith.constant 0 : i32
    %c0_i32_0 = arith.constant 0 : i32
    %c0_i32_1 = arith.constant 0 : i32
    return %c0_i32, %c0_i32_0 : i32, i32
  }
  func.func @transform_5(%arg0: i32) -> (i32, i32, i32) {
    %c0_i32 = arith.constant 0 : i32
    %c0_i32_0 = arith.constant 0 : i32
    %c0_i32_1 = arith.constant 0 : i32
    return %arg0, %c0_i32, %c0_i32_0 : i32, i32, i32
  }
}

</mosaic_0001>

<bundles_post_ra>
// kernel: _lambda_.12
= control target key start
LH: loop header
LB: loop body
LE: loop exit
PB: predicated region body
PF: predicated region fallthrough
CT: control target
= control target key end

     0   :  { %s719_s15 = smov 0   ;;  %s993_s0 = inlined_call_operand.vmem [shape: f32[256,196], index: 0, kind: input, shape index: {}]   ;;  %s994_s1 = inlined_call_operand.vmem [shape: f32[196,8], index: 1, kind: input, shape index: {}]   ;;  %s995_s2 = inlined_call_operand.vmem [shape: f32[1,8], index: 2, kind: input, shape index: {}]   ;;  %s996_s3 = inlined_call_operand.vmem [shape: f32[1,8], index: 3, kind: input, shape index: {}]   ;;  %s997_s4 = inlined_call_operand.vmem [shape: f32[256,8], index: 4, kind: output, shape index: {}]  }
   0x1 LB: > { %s594_s16 = sadd.s32 4294967295, %s691_s15   ;;  %p598_p0 = scmp.ge.s32.totalorder %s691_s15, 1  ;;  %s691_s15 = sphi %s719_s15, %s14_s15  }
   0x2   : > { %p164_p1 = scmp.lt.s32.totalorder %s691_s15, 3 }
   0x4   : > { %p165_p2 = pnand %p598_p0, %p164_p1 }
   0x5   : > { %s599_s27 = sshll.u32 (!%p165_p2), %s594_s16, 4 }
   0x6   : > { %168 = sbr.rel (%p165_p2) target bundleno = 291 (0x123), region = 36  ;;  %p192_p3 = scmp.lt.s32.totalorder (!%p165_p2), %s599_s27, 31 }
   0xb   : > { %v251_v0 = vld [vmem:[%s994_s1 + $0x78] sm:$0xff]  ;;  %v693_v1 = vmov 0.0   ;;  %v250_v2 = vld [vmem:[%s994_s1 + $0x70] sm:$0xff]  ;;  %v249_v3 = vld [vmem:[%s994_s1 + $0x68] sm:$0xff]  ;;  %vm310_vm0 = vcmask 1043456   ;;  %s999_s27 = smov (!%p192_p3, %s599_s27), 31 }
   0xc   : > { %314 = vmatprep.subr.mxu0 %v693_v1  ;;  %626 = vmatprep.subr.mxu1 %v693_v1  ;;  %v248_v4 = vld [vmem:[%s994_s1 + $0x60] sm:$0xff]  ;;  %v247_v5 = vld [vmem:[%s994_s1 + $0x58] sm:$0xff]  ;;  %v246_v6 = vld [vmem:[%s994_s1 + $0x50] sm:$0xff]  ;;  %s625_s11 = sshll.u32 %s999_s27, 4  ;;  %vm261_vm1 = vcmask 556032   ;;  %s603_s28 = sshll.u32 %s999_s27, 3 }
   0xd   : > { %315 = vmatpush1.msra.mxu0 %v251_v0  ;;  %651 = vmatpush1.msra.mxu1 %v251_v0  ;;  %v245_v7 = vld [vmem:[%s994_s1 + $0x48] sm:$0xff]  ;;  %v244_v8 = vld [vmem:[%s994_s1 + $0x40] sm:$0xff]  ;;  %v243_v9 = vld [vmem:[%s994_s1 + $0x38] sm:$0xff]  ;;  %s853_s20 = scalar_lea.vmem %s993_s0, %s625_s11  ;;  %s928_s5 = scalar_lea.vmem %s997_s4, %s603_s28  ;;  %vm521_vm2 = vcmask 64512  }
   0xe   : > { %316 = vmatprep.subr.mxu0 %v693_v1  ;;  %627 = vmatprep.subr.mxu1 %v693_v1  ;;  %v242_v10 = vld [vmem:[%s994_s1 + $0x30] sm:$0xff]  ;;  %v241_v11 = vld [vmem:[%s994_s1 + $0x28] sm:$0xff]  ;;  %v240_v12 = vld [vmem:[%s994_s1 + $0x20] sm:$0xff] }
   0xf   : > { %317 = vmatpush1.msra.mxu0 %v250_v2  ;;  %652 = vmatpush1.msra.mxu1 %v250_v2  ;;  %v239_v13 = vld [vmem:[%s994_s1 + $0x18] sm:$0xff]  ;;  %v238_v14 = vld [vmem:[%s994_s1 + $0x10] sm:$0xff]  ;;  %v237_v15 = vld [vmem:[%s994_s1 + $0x8] sm:$0xff] }
  0x10   : > { %318 = vmatprep.subr.mxu0 %v693_v1  ;;  %628 = vmatprep.subr.mxu1 %v693_v1  ;;  %v236_v16 = vld [vmem:[%s994_s1] sm:$0xff]  ;;  %v259_v18 = vld [vmem:[%s994_s1 + $0xb8] sm:$0xff]  ;;  %v258_v19 = vld [vmem:[%s994_s1 + $0xb0] sm:$0xff] }
  0x11   : > { %319 = vmatpush1.msra.mxu0 %v249_v3  ;;  %653 = vmatpush1.msra.mxu1 %v249_v3  ;;  %v260_v17 = vld [vmem:[%s994_s1 + $0xc0] sm:$0xf]  ;;  %v257_v20 = vld [vmem:[%s994_s1 + $0xa8] sm:$0xff]  ;;  %v255_v22 = vld [vmem:[%s994_s1 + $0x98] sm:$0xff] }
  0x12   : > { %320 = vmatprep.subr.mxu0 %v693_v1  ;;  %629 = vmatprep.subr.mxu1 %v693_v1  ;;  %v256_v21 = vld [vmem:[%s994_s1 + $0xa0] sm:$0xff]  ;;  %v254_v23 = vld [vmem:[%s994_s1 + $0x90] sm:$0xff]  ;;  %v253_v24 = vld [vmem:[%s994_s1 + $0x88] sm:$0xff] }
  0x13   : > { %321 = vmatpush1.msra.mxu0 %v248_v4  ;;  %654 = vmatpush1.msra.mxu1 %v248_v4  ;;  %v252_v25 = vld [vmem:[%s994_s1 + $0x80] sm:$0xff]  ;;  %v205_v26 = vld [vmem:[%s853_s20 + $0x8] sm:$0xff]  ;;  %v207_v30 = vld [vmem:[%s853_s20 + $0x18] sm:$0xff] }
  0x14   : > { %322 = vmatprep.subr.mxu0 %v693_v1  ;;  %630 = vmatprep.subr.mxu1 %v693_v1  ;;  %v221_v27 = vld [vmem:[%s853_s20 + $0x88] sm:$0xff]  ;;  %v204_v28 = vld [vmem:[%s853_s20] sm:$0xff]  ;;  %v223_v31 = vld [vmem:[%s853_s20 + $0x98] sm:$0xff] }
  0x15   : > { %323 = vmatpush1.msra.mxu0 %v247_v5  ;;  %655 = vmatpush1.msra.mxu1 %v247_v5  ;;  %v220_v29 = vld [vmem:[%s853_s20 + $0x80] sm:$0xff]  ;;  %v206_v32 = vld [vmem:[%s853_s20 + $0x10] sm:$0xff]  ;;  %v209_v34 = vld [vmem:[%s853_s20 + $0x28] sm:$0xff] }
  0x16   : > { %324 = vmatprep.subr.mxu0 %v693_v1  ;;  %631 = vmatprep.subr.mxu1 %v693_v1  ;;  %v222_v33 = vld [vmem:[%s853_s20 + $0x90] sm:$0xff]  ;;  %v225_v35 = vld [vmem:[%s853_s20 + $0xa8] sm:$0xff]  ;;  %v208_v36 = vld [vmem:[%s853_s20 + $0x20] sm:$0xff] }
  0x17   : > { %325 = vmatpush1.msra.mxu0 %v246_v6  ;;  %656 = vmatpush1.msra.mxu1 %v246_v6  ;;  %v224_v37 = vld [vmem:[%s853_s20 + $0xa0] sm:$0xff]  ;;  %v211_v38 = vld [vmem:[%s853_s20 + $0x38] sm:$0xff]  ;;  %v210_v40 = vld [vmem:[%s853_s20 + $0x30] sm:$0xff] }
  0x18   : > { %326 = vmatprep.subr.mxu0 %v693_v1  ;;  %632 = vmatprep.subr.mxu1 %v693_v1  ;;  %v227_v39 = vld [vmem:[%s853_s20 + $0xb8] sm:$0xff]  ;;  %v226_v41 = vld [vmem:[%s853_s20 + $0xb0] sm:$0xff]  ;;  %v213_v42 = vld [vmem:[%s853_s20 + $0x48] sm:$0xff] }
  0x19   : > { %327 = vmatpush1.msra.mxu0 %v245_v7  ;;  %657 = vmatpush1.msra.mxu1 %v245_v7  ;;  %v229_v43 = vld [vmem:[%s853_s20 + $0xc8] sm:$0xff]  ;;  %v212_v44 = vld [vmem:[%s853_s20 + $0x40] sm:$0xff]  ;;  %v215_v46 = vld [vmem:[%s853_s20 + $0x58] sm:$0xff] }
  0x1a   : > { %328 = vmatprep.subr.mxu0 %v693_v1  ;;  %633 = vmatprep.subr.mxu1 %v693_v1  ;;  %v228_v45 = vld [vmem:[%s853_s20 + $0xc0] sm:$0xff]  ;;  %v231_v47 = vld [vmem:[%s853_s20 + $0xd8] sm:$0xff]  ;;  %v214_v48 = vld [vmem:[%s853_s20 + $0x50] sm:$0xff] }
  0x1b   : > { %329 = vmatpush1.msra.mxu0 %v244_v8  ;;  %658 = vmatpush1.msra.mxu1 %v244_v8  ;;  %v230_v49 = vld [vmem:[%s853_s20 + $0xd0] sm:$0xff]  ;;  %v217_v50 = vld [vmem:[%s853_s20 + $0x68] sm:$0xff]  ;;  %v216_v52 = vld [vmem:[%s853_s20 + $0x60] sm:$0xff] }
  0x1c   : > { %330 = vmatprep.subr.mxu0 %v693_v1  ;;  %634 = vmatprep.subr.mxu1 %v693_v1  ;;  %v233_v51 = vld [vmem:[%s853_s20 + $0xe8] sm:$0xff]  ;;  %v232_v53 = vld [vmem:[%s853_s20 + $0xe0] sm:$0xff]  ;;  %v219_v54 = vld [vmem:[%s853_s20 + $0x78] sm:$0xff] }
  0x1d   : > { %331 = vmatpush1.msra.mxu0 %v243_v9  ;;  %659 = vmatpush1.msra.mxu1 %v243_v9  ;;  %v235_v55 = vld [vmem:[%s853_s20 + $0xf8] sm:$0xff]  ;;  %v218_v56 = vld [vmem:[%s853_s20 + $0x70] sm:$0xff]  ;;  %v913_v58 = vld [vmem:[%s995_s2] ss:$0 sm:$0xff] }
  0x1e   : > { %332 = vmatprep.subr.mxu0 %v693_v1  ;;  %635 = vmatprep.subr.mxu1 %v693_v1  ;;  %v234_v57 = vld [vmem:[%s853_s20 + $0xf0] sm:$0xff]  ;;  %v918_v60 = vld [vmem:[%s996_s3] ss:$0 sm:$0xff] }
  0x1f   : > { %333 = vmatpush1.msra.mxu0 %v242_v10  ;;  %660 = vmatpush1.msra.mxu1 %v242_v10 }
  0x20   : > { %334 = vmatprep.subr.mxu0 %v693_v1  ;;  %636 = vmatprep.subr.mxu1 %v693_v1 }
  0x21   : > { %335 = vmatpush1.msra.mxu0 %v241_v11  ;;  %661 = vmatpush1.msra.mxu1 %v241_v11 }
  0x22   : > { %336 = vmatprep.subr.mxu0 %v693_v1  ;;  %637 = vmatprep.subr.mxu1 %v693_v1 }
  0x23   : > { %337 = vmatpush1.msra.mxu0 %v240_v12  ;;  %662 = vmatpush1.msra.mxu1 %v240_v12 }
  0x24   : > { %338 = vmatprep.subr.mxu0 %v693_v1  ;;  %638 = vmatprep.subr.mxu1 %v693_v1 }
  0x25   : > { %339 = vmatpush1.msra.mxu0 %v239_v13  ;;  %663 = vmatpush1.msra.mxu1 %v239_v13 }
  0x26   : > { %340 = vmatprep.subr.mxu0 %v693_v1  ;;  %639 = vmatprep.subr.mxu1 %v693_v1 }
  0x27   : > { %341 = vmatpush1.msra.mxu0 %v238_v14  ;;  %664 = vmatpush1.msra.mxu1 %v238_v14 }
  0x28   : > { %342 = vmatprep.subr.mxu0 %v693_v1  ;;  %640 = vmatprep.subr.mxu1 %v693_v1 }
  0x29   : > { %343 = vmatpush1.msra.mxu0 %v237_v15  ;;  %665 = vmatpush1.msra.mxu1 %v237_v15 }
  0x2a   : > { %344 = vmatprep.subr.mxu0 %v693_v1  ;;  %641 = vmatprep.subr.mxu1 %v693_v1 }
  0x2b   : > { %345 = vmatpush1.msra.mxu0 %v236_v16  ;;  %666 = vmatpush1.msra.mxu1 %v236_v16 }
  0x2c   : > { %360 = vmatprep.subr.mxu0 %v693_v1  ;;  %642 = vmatprep.subr.mxu1 %v693_v1 }
  0x2d   : > { %604 = vmatpush2.msk.msra.mxu0 %vm310_vm0, %v260_v17  ;;  %667 = vmatpush2.msk.msra.mxu1 %vm310_vm0, %v260_v17 }
  0x2e   : > { %362 = vmatprep.subr.mxu0 %v693_v1  ;;  %643 = vmatprep.subr.mxu1 %v693_v1 }
  0x2f   : > { %363 = vmatpush2.msra.mxu0 %v259_v18  ;;  %668 = vmatpush2.msra.mxu1 %v259_v18 }
  0x30   : > { %364 = vmatprep.subr.mxu0 %v693_v1  ;;  %644 = vmatprep.subr.mxu1 %v693_v1 }
  0x31   : > { %365 = vmatpush2.msra.mxu0 %v258_v19  ;;  %669 = vmatpush2.msra.mxu1 %v258_v19 }
  0x32   : > { %366 = vmatprep.subr.mxu0 %v693_v1  ;;  %645 = vmatprep.subr.mxu1 %v693_v1 }
  0x33   : > { %367 = vmatpush2.msra.mxu0 %v257_v20  ;;  %670 = vmatpush2.msra.mxu1 %v257_v20 }
  0x34   : > { %368 = vmatprep.subr.mxu0 %v693_v1  ;;  %646 = vmatprep.subr.mxu1 %v693_v1 }
  0x35   : > { %369 = vmatpush2.msra.mxu0 %v256_v21  ;;  %671 = vmatpush2.msra.mxu1 %v256_v21 }
  0x36   : > { %370 = vmatprep.subr.mxu0 %v693_v1  ;;  %647 = vmatprep.subr.mxu1 %v693_v1 }
  0x37   : > { %371 = vmatpush2.msra.mxu0 %v255_v22  ;;  %672 = vmatpush2.msra.mxu1 %v255_v22 }
  0x38   : > { %372 = vmatprep.subr.mxu0 %v693_v1  ;;  %648 = vmatprep.subr.mxu1 %v693_v1 }
  0x39   : > { %373 = vmatpush2.msra.mxu0 %v254_v23  ;;  %673 = vmatpush2.msra.mxu1 %v254_v23 }
  0x3a   : > { %374 = vmatprep.subr.mxu0 %v693_v1  ;;  %649 = vmatprep.subr.mxu1 %v693_v1 }
  0x3b   : > { %375 = vmatpush2.msra.mxu0 %v253_v24  ;;  %674 = vmatpush2.msra.mxu1 %v253_v24 }
  0x3c   : > { %376 = vmatprep.subr.mxu0 %v693_v1  ;;  %650 = vmatprep.subr.mxu1 %v693_v1 }
  0x3d   : > { %377 = vmatpush2.msra.mxu0 %v252_v25  ;;  %675 = vmatpush2.msra.mxu1 %v252_v25 }
  0x3e   : > { %605 = vmatprep.mubr.msk.f32.mxu0 %vm261_vm1, %v205_v26  ;;  %613 = vmatprep.mubr.msk.f32.mxu1 %vm261_vm1, %v221_v27 }
  0x3f   : > { %379 = vmatmul.mubr.f32.vlgmr.msra.gmra.mxu0 %v204_v28  ;;  %419 = vmatmul.mubr.f32.vlgmr.msra.gmra.mxu1 %v220_v29 }
  0x40   : > { %606 = vmatprep.mubr.msk.f32.mxu0 %vm261_vm1, %v207_v30  ;;  %614 = vmatprep.mubr.msk.f32.mxu1 %vm261_vm1, %v223_v31 }
  0x43   : > { %384 = vmatmul.mubr.f32.gmra.mxu0 %v206_v32  ;;  %424 = vmatmul.mubr.f32.gmra.mxu1 %v222_v33 }
  0x44   : > { %607 = vmatprep.mubr.msk.f32.mxu0 %vm261_vm1, %v209_v34  ;;  %615 = vmatprep.mubr.msk.f32.mxu1 %vm261_vm1, %v225_v35 }
  0x47   : > { %389 = vmatmul.mubr.f32.gmra.mxu0 %v208_v36  ;;  %429 = vmatmul.mubr.f32.gmra.mxu1 %v224_v37 }
  0x48   : > { %608 = vmatprep.mubr.msk.f32.mxu0 %vm261_vm1, %v211_v38  ;;  %616 = vmatprep.mubr.msk.f32.mxu1 %vm261_vm1, %v227_v39 }
  0x4b   : > { %394 = vmatmul.mubr.f32.gmra.mxu0 %v210_v40  ;;  %434 = vmatmul.mubr.f32.gmra.mxu1 %v226_v41 }
  0x4c   : > { %609 = vmatprep.mubr.msk.f32.mxu0 %vm261_vm1, %v213_v42  ;;  %617 = vmatprep.mubr.msk.f32.mxu1 %vm261_vm1, %v229_v43 }
  0x4f   : > { %399 = vmatmul.mubr.f32.gmra.mxu0 %v212_v44  ;;  %439 = vmatmul.mubr.f32.gmra.mxu1 %v228_v45 }
  0x50   : > { %610 = vmatprep.mubr.msk.f32.mxu0 %vm261_vm1, %v215_v46  ;;  %618 = vmatprep.mubr.msk.f32.mxu1 %vm261_vm1, %v231_v47 }
  0x53   : > { %404 = vmatmul.mubr.f32.gmra.mxu0 %v214_v48  ;;  %444 = vmatmul.mubr.f32.gmra.mxu1 %v230_v49 }
  0x54   : > { %611 = vmatprep.mubr.msk.f32.mxu0 %vm261_vm1, %v217_v50  ;;  %619 = vmatprep.mubr.msk.f32.mxu1 %vm261_vm1, %v233_v51 }
  0x57   : > { %409 = vmatmul.mubr.f32.gmra.mxu0 %v216_v52  ;;  %449 = vmatmul.mubr.f32.gmra.mxu1 %v232_v53 }
  0x58   : > { %612 = vmatprep.mubr.msk.f32.mxu0 %vm261_vm1, %v219_v54  ;;  %620 = vmatprep.mubr.msk.f32.mxu1 %vm261_vm1, %v235_v55 }
  0x5b   : > { %414 = vmatmul.mubr.f32.gmra.mxu0 %v218_v56  ;;  %454 = vmatmul.mubr.f32.gmra.mxu1 %v234_v57 }
  0xff   : > { %v380_v59 = vpop.f32.mrf.mxu0  ;;  %v420_v61 = vpop.f32.mrf.mxu1 }
 0x100   : > { %v466_v62 = vmul.f32 %v913_v58, %v380_v59  ;;  %v474_v63 = vmul.f32 %v913_v58, %v420_v61 }
 0x101   : > { %v382_v0 = vpop.f32.mrf.mxu0  ;;  %v422_v1 = vpop.f32.mrf.mxu1 }
 0x102   : > { %v489_v2 = vadd.f32 %v918_v60, %v466_v62  ;;  %v497_v3 = vadd.f32 %v918_v60, %v474_v63 }
 0x103   : > { %v385_v4 = vpop.f32.mrf.mxu0  ;;  %v425_v5 = vpop.f32.mrf.mxu1 }
 0x104   : > { %v505_v6 = vmax.f32 %v489_v2, 0.0  ;;  %v513_v7 = vmax.f32 %v497_v3, 0.0  ;;  %v467_v8 = vmul.f32 %v913_v58, %v385_v4  ;;  %v475_v9 = vmul.f32 %v913_v58, %v425_v5 }
 0x105   : > { %v387_v10 = vpop.f32.mrf.mxu0  ;;  %v427_v11 = vpop.f32.mrf.mxu1 }
 0x106   : > { %522 = vst.msk [vmem:[%s928_s5] sm:$0xff] %vm521_vm2, %v505_v6  ;;  %530 = vst.msk [vmem:[%s928_s5 + $0x40] sm:$0xff] %vm521_vm2, %v513_v7  ;;  %v490_v12 = vadd.f32 %v918_v60, %v467_v8  ;;  %v498_v13 = vadd.f32 %v918_v60, %v475_v9 }
 0x107   : > { %v390_v14 = vpop.f32.mrf.mxu0  ;;  %v430_v15 = vpop.f32.mrf.mxu1 }
 0x108   : > { %v506_v16 = vmax.f32 %v490_v12, 0.0  ;;  %v514_v17 = vmax.f32 %v498_v13, 0.0  ;;  %v468_v18 = vmul.f32 %v913_v58, %v390_v14  ;;  %v476_v19 = vmul.f32 %v913_v58, %v430_v15 }
 0x109   : > { %v392_v20 = vpop.f32.mrf.mxu0  ;;  %v432_v21 = vpop.f32.mrf.mxu1 }
 0x10a   : > { %523 = vst.msk [vmem:[%s928_s5 + $0x8] sm:$0xff] %vm521_vm2, %v506_v16  ;;  %531 = vst.msk [vmem:[%s928_s5 + $0x48] sm:$0xff] %vm521_vm2, %v514_v17  ;;  %v491_v22 = vadd.f32 %v918_v60, %v468_v18  ;;  %v499_v23 = vadd.f32 %v918_v60, %v476_v19 }
 0x10b   : > { %v395_v24 = vpop.f32.mrf.mxu0  ;;  %v435_v25 = vpop.f32.mrf.mxu1 }
 0x10c   : > { %v507_v26 = vmax.f32 %v491_v22, 0.0  ;;  %v515_v27 = vmax.f32 %v499_v23, 0.0  ;;  %v469_v28 = vmul.f32 %v913_v58, %v395_v24  ;;  %v477_v29 = vmul.f32 %v913_v58, %v435_v25 }
 0x10d   : > { %v397_v30 = vpop.f32.mrf.mxu0  ;;  %v437_v31 = vpop.f32.mrf.mxu1 }
 0x10e   : > { %524 = vst.msk [vmem:[%s928_s5 + $0x10] sm:$0xff] %vm521_vm2, %v507_v26  ;;  %532 = vst.msk [vmem:[%s928_s5 + $0x50] sm:$0xff] %vm521_vm2, %v515_v27  ;;  %v492_v32 = vadd.f32 %v918_v60, %v469_v28  ;;  %v500_v33 = vadd.f32 %v918_v60, %v477_v29 }
 0x10f   : > { %v400_v34 = vpop.f32.mrf.mxu0  ;;  %v440_v35 = vpop.f32.mrf.mxu1 }
 0x110   : > { %v508_v36 = vmax.f32 %v492_v32, 0.0  ;;  %v516_v37 = vmax.f32 %v500_v33, 0.0  ;;  %v470_v38 = vmul.f32 %v913_v58, %v400_v34  ;;  %v478_v39 = vmul.f32 %v913_v58, %v440_v35 }
 0x111   : > { %v402_v40 = vpop.f32.mrf.mxu0  ;;  %v442_v41 = vpop.f32.mrf.mxu1 }
 0x112   : > { %525 = vst.msk [vmem:[%s928_s5 + $0x18] sm:$0xff] %vm521_vm2, %v508_v36  ;;  %533 = vst.msk [vmem:[%s928_s5 + $0x58] sm:$0xff] %vm521_vm2, %v516_v37  ;;  %v493_v42 = vadd.f32 %v918_v60, %v470_v38  ;;  %v501_v43 = vadd.f32 %v918_v60, %v478_v39 }
 0x113   : > { %v405_v44 = vpop.f32.mrf.mxu0  ;;  %v445_v45 = vpop.f32.mrf.mxu1 }
 0x114   : > { %v509_v46 = vmax.f32 %v493_v42, 0.0  ;;  %v517_v47 = vmax.f32 %v501_v43, 0.0  ;;  %v471_v48 = vmul.f32 %v913_v58, %v405_v44  ;;  %v479_v49 = vmul.f32 %v913_v58, %v445_v45 }
 0x115   : > { %v407_v50 = vpop.f32.mrf.mxu0  ;;  %v447_v51 = vpop.f32.mrf.mxu1 }
 0x116   : > { %526 = vst.msk [vmem:[%s928_s5 + $0x20] sm:$0xff] %vm521_vm2, %v509_v46  ;;  %534 = vst.msk [vmem:[%s928_s5 + $0x60] sm:$0xff] %vm521_vm2, %v517_v47  ;;  %v494_v52 = vadd.f32 %v918_v60, %v471_v48  ;;  %v502_v53 = vadd.f32 %v918_v60, %v479_v49 }
 0x117   : > { %v410_v54 = vpop.f32.mrf.mxu0  ;;  %v450_v55 = vpop.f32.mrf.mxu1 }
 0x118   : > { %v510_v56 = vmax.f32 %v494_v52, 0.0  ;;  %v518_v57 = vmax.f32 %v502_v53, 0.0  ;;  %v472_v59 = vmul.f32 %v913_v58, %v410_v54  ;;  %v480_v61 = vmul.f32 %v913_v58, %v450_v55 }
 0x119   : > { %v412_v62 = vpop.f32.mrf.mxu0  ;;  %v452_v63 = vpop.f32.mrf.mxu1 }
 0x11a   : > { %527 = vst.msk [vmem:[%s928_s5 + $0x28] sm:$0xff] %vm521_vm2, %v510_v56  ;;  %535 = vst.msk [vmem:[%s928_s5 + $0x68] sm:$0xff] %vm521_vm2, %v518_v57  ;;  %v495_v0 = vadd.f32 %v918_v60, %v472_v59  ;;  %v503_v1 = vadd.f32 %v918_v60, %v480_v61 }
 0x11b   : > { %v415_v2 = vpop.f32.mrf.mxu0  ;;  %v455_v3 = vpop.f32.mrf.mxu1 }
 0x11c   : > { %v511_v4 = vmax.f32 %v495_v0, 0.0  ;;  %v519_v5 = vmax.f32 %v503_v1, 0.0  ;;  %v473_v6 = vmul.f32 %v913_v58, %v415_v2  ;;  %v481_v7 = vmul.f32 %v913_v58, %v455_v3 }
 0x11d   : > { %v417_v8 = vpop.f32.mrf.mxu0  ;;  %v457_v9 = vpop.f32.mrf.mxu1 }
 0x11e   : > { %528 = vst.msk [vmem:[%s928_s5 + $0x30] sm:$0xff] %vm521_vm2, %v511_v4  ;;  %536 = vst.msk [vmem:[%s928_s5 + $0x70] sm:$0xff] %vm521_vm2, %v519_v5  ;;  %v496_v10 = vadd.f32 %v918_v60, %v473_v6  ;;  %v504_v11 = vadd.f32 %v918_v60, %v481_v7 }
 0x120   : > { %v512_v12 = vmax.f32 %v496_v10, 0.0  ;;  %v520_v13 = vmax.f32 %v504_v11, 0.0 }
 0x122   : > { %529 = vst.msk [vmem:[%s928_s5 + $0x38] sm:$0xff] %vm521_vm2, %v512_v12  ;;  %537 = vst.msk [vmem:[%s928_s5 + $0x78] sm:$0xff] %vm521_vm2, %v520_v13 }
 0x123 PF: > { %s14_s15 = sadd.s32 1, %s691_s15  }
 0x124   : > { %p11_p4 = scmp.ge.s32.totalorder %s14_s15, 4  }
 0x126   :  { %13 = sbr.rel (!%p11_p4) target bundleno = 1 (0x1), region = 66 }

// kernel: _lambda_.13
= control target key start
LH: loop header
LB: loop body
LE: loop exit
PB: predicated region body
PF: predicated region fallthrough
CT: control target
= control target key end

     0   :  { %s830_s30 = smov 0   ;;  %s941_s0 = inlined_call_operand.vmem [shape: f32[64,8], index: 0, kind: input, shape index: {}]   ;;  %s942_s1 = inlined_call_operand.vmem [shape: f32[64,8], index: 1, kind: input, shape index: {}]   ;;  %s943_s2 = inlined_call_operand.vmem [shape: f32[64,8], index: 2, kind: input, shape index: {}]   ;;  %s944_s3 = inlined_call_operand.vmem [shape: f32[64,8], index: 3, kind: input, shape index: {}]   ;;  %s945_s4 = inlined_call_operand.vmem [shape: f32[64,8], index: 4, kind: input, shape index: {}]   ;;  %s946_s5 = inlined_call_operand.vmem [shape: f32[64,8], index: 5, kind: input, shape index: {}]   ;;  %s947_s6 = inlined_call_operand.vmem [shape: f32[64,8], index: 6, kind: input, shape index: {}]   ;;  %s948_s7 = inlined_call_operand.vmem [shape: f32[64,8], index: 7, kind: input, shape index: {}]   ;;  %s949_s8 = inlined_call_operand.vmem [shape: f32[64,8], index: 8, kind: input, shape index: {}]   ;;  %s950_s9 = inlined_call_operand.vmem [shape: f32[64,8], index: 9, kind: output, shape index: {}]  }
   0x1 LB: > { %s737_s10 = sadd.s32 4294967295, %s778_s30   ;;  %p741_p0 = scmp.ge.s32.totalorder %s778_s30, 1  ;;  %s778_s30 = sphi %s830_s30, %s19_s30  }
   0x2   : > { %p376_p1 = scmp.lt.s32.totalorder %s778_s30, 3 }
   0x4   : > { %p377_p2 = pnand %p741_p0, %p376_p1 }
   0x5   : > { %s742_s11 = sshll.u32 (!%p377_p2), %s737_s10, 2 }
   0x6   : > { %380 = sbr.rel (%p377_p2) target bundleno = 37 (0x25), region = 56  ;;  %p453_p3 = scmp.lt.s32.totalorder (!%p377_p2), %s742_s11, 7 }
   0xb   : > { %s952_s11 = smov (!%p453_p3, %s742_s11), 7  ;;  %vm580_vm0 = vcmask 64512  }
   0xc   : > { %s838_s12 = sshll.u32 %s952_s11, 3 }
   0xd   : > { %s844_s15 = scalar_lea.vmem %s941_s0, %s838_s12  ;;  %s850_s18 = scalar_lea.vmem %s942_s1, %s838_s12 }
   0xe   : > { %s856_s21 = scalar_lea.vmem %s943_s2, %s838_s12  ;;  %s862_s24 = scalar_lea.vmem %s944_s3, %s838_s12  ;;  %v512_v0 = vld [vmem:[%s844_s15] sm:$0xff]  ;;  %v513_v2 = vld [vmem:[%s844_s15 + $0x8] sm:$0xff]  ;;  %v514_v17 = vld [vmem:[%s844_s15 + $0x10] sm:$0xff] }
   0xf   : > { %v516_v1 = vld [vmem:[%s850_s18] sm:$0xff]  ;;  %s871_s27 = scalar_lea.vmem %s945_s4, %s838_s12  ;;  %v517_v5 = vld [vmem:[%s850_s18 + $0x8] sm:$0xff]  ;;  %s879_s10 = scalar_lea.vmem %s946_s5, %s838_s12  ;;  %v518_v18 = vld [vmem:[%s850_s18 + $0x10] sm:$0xff] }
  0x10   : > { %v520_v3 = vmax.f32 %v512_v0, %v516_v1  ;;  %v524_v4 = vld [vmem:[%s856_s21] sm:$0xff]  ;;  %v521_v7 = vmax.f32 %v513_v2, %v517_v5  ;;  %v525_v8 = vld [vmem:[%s856_s21 + $0x8] sm:$0xff]  ;;  %s889_s14 = scalar_lea.vmem %s947_s6, %s838_s12  ;;  %v526_v19 = vld [vmem:[%s856_s21 + $0x10] sm:$0xff]  ;;  %s900_s19 = scalar_lea.vmem %s948_s7, %s838_s12  ;;  %v522_v22 = vmax.f32 %v514_v17, %v518_v18 }
  0x11   : > { %v532_v6 = vld [vmem:[%s862_s24] sm:$0xff]  ;;  %v533_v10 = vld [vmem:[%s862_s24 + $0x8] sm:$0xff]  ;;  %v534_v26 = vld [vmem:[%s862_s24 + $0x10] sm:$0xff]  ;;  %s910_s23 = scalar_lea.vmem %s949_s8, %s838_s12 }
  0x12   : > { %v528_v9 = vmax.f32 %v520_v3, %v524_v4  ;;  %v540_v11 = vld [vmem:[%s871_s27] sm:$0xff]  ;;  %v529_v12 = vmax.f32 %v521_v7, %v525_v8  ;;  %v541_v15 = vld [vmem:[%s871_s27 + $0x8] sm:$0xff]  ;;  %v530_v28 = vmax.f32 %v522_v22, %v526_v19  ;;  %v515_v29 = vld [vmem:[%s844_s15 + $0x18] sm:$0xff] }
  0x13   : > { %v548_v14 = vld [vmem:[%s879_s10] sm:$0xff]  ;;  %v549_v21 = vld [vmem:[%s879_s10 + $0x8] sm:$0xff]  ;;  %v519_v30 = vld [vmem:[%s850_s18 + $0x18] sm:$0xff] }
  0x14   : > { %v536_v13 = vmax.f32 %v528_v9, %v532_v6  ;;  %v537_v16 = vmax.f32 %v529_v12, %v533_v10  ;;  %v556_v23 = vld [vmem:[%s889_s14] sm:$0xff]  ;;  %v557_v25 = vld [vmem:[%s889_s14 + $0x8] sm:$0xff]  ;;  %v527_v31 = vld [vmem:[%s856_s21 + $0x18] sm:$0xff]  ;;  %v523_v35 = vmax.f32 %v515_v29, %v519_v30  ;;  %v538_v38 = vmax.f32 %v530_v28, %v534_v26  ;;  %s510_s21 = scalar_lea.vmem %s950_s9, %s838_s12 }
  0x15   : > { %v564_v32 = vld [vmem:[%s900_s19] sm:$0xff]  ;;  %v542_v34 = vld [vmem:[%s871_s27 + $0x10] sm:$0xff]  ;;  %v565_v37 = vld [vmem:[%s900_s19 + $0x8] sm:$0xff] }
  0x16   : > { %v544_v20 = vmax.f32 %v536_v13, %v540_v11  ;;  %v545_v24 = vmax.f32 %v537_v16, %v541_v15  ;;  %v535_v39 = vld [vmem:[%s862_s24 + $0x18] sm:$0xff]  ;;  %v572_v40 = vld [vmem:[%s910_s23] sm:$0xff]  ;;  %v550_v42 = vld [vmem:[%s879_s10 + $0x10] sm:$0xff]  ;;  %v531_v43 = vmax.f32 %v523_v35, %v527_v31  ;;  %v546_v46 = vmax.f32 %v538_v38, %v542_v34 }
  0x17   : > { %v573_v45 = vld [vmem:[%s910_s23 + $0x8] sm:$0xff]  ;;  %v543_v47 = vld [vmem:[%s871_s27 + $0x18] sm:$0xff]  ;;  %v558_v49 = vld [vmem:[%s889_s14 + $0x10] sm:$0xff] }
  0x18   : > { %v552_v27 = vmax.f32 %v544_v20, %v548_v14  ;;  %v553_v33 = vmax.f32 %v545_v24, %v549_v21  ;;  %v539_v50 = vmax.f32 %v531_v43, %v535_v39  ;;  %v554_v52 = vmax.f32 %v546_v46, %v550_v42  ;;  %v551_v53 = vld [vmem:[%s879_s10 + $0x18] sm:$0xff]  ;;  %v566_v55 = vld [vmem:[%s900_s19 + $0x10] sm:$0xff] }
  0x19   : > { %v559_v58 = vld [vmem:[%s889_s14 + $0x18] sm:$0xff]  ;;  %v574_v59 = vld [vmem:[%s910_s23 + $0x10] sm:$0xff] }
  0x1a   : > { %v560_v36 = vmax.f32 %v552_v27, %v556_v23  ;;  %v561_v41 = vmax.f32 %v553_v33, %v557_v25  ;;  %v547_v56 = vmax.f32 %v539_v50, %v543_v47  ;;  %v562_v57 = vmax.f32 %v554_v52, %v558_v49  ;;  %v567_v62 = vld [vmem:[%s900_s19 + $0x18] sm:$0xff] }
  0x1b   : > { %v575_v1 = vld [vmem:[%s910_s23 + $0x18] sm:$0xff] }
  0x1c   : > { %v568_v44 = vmax.f32 %v560_v36, %v564_v32  ;;  %v569_v48 = vmax.f32 %v561_v41, %v565_v37  ;;  %v555_v60 = vmax.f32 %v547_v56, %v551_v53  ;;  %v570_v61 = vmax.f32 %v562_v57, %v566_v55 }
  0x1e   : > { %v576_v51 = vmax.f32 %v568_v44, %v572_v40  ;;  %v577_v54 = vmax.f32 %v569_v48, %v573_v45  ;;  %v563_v63 = vmax.f32 %v555_v60, %v559_v58  ;;  %v578_v0 = vmax.f32 %v570_v61, %v574_v59 }
  0x20   : > { %581 = vst.msk [vmem:[%s510_s21] sm:$0xff] %vm580_vm0, %v576_v51  ;;  %582 = vst.msk [vmem:[%s510_s21 + $0x8] sm:$0xff] %vm580_vm0, %v577_v54  ;;  %v571_v2 = vmax.f32 %v563_v63, %v567_v62 }
  0x21   : > { %583 = vst.msk [vmem:[%s510_s21 + $0x10] sm:$0xff] %vm580_vm0, %v578_v0 }
  0x22   : > { %v579_v3 = vmax.f32 %v571_v2, %v575_v1 }
  0x24   : > { %584 = vst.msk [vmem:[%s510_s21 + $0x18] sm:$0xff] %vm580_vm0, %v579_v3 }
  0x25 PF: > { %s19_s30 = sadd.s32 1, %s778_s30  }
  0x26   : > { %p16_p4 = scmp.ge.s32.totalorder %s19_s30, 4  }
  0x28   :  { %18 = sbr.rel (!%p16_p4) target bundleno = 1 (0x1), region = 110 }

// kernel: _lambda_.14
= control target key start
LH: loop header
LB: loop body
LE: loop exit
PB: predicated region body
PF: predicated region fallthrough
CT: control target
= control target key end

     0   :  { %s556_s21 = smov 0   ;;  %s595_s0 = inlined_call_operand.vmem [shape: f32[64,8], index: 0, kind: input, shape index: {}]   ;;  %s596_s1 = inlined_call_operand.vmem [shape: f32[1,8], index: 1, kind: input, shape index: {}]   ;;  %s597_s2 = inlined_call_operand.vmem [shape: f32[1,8], index: 2, kind: input, shape index: {}]   ;;  %s598_s3 = inlined_call_operand.vmem [shape: f32[8,16], index: 3, kind: input, shape index: {}]   ;;  %s599_s4 = inlined_call_operand.vmem [shape: f32[1,16], index: 4, kind: input, shape index: {}]   ;;  %s600_s5 = inlined_call_operand.vmem [shape: f32[1,16], index: 5, kind: input, shape index: {}]   ;;  %s601_s6 = inlined_call_operand.vmem [shape: f32[64,16], index: 6, kind: output, shape index: {}]  }
   0x1 LB: > { %s471_s22 = sadd.s32 4294967295, %s519_s21   ;;  %p475_p0 = scmp.ge.s32.totalorder %s519_s21, 1  ;;  %s519_s21 = sphi %s556_s21, %s16_s21  }
   0x2   : > { %p213_p1 = scmp.lt.s32.totalorder %s519_s21, 3 }
   0x4   : > { %p214_p2 = pnand %p475_p0, %p213_p1 }
   0x5   : > { %s476_s25 = sshll.u32 (!%p214_p2), %s471_s22, 2 }
   0x6   : > { %217 = sbr.rel (%p214_p2) target bundleno = 224 (0xe0), region = 44  ;;  %p244_p3 = scmp.lt.s32.totalorder (!%p214_p2), %s476_s25, 7 }
   0xb   : > { %v285_v0 = vld [vmem:[%s598_s3] sm:$0xff]  ;;  %s603_s25 = smov (!%p244_p3, %s476_s25), 7  ;;  %vm286_vm0 = vcmask 64512   ;;  %vm410_vm1 = vcmask 130048  }
   0xc   : > { %495 = vmatprep.subr.mxu0 %v285_v0  ;;  %503 = vmatprep.subr.mxu1 %v285_v0  ;;  %s477_s26 = sshll.u32 %s603_s25, 3  ;;  %v480_v1 = vld [vmem:[%s596_s1] ss:$0 sm:$0xff] }
   0xd   : > { %496 = vmatpush3.msra.mxu0 %v285_v0  ;;  %504 = vmatpush3.msra.mxu1 %v285_v0  ;;  %s247_s7 = scalar_lea.vmem %s595_s0, %s477_s26  ;;  %v481_v2 = vld [vmem:[%s597_s2] ss:$0 sm:$0xff]  ;;  %s253_s16 = scalar_lea.vmem %s601_s6, %s477_s26 }
   0xe   : > { %v255_v3 = vld [vmem:[%s247_s7] sm:$0xff]  ;;  %v257_v4 = vld [vmem:[%s247_s7 + $0x10] sm:$0xff]  ;;  %v256_v5 = vld [vmem:[%s247_s7 + $0x8] sm:$0xff] }
   0xf   : > { %v266_v6 = vmul.f32 %v480_v1, %v255_v3  ;;  %v268_v7 = vmul.f32 %v480_v1, %v257_v4  ;;  %v267_v8 = vmul.f32 %v480_v1, %v256_v5  ;;  %v258_v9 = vld [vmem:[%s247_s7 + $0x18] sm:$0xff]  ;;  %v486_v19 = vld [vmem:[%s599_s4] ss:$0 sm:$0xff] }
  0x10   : > { %v269_v10 = vmul.f32 %v480_v1, %v258_v9  ;;  %v487_v23 = vld [vmem:[%s600_s5] ss:$0 sm:$0xff] }
  0x11   : > { %v277_v11 = vadd.f32 %v481_v2, %v266_v6  ;;  %v279_v12 = vadd.f32 %v481_v2, %v268_v7  ;;  %v278_v13 = vadd.f32 %v481_v2, %v267_v8 }
  0x12   : > { %v280_v14 = vadd.f32 %v481_v2, %v269_v10 }
  0x13   : > { %v281_v15 = vmax.f32 %v277_v11, 0.0  ;;  %v283_v16 = vmax.f32 %v279_v12, 0.0  ;;  %v282_v17 = vmax.f32 %v278_v13, 0.0 }
  0x14   : > { %v284_v18 = vmax.f32 %v280_v14, 0.0 }
  0x15   : > { %497 = vmatprep.mubr.msk.f32.mxu0 %vm286_vm0, %v281_v15  ;;  %500 = vmatprep.mubr.msk.f32.mxu1 %vm286_vm0, %v283_v16 }
  0x16   : > { %498 = vmatmul.mubr.msk.f32.vlgmr.msra.gmra.mxu0 %vm286_vm0, %v282_v17  ;;  %501 = vmatmul.mubr.msk.f32.vlgmr.msra.gmra.mxu1 %vm286_vm0, %v284_v18 }
  0xd6   : > { %v499_v20 = vpop.f32.mrf.mxu0  ;;  %v502_v21 = vpop.f32.mrf.mxu1 }
  0xd7   : > { %v392_v22 = vmul.f32 %v499_v20, %v486_v19  ;;  %v394_v24 = vmul.f32 %v502_v21, %v486_v19 }
  0xd8   : > { %v365_v25 = vpop.f32.mrf.mxu0  ;;  %v375_v26 = vpop.f32.mrf.mxu1 }
  0xd9   : > { %v391_v27 = vmul.f32 %v486_v19, %v365_v25  ;;  %v393_v28 = vmul.f32 %v486_v19, %v375_v26  ;;  %v403_v29 = vadd.f32 %v487_v23, %v392_v22  ;;  %v405_v32 = vadd.f32 %v487_v23, %v394_v24 }
  0xdb   : > { %v402_v30 = vadd.f32 %v487_v23, %v391_v27  ;;  %v404_v31 = vadd.f32 %v487_v23, %v393_v28  ;;  %v407_v34 = vmax.f32 %v403_v29, 0.0  ;;  %v409_v36 = vmax.f32 %v405_v32, 0.0 }
  0xdd   : > { %v406_v33 = vmax.f32 %v402_v30, 0.0  ;;  %v408_v35 = vmax.f32 %v404_v31, 0.0  ;;  %412 = vst.msk [vmem:[%s253_s16 + $0x8] sm:$0xff] %vm410_vm1, %v407_v34  ;;  %414 = vst.msk [vmem:[%s253_s16 + $0x18] sm:$0xff] %vm410_vm1, %v409_v36 }
  0xdf   : > { %411 = vst.msk [vmem:[%s253_s16] sm:$0xff] %vm410_vm1, %v406_v33  ;;  %413 = vst.msk [vmem:[%s253_s16 + $0x10] sm:$0xff] %vm410_vm1, %v408_v35 }
  0xe0 PF: > { %s16_s21 = sadd.s32 1, %s519_s21  }
  0xe1   : > { %p13_p4 = scmp.ge.s32.totalorder %s16_s21, 4  }
  0xe3   :  { %15 = sbr.rel (!%p13_p4) target bundleno = 1 (0x1), region = 74 }

// kernel: _lambda_.16
= control target key start
LH: loop header
LB: loop body
LE: loop exit
PB: predicated region body
PF: predicated region fallthrough
CT: control target
= control target key end

     0   :  { %s561_s21 = smov 0   ;;  %s611_s0 = inlined_call_operand.vmem [shape: f32[64,16], index: 0, kind: input, shape index: {}]   ;;  %s612_s1 = inlined_call_operand.vmem [shape: f32[1,16], index: 1, kind: input, shape index: {}]   ;;  %s613_s2 = inlined_call_operand.vmem [shape: f32[1,16], index: 2, kind: input, shape index: {}]   ;;  %s614_s3 = inlined_call_operand.vmem [shape: f32[16,16], index: 3, kind: input, shape index: {}]   ;;  %s615_s4 = inlined_call_operand.vmem [shape: f32[1,16], index: 4, kind: input, shape index: {}]   ;;  %s616_s5 = inlined_call_operand.vmem [shape: f32[1,16], index: 5, kind: input, shape index: {}]   ;;  %s617_s6 = inlined_call_operand.vmem [shape: f32[64,16], index: 6, kind: output, shape index: {}]  }
   0x1 LB: > { %s471_s22 = sadd.s32 4294967295, %s524_s21   ;;  %p475_p0 = scmp.ge.s32.totalorder %s524_s21, 1  ;;  %s524_s21 = sphi %s561_s21, %s16_s21  }
   0x2   : > { %p213_p1 = scmp.lt.s32.totalorder %s524_s21, 3 }
   0x4   : > { %p214_p2 = pnand %p475_p0, %p213_p1 }
   0x5   : > { %s476_s27 = sshll.u32 (!%p214_p2), %s471_s22, 2 }
   0x6   : > { %217 = sbr.rel (%p214_p2) target bundleno = 224 (0xe0), region = 44  ;;  %p244_p3 = scmp.lt.s32.totalorder (!%p214_p2), %s476_s27, 7 }
   0xb   : > { %v286_v0 = vld [vmem:[%s614_s3 + $0x8] sm:$0xff]  ;;  %v285_v1 = vld [vmem:[%s614_s3] sm:$0xff]  ;;  %s619_s27 = smov (!%p244_p3, %s476_s27), 7  ;;  %vm287_vm0 = vcmask 130048  }
   0xc   : > { %496 = vmatprep.subr.mxu0 %v286_v0  ;;  %506 = vmatprep.subr.mxu1 %v286_v0  ;;  %s477_s28 = sshll.u32 %s619_s27, 3  ;;  %v480_v2 = vld [vmem:[%s612_s1] ss:$0 sm:$0xff] }
   0xd   : > { %497 = vmatpush3.msra.mxu0 %v286_v0  ;;  %508 = vmatpush3.msra.mxu1 %v286_v0  ;;  %s247_s9 = scalar_lea.vmem %s611_s0, %s477_s28  ;;  %v481_v3 = vld [vmem:[%s613_s2] ss:$0 sm:$0xff]  ;;  %s253_s18 = scalar_lea.vmem %s617_s6, %s477_s28 }
   0xe   : > { %498 = vmatprep.subr.mxu0 %v285_v1  ;;  %507 = vmatprep.subr.mxu1 %v285_v1  ;;  %v255_v4 = vld [vmem:[%s247_s9] sm:$0xff]  ;;  %v257_v5 = vld [vmem:[%s247_s9 + $0x10] sm:$0xff]  ;;  %v256_v6 = vld [vmem:[%s247_s9 + $0x8] sm:$0xff] }
   0xf   : > { %499 = vmatpush3.msra.mxu0 %v285_v1  ;;  %509 = vmatpush3.msra.mxu1 %v285_v1  ;;  %v266_v7 = vmul.f32 %v480_v2, %v255_v4  ;;  %v268_v8 = vmul.f32 %v480_v2, %v257_v5  ;;  %v267_v9 = vmul.f32 %v480_v2, %v256_v6  ;;  %v258_v10 = vld [vmem:[%s247_s9 + $0x18] sm:$0xff]  ;;  %v486_v20 = vld [vmem:[%s615_s4] ss:$0 sm:$0xff] }
  0x10   : > { %v269_v11 = vmul.f32 %v480_v2, %v258_v10  ;;  %v487_v24 = vld [vmem:[%s616_s5] ss:$0 sm:$0xff] }
  0x11   : > { %v277_v12 = vadd.f32 %v481_v3, %v266_v7  ;;  %v279_v13 = vadd.f32 %v481_v3, %v268_v8  ;;  %v278_v14 = vadd.f32 %v481_v3, %v267_v9 }
  0x12   : > { %v280_v15 = vadd.f32 %v481_v3, %v269_v11 }
  0x13   : > { %v281_v16 = vmax.f32 %v277_v12, 0.0  ;;  %v283_v17 = vmax.f32 %v279_v13, 0.0  ;;  %v282_v18 = vmax.f32 %v278_v14, 0.0 }
  0x14   : > { %v284_v19 = vmax.f32 %v280_v15, 0.0 }
  0x15   : > { %500 = vmatprep.mubr.msk.f32.mxu0 %vm287_vm0, %v281_v16  ;;  %503 = vmatprep.mubr.msk.f32.mxu1 %vm287_vm0, %v283_v17 }
  0x16   : > { %501 = vmatmul.mubr.msk.f32.vlgmr.msra.gmra.mxu0 %vm287_vm0, %v282_v18  ;;  %504 = vmatmul.mubr.msk.f32.vlgmr.msra.gmra.mxu1 %vm287_vm0, %v284_v19 }
  0xd6   : > { %v502_v21 = vpop.f32.mrf.mxu0  ;;  %v505_v22 = vpop.f32.mrf.mxu1 }
  0xd7   : > { %v393_v23 = vmul.f32 %v502_v21, %v486_v20  ;;  %v395_v25 = vmul.f32 %v505_v22, %v486_v20 }
  0xd8   : > { %v366_v26 = vpop.f32.mrf.mxu0  ;;  %v376_v27 = vpop.f32.mrf.mxu1 }
  0xd9   : > { %v392_v28 = vmul.f32 %v486_v20, %v366_v26  ;;  %v394_v29 = vmul.f32 %v486_v20, %v376_v27  ;;  %v404_v30 = vadd.f32 %v487_v24, %v393_v23  ;;  %v406_v33 = vadd.f32 %v487_v24, %v395_v25 }
  0xdb   : > { %v403_v31 = vadd.f32 %v487_v24, %v392_v28  ;;  %v405_v32 = vadd.f32 %v487_v24, %v394_v29  ;;  %v408_v35 = vmax.f32 %v404_v30, 0.0  ;;  %v410_v37 = vmax.f32 %v406_v33, 0.0 }
  0xdd   : > { %v407_v34 = vmax.f32 %v403_v31, 0.0  ;;  %v409_v36 = vmax.f32 %v405_v32, 0.0  ;;  %412 = vst.msk [vmem:[%s253_s18 + $0x8] sm:$0xff] %vm287_vm0, %v408_v35  ;;  %414 = vst.msk [vmem:[%s253_s18 + $0x18] sm:$0xff] %vm287_vm0, %v410_v37 }
  0xdf   : > { %411 = vst.msk [vmem:[%s253_s18] sm:$0xff] %vm287_vm0, %v407_v34  ;;  %413 = vst.msk [vmem:[%s253_s18 + $0x10] sm:$0xff] %vm287_vm0, %v409_v36 }
  0xe0 PF: > { %s16_s21 = sadd.s32 1, %s524_s21  }
  0xe1   : > { %p13_p4 = scmp.ge.s32.totalorder %s16_s21, 4  }
  0xe3   :  { %15 = sbr.rel (!%p13_p4) target bundleno = 1 (0x1), region = 74 }

// kernel: _lambda_.19
= control target key start
LH: loop header
LB: loop body
LE: loop exit
PB: predicated region body
PF: predicated region fallthrough
CT: control target
= control target key end

     0   :  { %s497_s21 = smov 0   ;;  %s532_s0 = inlined_call_operand.vmem [shape: f32[16,12], index: 0, kind: input, shape index: {}]   ;;  %s533_s1 = inlined_call_operand.vmem [shape: f32[1,12], index: 1, kind: input, shape index: {}]   ;;  %s534_s2 = inlined_call_operand.vmem [shape: f32[1,12], index: 2, kind: input, shape index: {}]   ;;  %s535_s3 = inlined_call_operand.vmem [shape: f32[12,16], index: 3, kind: input, shape index: {}]   ;;  %s536_s4 = inlined_call_operand.vmem [shape: f32[1,16], index: 4, kind: input, shape index: {}]   ;;  %s537_s5 = inlined_call_operand.vmem [shape: f32[1,16], index: 5, kind: input, shape index: {}]   ;;  %s538_s6 = inlined_call_operand.vmem [shape: f32[16,16], index: 6, kind: output, shape index: {}]  }
   0x1 LB: > { %s417_s22 = sadd.s32 4294967295, %s458_s21   ;;  %p421_p0 = scmp.ge.s32.totalorder %s458_s21, 1  ;;  %s458_s21 = sphi %s497_s21, %s16_s21  }
   0x2   : > { %p211_p1 = scmp.lt.s32.totalorder %s458_s21, 3 }
   0x4   : > { %p212_p2 = pnand %p421_p0, %p211_p1 }
   0x5   : > { %p239_p3 = scmp.lt.s32.totalorder (!%p212_p2), %s417_s22, 1 }
   0x6   : > { %215 = sbr.rel (%p212_p2) target bundleno = 222 (0xde), region = 44 }
   0xb   : > { %v266_v0 = vld [vmem:[%s535_s3 + $0x8] sm:$0xf]  ;;  %vm271_vm0 = vcmask 1043456   ;;  %v460_v1 = vmov 0.0   ;;  %v265_v2 = vld [vmem:[%s535_s3] sm:$0xff]  ;;  %vm461_vm1 = vmmov 0  }
   0xc   : > { %435 = vmatprep.subr.mxu0 %v460_v1  ;;  %439 = vmatprep.mubr.msk.f32.mxu0 %vm461_vm1, %v460_v1  ;;  %s540_s22 = smov (!%p239_p3, %s417_s22), 1  ;;  %v424_v3 = vld [vmem:[%s533_s1] ss:$0 sm:$0xff]  ;;  %vm267_vm2 = vcmask 97280   ;;  %vm362_vm3 = vcmask 130048  }
   0xd   : > { %436 = vmatpush3.msk.msra.mxu0 %vm271_vm0, %v266_v0  ;;  %s422_s27 = sshll.u32 %s540_s22, 3  ;;  %v425_v5 = vld [vmem:[%s534_s2] ss:$0 sm:$0xff] }
   0xe   : > { %437 = vmatprep.subr.mxu0 %v460_v1  ;;  %s242_s8 = scalar_lea.vmem %s532_s0, %s422_s27  ;;  %v428_v9 = vld [vmem:[%s536_s4] ss:$0 sm:$0xff]  ;;  %s246_s17 = scalar_lea.vmem %s538_s6, %s422_s27 }
   0xf   : > { %438 = vmatpush3.msra.mxu0 %v265_v2  ;;  %v247_v4 = vld [vmem:[%s242_s8] sm:$0xff] }
  0x10   : > { %v255_v6 = vmul.f32 %v424_v3, %v247_v4  ;;  %v429_v11 = vld [vmem:[%s537_s5] ss:$0 sm:$0xff] }
  0x12   : > { %v263_v7 = vadd.f32 %v425_v5, %v255_v6 }
  0x14   : > { %v264_v8 = vmax.f32 %v263_v7, 0.0 }
  0x16   : > { %440 = vmatmul.mubr.msk.f32.vlgmr.msra.gmra.mxu0 %vm267_vm2, %v264_v8 }
  0xd6   : > { %v341_v10 = vpop.f32.mrf.mxu0 }
  0xd7   : > { %v352_v12 = vmul.f32 %v428_v9, %v341_v10 }
  0xd8   : > { %v441_v13 = vpop.f32.mrf.mxu0 }
  0xd9   : > { %v360_v14 = vadd.f32 %v429_v11, %v352_v12 }
  0xdb   : > { %v361_v15 = vmax.f32 %v360_v14, 0.0 }
  0xdd   : > { %363 = vst.msk [vmem:[%s246_s17] sm:$0xff] %vm362_vm3, %v361_v15 }
  0xde PF: > { %s16_s21 = sadd.s32 1, %s458_s21  }
  0xdf   : > { %p13_p4 = scmp.ge.s32.totalorder %s16_s21, 4  }
  0xe1   :  { %15 = sbr.rel (!%p13_p4) target bundleno = 1 (0x1), region = 74 }

// kernel: _lambda_.18
= control target key start
LH: loop header
LB: loop body
LE: loop exit
PB: predicated region body
PF: predicated region fallthrough
CT: control target
= control target key end

     0   :  { %s615_s24 = smov 0   ;;  %s663_s0 = inlined_call_operand.vmem [shape: f32[16,24], index: 0, kind: input, shape index: {}]   ;;  %s664_s1 = inlined_call_operand.vmem [shape: f32[16,24], index: 1, kind: input, shape index: {}]   ;;  %s665_s2 = inlined_call_operand.vmem [shape: f32[16,24], index: 2, kind: input, shape index: {}]   ;;  %s666_s3 = inlined_call_operand.vmem [shape: f32[16,24], index: 3, kind: input, shape index: {}]   ;;  %s667_s4 = inlined_call_operand.vmem [shape: f32[1,24], index: 4, kind: input, shape index: {}]   ;;  %s668_s5 = inlined_call_operand.vmem [shape: f32[1,24], index: 5, kind: input, shape index: {}]   ;;  %s669_s6 = inlined_call_operand.vmem [shape: f32[24,12], index: 6, kind: input, shape index: {}]   ;;  %s670_s7 = inlined_call_operand.vmem [shape: f32[16,12], index: 7, kind: output, shape index: {}]  }
   0x1 LB: > { %s527_s25 = sadd.s32 4294967295, %s571_s24   ;;  %p531_p0 = scmp.ge.s32.totalorder %s571_s24, 1  ;;  %s571_s24 = sphi %s615_s24, %s17_s24  }
   0x2   : > { %p263_p1 = scmp.lt.s32.totalorder %s571_s24, 3 }
   0x4   : > { %p264_p2 = pnand %p531_p0, %p263_p1 }
   0x5   : > { %p305_p3 = scmp.lt.s32.totalorder (!%p264_p2), %s527_s25, 1 }
   0x6   : > { %267 = sbr.rel (%p264_p2) target bundleno = 225 (0xe1), region = 48 }
   0xb   : > { %v361_v0 = vld [vmem:[%s669_s6 + $0x10] sm:$0xff]  ;;  %v573_v1 = vmov 0.0   ;;  %v360_v2 = vld [vmem:[%s669_s6 + $0x8] sm:$0xff]  ;;  %vm574_vm0 = vmmov 0   ;;  %s672_s25 = smov (!%p305_p3, %s527_s25), 1  ;;  %v359_v3 = vld [vmem:[%s669_s6] sm:$0xff] }
   0xc   : > { %546 = vmatprep.subr.mxu0 %v573_v1  ;;  %552 = vmatprep.mubr.msk.f32.mxu0 %vm574_vm0, %v573_v1  ;;  %s632_s9 = sshll.u32 %s672_s25, 3  ;;  %v537_v4 = vld [vmem:[%s667_s4] ss:$0 sm:$0xff]  ;;  %vm362_vm1 = vcmask 195584   ;;  %vm436_vm2 = vcmask 97280  }
   0xd   : > { %547 = vmatpush3.msra.mxu0 %v361_v0  ;;  %s308_s14 = scalar_lea.vmem %s663_s0, %s632_s9  ;;  %s312_s17 = scalar_lea.vmem %s664_s1, %s632_s9  ;;  %v538_v5 = vld [vmem:[%s668_s5] ss:$0 sm:$0xff] }
   0xe   : > { %548 = vmatprep.subr.mxu0 %v573_v1  ;;  %s316_s20 = scalar_lea.vmem %s665_s2, %s632_s9  ;;  %s320_s23 = scalar_lea.vmem %s666_s3, %s632_s9  ;;  %v327_v6 = vld [vmem:[%s308_s14] sm:$0xff] }
   0xf   : > { %549 = vmatpush3.msra.mxu0 %v360_v2  ;;  %v343_v7 = vld [vmem:[%s312_s17] sm:$0xff]  ;;  %v334_v8 = vmul.f32 %v537_v4, %v327_v6  ;;  %s324_s29 = scalar_lea.vmem %s670_s7, %s632_s9 }
  0x10   : > { %550 = vmatprep.subr.mxu0 %v573_v1  ;;  %v344_v9 = vmul.f32 %v537_v4, %v343_v7  ;;  %v348_v10 = vld [vmem:[%s316_s20] sm:$0xff] }
  0x11   : > { %551 = vmatpush3.msra.mxu0 %v359_v3  ;;  %v353_v11 = vld [vmem:[%s320_s23] sm:$0xff]  ;;  %v349_v12 = vmul.f32 %v537_v4, %v348_v10  ;;  %v341_v14 = vadd.f32 %v538_v5, %v334_v8 }
  0x12   : > { %v354_v13 = vmul.f32 %v537_v4, %v353_v11  ;;  %v345_v15 = vadd.f32 %v538_v5, %v344_v9 }
  0x13   : > { %v350_v16 = vadd.f32 %v538_v5, %v349_v12  ;;  %v342_v18 = vmax.f32 %v341_v14, 0.0 }
  0x14   : > { %v355_v17 = vadd.f32 %v538_v5, %v354_v13  ;;  %v346_v19 = vmax.f32 %v345_v15, 0.0 }
  0x15   : > { %v351_v20 = vmax.f32 %v350_v16, 0.0 }
  0x16   : > { %v347_v21 = vadd.f32 %v346_v19, %v342_v18  ;;  %v356_v22 = vmax.f32 %v355_v17, 0.0 }
  0x18   : > { %v352_v23 = vadd.f32 %v351_v20, %v347_v21 }
  0x1a   : > { %v357_v24 = vadd.f32 %v356_v22, %v352_v23 }
  0x1c   : > { %v358_v25 = vmul.f32 0.25, %v357_v24 }
  0x1e   : > { %553 = vmatmul.mubr.msk.f32.vlgmr.msra.gmra.mxu0 %vm362_vm1, %v358_v25 }
  0xde   : > { %v432_v26 = vpop.f32.mrf.mxu0 }
  0xdf   : > { %437 = vst.msk [vmem:[%s324_s29] sm:$0xff] %vm436_vm2, %v432_v26 }
  0xe0   : > { %v554_v27 = vpop.f32.mrf.mxu0 }
  0xe1 PF: > { %s17_s24 = sadd.s32 1, %s571_s24  }
  0xe2   : > { %p14_p4 = scmp.ge.s32.totalorder %s17_s24, 4  }
  0xe4   :  { %16 = sbr.rel (!%p14_p4) target bundleno = 1 (0x1), region = 87 }

// kernel: _lambda_.15
= control target key start
LH: loop header
LB: loop body
LE: loop exit
PB: predicated region body
PF: predicated region fallthrough
CT: control target
= control target key end

     0   :  { %s1934_s13 = smov 0   ;;  %s2113_s0 = inlined_call_operand.vmem [shape: f32[64,16], index: 0, kind: input, shape index: {}]   ;;  %s2114_s1 = inlined_call_operand.vmem [shape: f32[64,16], index: 1, kind: input, shape index: {}]   ;;  %s2115_s2 = inlined_call_operand.vmem [shape: f32[64,16], index: 2, kind: input, shape index: {}]   ;;  %s2116_s3 = inlined_call_operand.vmem [shape: f32[64,16], index: 3, kind: input, shape index: {}]   ;;  %s2117_s4 = inlined_call_operand.vmem [shape: f32[64,16], index: 4, kind: input, shape index: {}]   ;;  %s2118_s5 = inlined_call_operand.vmem [shape: f32[64,16], index: 5, kind: input, shape index: {}]   ;;  %s2119_s6 = inlined_call_operand.vmem [shape: f32[64,16], index: 6, kind: input, shape index: {}]   ;;  %s2120_s7 = inlined_call_operand.vmem [shape: f32[64,16], index: 7, kind: input, shape index: {}]   ;;  %s2121_s8 = inlined_call_operand.vmem [shape: f32[64,16], index: 8, kind: input, shape index: {}]   ;;  %s2122_s9 = inlined_call_operand.vmem [shape: f32[144,8], index: 9, kind: input, shape index: {}]   ;;  %s2123_s10 = inlined_call_operand.vmem [shape: f32[64,8], index: 10, kind: output, shape index: {}]  }
   0x1 LB: > { %s1652_s14 = sadd.s32 4294967295, %s1877_s13   ;;  %p1656_p0 = scmp.ge.s32.totalorder %s1877_s13, 1  ;;  %s1877_s13 = sphi %s1934_s13, %s20_s13  }
   0x2   : > { %p401_p1 = scmp.lt.s32.totalorder %s1877_s13, 3 }
   0x4   : > { %p402_p2 = pnand %p1656_p0, %p401_p1 }
   0x5   : > { %s1657_s19 = sshll.u32 (!%p402_p2), %s1652_s14, 2 }
   0x6   : > { %405 = sbr.rel (%p402_p2) target bundleno = 251 (0xfb), region = 60  ;;  %p480_p3 = scmp.lt.s32.totalorder (!%p402_p2), %s1657_s19, 7 }
   0xb   : > { %v550_v0 = vld [vmem:[%s2122_s9 + $0x18] sm:$0xff]  ;;  %v549_v1 = vld [vmem:[%s2122_s9 + $0x10] sm:$0xff]  ;;  %v544_v2 = vld [vmem:[%s2122_s9 + $0x8] sm:$0xff]  ;;  %s2125_s19 = smov (!%p480_p3, %s1657_s19), 7  ;;  %vm551_vm0 = vcmask 130048   ;;  %vm1495_vm1 = vcmask 64512  }
   0xc   : > { %1859 = vmatprep.subr.mxu1 %v550_v0  ;;  %1769 = vmatprep.subr.mxu0 %v550_v0  ;;  %v751_v3 = vld [vmem:[%s2122_s9 + $0x28] sm:$0xff]  ;;  %s1954_s24 = sshll.u32 %s2125_s19, 3  ;;  %v543_v8 = vld [vmem:[%s2122_s9] sm:$0xff]  ;;  %v858_v12 = vld [vmem:[%s2122_s9 + $0x38] sm:$0xff] }
   0xd   : > { %1861 = vmatpush3.msra.mxu1 %v550_v0  ;;  %1770 = vmatpush3.msra.mxu0 %v550_v0  ;;  %s489_s27 = scalar_lea.vmem %s2114_s1, %s1954_s24  ;;  %s1964_s30 = scalar_lea.vmem %s2113_s0, %s1954_s24  ;;  %v750_v9 = vld [vmem:[%s2122_s9 + $0x20] sm:$0xff]  ;;  %v965_v15 = vld [vmem:[%s2122_s9 + $0x48] sm:$0xff]  ;;  %v857_v18 = vld [vmem:[%s2122_s9 + $0x30] sm:$0xff] }
   0xe   : > { %1860 = vmatprep.subr.mxu1 %v549_v1  ;;  %1771 = vmatprep.subr.mxu0 %v549_v1  ;;  %v545_v4 = vld [vmem:[%s489_s27] sm:$0xff]  ;;  %v547_v5 = vld [vmem:[%s489_s27 + $0x10] sm:$0xff]  ;;  %v546_v6 = vld [vmem:[%s489_s27 + $0x8] sm:$0xff]  ;;  %s1970_s14 = scalar_lea.vmem %s2115_s2, %s1954_s24  ;;  %s2001_s26 = scalar_lea.vmem %s2116_s3, %s1954_s24 }
   0xf   : > { %1862 = vmatpush3.msra.mxu1 %v549_v1  ;;  %1772 = vmatpush3.msra.mxu0 %v549_v1  ;;  %v548_v7 = vld [vmem:[%s489_s27 + $0x18] sm:$0xff]  ;;  %v539_v10 = vld [vmem:[%s1964_s30] sm:$0xff]  ;;  %v540_v13 = vld [vmem:[%s1964_s30 + $0x8] sm:$0xff]  ;;  %s2012_s12 = scalar_lea.vmem %s2117_s4, %s1954_s24  ;;  %s2041_s21 = scalar_lea.vmem %s2118_s5, %s1954_s24 }
  0x10   : > { %1779 = vmatprep.subr.mxu1 %v544_v2  ;;  %1789 = vmatprep.subr.mxu0 %v751_v3  ;;  %v746_v11 = vld [vmem:[%s1970_s14] sm:$0xff]  ;;  %v747_v14 = vld [vmem:[%s1970_s14 + $0x8] sm:$0xff]  ;;  %v541_v16 = vld [vmem:[%s1964_s30 + $0x10] sm:$0xff]  ;;  %s2052_s28 = scalar_lea.vmem %s2119_s6, %s1954_s24  ;;  %s525_s17 = scalar_lea.vmem %s2120_s7, %s1954_s24 }
  0x11   : > { %1773 = vmatprep.mubr.msk.f32.mxu0 %vm551_vm0, %v545_v4  ;;  %1776 = vmatprep.mubr.msk.f32.mxu1 %vm551_vm0, %v547_v5  ;;  %v748_v17 = vld [vmem:[%s1970_s14 + $0x10] sm:$0xff]  ;;  %v542_v19 = vld [vmem:[%s1964_s30 + $0x18] sm:$0xff]  ;;  %v964_v21 = vld [vmem:[%s2122_s9 + $0x40] sm:$0xff]  ;;  %s531_s23 = scalar_lea.vmem %s2121_s8, %s1954_s24  ;;  %s537_s29 = scalar_lea.vmem %s2123_s10, %s1954_s24 }
  0x12   : > { %1774 = vmatmul.mubr.msk.f32.vlgmr.msra.gmra.mxu0 %vm551_vm0, %v546_v6  ;;  %1777 = vmatmul.mubr.msk.f32.vlgmr.msra.gmra.mxu1 %vm551_vm0, %v548_v7  ;;  %v749_v20 = vld [vmem:[%s1970_s14 + $0x18] sm:$0xff]  ;;  %v853_v22 = vld [vmem:[%s2001_s26] sm:$0xff]  ;;  %v854_v25 = vld [vmem:[%s2001_s26 + $0x8] sm:$0xff] }
  0x13   : > { %1780 = vmatpush3.msra.mxu1 %v544_v2  ;;  %1790 = vmatpush3.msra.mxu0 %v751_v3  ;;  %v960_v23 = vld [vmem:[%s2012_s12] sm:$0xff]  ;;  %v1072_v24 = vld [vmem:[%s2122_s9 + $0x58] sm:$0xff]  ;;  %v961_v26 = vld [vmem:[%s2012_s12 + $0x8] sm:$0xff] }
  0x14   : > { %1781 = vmatprep.subr.mxu1 %v543_v8  ;;  %1791 = vmatprep.subr.mxu0 %v750_v9  ;;  %v1179_v27 = vld [vmem:[%s2122_s9 + $0x68] sm:$0xff]  ;;  %v855_v28 = vld [vmem:[%s2001_s26 + $0x10] sm:$0xff]  ;;  %v856_v31 = vld [vmem:[%s2001_s26 + $0x18] sm:$0xff] }
  0x15   : > { %1782 = vmatpush3.msra.mxu1 %v543_v8  ;;  %1783 = vmatprep.mubr.msk.f32.mxu1 %vm551_vm0, %v539_v10  ;;  %v962_v29 = vld [vmem:[%s2012_s12 + $0x10] sm:$0xff]  ;;  %v963_v32 = vld [vmem:[%s2012_s12 + $0x18] sm:$0xff]  ;;  %v1178_v33 = vld [vmem:[%s2122_s9 + $0x60] sm:$0xff] }
  0x16   : > { %1792 = vmatpush3.msra.mxu0 %v750_v9  ;;  %1793 = vmatprep.mubr.msk.f32.mxu0 %vm551_vm0, %v746_v11  ;;  %v1071_v30 = vld [vmem:[%s2122_s9 + $0x50] sm:$0xff]  ;;  %v1067_v34 = vld [vmem:[%s2041_s21] sm:$0xff]  ;;  %v1286_v36 = vld [vmem:[%s2122_s9 + $0x78] sm:$0xff] }
  0x17   : > { %1799 = vmatprep.subr.mxu1 %v858_v12  ;;  %1784 = vmatmul.mubr.msk.f32.vlgmr.msra.gmra.mxu1 %vm551_vm0, %v540_v13  ;;  %v1174_v35 = vld [vmem:[%s2052_s28] sm:$0xff]  ;;  %v1068_v37 = vld [vmem:[%s2041_s21 + $0x8] sm:$0xff]  ;;  %v1069_v40 = vld [vmem:[%s2041_s21 + $0x10] sm:$0xff] }
  0x18   : > { %1794 = vmatmul.mubr.msk.f32.vlgmr.msra.gmra.mxu0 %vm551_vm0, %v747_v14  ;;  %1800 = vmatpush3.msra.mxu1 %v858_v12  ;;  %v1175_v38 = vld [vmem:[%s2052_s28 + $0x8] sm:$0xff]  ;;  %v1176_v41 = vld [vmem:[%s2052_s28 + $0x10] sm:$0xff]  ;;  %v1070_v43 = vld [vmem:[%s2041_s21 + $0x18] sm:$0xff] }
  0x19   : > { %1809 = vmatprep.subr.mxu0 %v965_v15  ;;  %1786 = vmatprep.mubr.msk.f32.mxu1 %vm551_vm0, %v541_v16  ;;  %v1393_v39 = vld [vmem:[%s2122_s9 + $0x88] sm:$0xff]  ;;  %v1285_v42 = vld [vmem:[%s2122_s9 + $0x70] sm:$0xff]  ;;  %v1177_v44 = vld [vmem:[%s2052_s28 + $0x18] sm:$0xff] }
  0x1a   : > { %1810 = vmatpush3.msra.mxu0 %v965_v15  ;;  %1796 = vmatprep.mubr.msk.f32.mxu0 %vm551_vm0, %v748_v17  ;;  %v1392_v45 = vld [vmem:[%s2122_s9 + $0x80] sm:$0xff]  ;;  %v1282_v48 = vld [vmem:[%s525_s17 + $0x8] sm:$0xff]  ;;  %v1283_v50 = vld [vmem:[%s525_s17 + $0x10] sm:$0xff] }
  0x1b   : > { %1801 = vmatprep.subr.mxu1 %v857_v18  ;;  %1787 = vmatmul.mubr.msk.f32.gmra.mxu1 %vm551_vm0, %v542_v19  ;;  %v1281_v46 = vld [vmem:[%s525_s17] sm:$0xff]  ;;  %v1389_v49 = vld [vmem:[%s531_s23 + $0x8] sm:$0xff]  ;;  %v1390_v51 = vld [vmem:[%s531_s23 + $0x10] sm:$0xff] }
  0x1c   : > { %1797 = vmatmul.mubr.msk.f32.gmra.mxu0 %vm551_vm0, %v749_v20  ;;  %1802 = vmatpush3.msra.mxu1 %v857_v18  ;;  %v1388_v47 = vld [vmem:[%s531_s23] sm:$0xff]  ;;  %v1284_v52 = vld [vmem:[%s525_s17 + $0x18] sm:$0xff] }
  0x1d   : > { %1811 = vmatprep.subr.mxu0 %v964_v21  ;;  %1803 = vmatprep.mubr.msk.f32.mxu1 %vm551_vm0, %v853_v22  ;;  %v1391_v53 = vld [vmem:[%s531_s23 + $0x18] sm:$0xff] }
  0x1e   : > { %1812 = vmatpush3.msra.mxu0 %v964_v21  ;;  %1813 = vmatprep.mubr.msk.f32.mxu0 %vm551_vm0, %v960_v23 }
  0x1f   : > { %1819 = vmatprep.subr.mxu1 %v1072_v24  ;;  %1804 = vmatmul.mubr.msk.f32.vlgmr.msra.gmra.mxu1 %vm551_vm0, %v854_v25 }
  0x20   : > { %1814 = vmatmul.mubr.msk.f32.vlgmr.msra.gmra.mxu0 %vm551_vm0, %v961_v26  ;;  %1820 = vmatpush3.msra.mxu1 %v1072_v24 }
  0x21   : > { %1829 = vmatprep.subr.mxu0 %v1179_v27  ;;  %1806 = vmatprep.mubr.msk.f32.mxu1 %vm551_vm0, %v855_v28 }
  0x22   : > { %1830 = vmatpush3.msra.mxu0 %v1179_v27  ;;  %1816 = vmatprep.mubr.msk.f32.mxu0 %vm551_vm0, %v962_v29 }
  0x23   : > { %1821 = vmatprep.subr.mxu1 %v1071_v30  ;;  %1807 = vmatmul.mubr.msk.f32.gmra.mxu1 %vm551_vm0, %v856_v31 }
  0x24   : > { %1817 = vmatmul.mubr.msk.f32.gmra.mxu0 %vm551_vm0, %v963_v32  ;;  %1822 = vmatpush3.msra.mxu1 %v1071_v30 }
  0x25   : > { %1831 = vmatprep.subr.mxu0 %v1178_v33  ;;  %1823 = vmatprep.mubr.msk.f32.mxu1 %vm551_vm0, %v1067_v34 }
  0x26   : > { %1832 = vmatpush3.msra.mxu0 %v1178_v33  ;;  %1833 = vmatprep.mubr.msk.f32.mxu0 %vm551_vm0, %v1174_v35 }
  0x27   : > { %1839 = vmatprep.subr.mxu1 %v1286_v36  ;;  %1824 = vmatmul.mubr.msk.f32.vlgmr.msra.gmra.mxu1 %vm551_vm0, %v1068_v37 }
  0x28   : > { %1834 = vmatmul.mubr.msk.f32.vlgmr.msra.gmra.mxu0 %vm551_vm0, %v1175_v38  ;;  %1840 = vmatpush3.msra.mxu1 %v1286_v36 }
  0x29   : > { %1849 = vmatprep.subr.mxu0 %v1393_v39  ;;  %1826 = vmatprep.mubr.msk.f32.mxu1 %vm551_vm0, %v1069_v40 }
  0x2a   : > { %1850 = vmatpush3.msra.mxu0 %v1393_v39  ;;  %1836 = vmatprep.mubr.msk.f32.mxu0 %vm551_vm0, %v1176_v41 }
  0x2b   : > { %1841 = vmatprep.subr.mxu1 %v1285_v42  ;;  %1827 = vmatmul.mubr.msk.f32.gmra.mxu1 %vm551_vm0, %v1070_v43 }
  0x2c   : > { %1837 = vmatmul.mubr.msk.f32.gmra.mxu0 %vm551_vm0, %v1177_v44  ;;  %1842 = vmatpush3.msra.mxu1 %v1285_v42 }
  0x2d   : > { %1851 = vmatprep.subr.mxu0 %v1392_v45  ;;  %1843 = vmatprep.mubr.msk.f32.mxu1 %vm551_vm0, %v1281_v46 }
  0x2e   : > { %1852 = vmatpush3.msra.mxu0 %v1392_v45  ;;  %1853 = vmatprep.mubr.msk.f32.mxu0 %vm551_vm0, %v1388_v47 }
  0x2f   : > { %1844 = vmatmul.mubr.msk.f32.vlgmr.msra.gmra.mxu1 %vm551_vm0, %v1282_v48 }
  0x30   : > { %1854 = vmatmul.mubr.msk.f32.vlgmr.msra.gmra.mxu0 %vm551_vm0, %v1389_v49  ;;  %1846 = vmatprep.mubr.msk.f32.mxu1 %vm551_vm0, %v1283_v50 }
  0x31   : > { %1856 = vmatprep.mubr.msk.f32.mxu0 %vm551_vm0, %v1390_v51 }
  0x33   : > { %1847 = vmatmul.mubr.msk.f32.gmra.mxu1 %vm551_vm0, %v1284_v52 }
  0x34   : > { %1857 = vmatmul.mubr.msk.f32.gmra.mxu0 %vm551_vm0, %v1391_v53 }
  0xd2   : > { %v1775_v54 = vpop.f32.mrf.mxu0  ;;  %v1778_v55 = vpop.f32.mrf.mxu1 }
  0xd4   : > { %v630_v56 = vpop.f32.mrf.mxu0  ;;  %v640_v57 = vpop.f32.mrf.mxu1 }
  0xd7   : > { %v1785_v58 = vpop.f32.mrf.mxu1 }
  0xd8   : > { %v1795_v59 = vpop.f32.mrf.mxu0  ;;  %v733_v2 = vadd.f32 %v1785_v58, %v1775_v54 }
  0xd9   : > { %v727_v60 = vpop.f32.mrf.mxu1 }
  0xda   : > { %v830_v61 = vpop.f32.mrf.mxu0  ;;  %v728_v4 = vadd.f32 %v727_v60, %v630_v56  ;;  %v850_v8 = vadd.f32 %v1795_v59, %v733_v2 }
  0xdb   : > { %v1788_v62 = vpop.f32.mrf.mxu1 }
  0xdc   : > { %v1798_v63 = vpop.f32.mrf.mxu0  ;;  %v743_v9 = vadd.f32 %v1788_v62, %v1778_v55  ;;  %v849_v11 = vadd.f32 %v830_v61, %v728_v4 }
  0xdd   : > { %v737_v0 = vpop.f32.mrf.mxu1 }
  0xde   : > { %v840_v1 = vpop.f32.mrf.mxu0  ;;  %v738_v12 = vadd.f32 %v737_v0, %v640_v57  ;;  %v852_v18 = vadd.f32 %v1798_v63, %v743_v9 }
  0xdf   : > { %v1805_v3 = vpop.f32.mrf.mxu1 }
  0xe0   : > { %v1815_v5 = vpop.f32.mrf.mxu0  ;;  %v957_v14 = vadd.f32 %v1805_v3, %v850_v8  ;;  %v851_v20 = vadd.f32 %v840_v1, %v738_v12 }
  0xe1   : > { %v937_v6 = vpop.f32.mrf.mxu1 }
  0xe2   : > { %v1044_v7 = vpop.f32.mrf.mxu0  ;;  %v956_v16 = vadd.f32 %v937_v6, %v849_v11  ;;  %v1064_v22 = vadd.f32 %v1815_v5, %v957_v14 }
  0xe3   : > { %v1808_v10 = vpop.f32.mrf.mxu1 }
  0xe4   : > { %v1818_v13 = vpop.f32.mrf.mxu0  ;;  %v959_v23 = vadd.f32 %v1808_v10, %v852_v18  ;;  %v1063_v25 = vadd.f32 %v1044_v7, %v956_v16 }
  0xe5   : > { %v947_v15 = vpop.f32.mrf.mxu1 }
  0xe6   : > { %v1054_v17 = vpop.f32.mrf.mxu0  ;;  %v958_v26 = vadd.f32 %v947_v15, %v851_v20  ;;  %v1066_v32 = vadd.f32 %v1818_v13, %v959_v23 }
  0xe7   : > { %v1825_v19 = vpop.f32.mrf.mxu1 }
  0xe8   : > { %v1835_v21 = vpop.f32.mrf.mxu0  ;;  %v1171_v28 = vadd.f32 %v1825_v19, %v1064_v22  ;;  %v1065_v34 = vadd.f32 %v1054_v17, %v958_v26 }
  0xe9   : > { %v1151_v24 = vpop.f32.mrf.mxu1 }
  0xea   : > { %v1258_v27 = vpop.f32.mrf.mxu0  ;;  %v1170_v30 = vadd.f32 %v1151_v24, %v1063_v25  ;;  %v1278_v36 = vadd.f32 %v1835_v21, %v1171_v28 }
  0xeb   : > { %v1828_v29 = vpop.f32.mrf.mxu1 }
  0xec   : > { %v1838_v31 = vpop.f32.mrf.mxu0  ;;  %v1173_v37 = vadd.f32 %v1828_v29, %v1066_v32  ;;  %v1277_v39 = vadd.f32 %v1258_v27, %v1170_v30 }
  0xed   : > { %v1161_v33 = vpop.f32.mrf.mxu1 }
  0xee   : > { %v1268_v35 = vpop.f32.mrf.mxu0  ;;  %v1172_v40 = vadd.f32 %v1161_v33, %v1065_v34  ;;  %v1280_v46 = vadd.f32 %v1838_v31, %v1173_v37 }
  0xef   : > { %v1845_v38 = vpop.f32.mrf.mxu1 }
  0xf0   : > { %v1855_v41 = vpop.f32.mrf.mxu0  ;;  %v1385_v42 = vadd.f32 %v1845_v38, %v1278_v36  ;;  %v1279_v48 = vadd.f32 %v1268_v35, %v1172_v40 }
  0xf1   : > { %v1365_v43 = vpop.f32.mrf.mxu1 }
  0xf2   : > { %v1384_v44 = vadd.f32 %v1365_v43, %v1277_v39  ;;  %v1472_v45 = vpop.f32.mrf.mxu0  ;;  %v1492_v51 = vadd.f32 %v1855_v41, %v1385_v42 }
  0xf3   : > { %v1848_v47 = vpop.f32.mrf.mxu1 }
  0xf4   : > { %v1491_v49 = vadd.f32 %v1472_v45, %v1384_v44  ;;  %v1858_v50 = vpop.f32.mrf.mxu0  ;;  %v1387_v52 = vadd.f32 %v1848_v47, %v1280_v46  ;;  %1497 = vst.msk [vmem:[%s537_s29 + $0x8] sm:$0xff] %vm1495_vm1, %v1492_v51 }
  0xf5   : > { %v1375_v53 = vpop.f32.mrf.mxu1 }
  0xf6   : > { %1496 = vst.msk [vmem:[%s537_s29] sm:$0xff] %vm1495_vm1, %v1491_v49  ;;  %v1386_v54 = vadd.f32 %v1375_v53, %v1279_v48  ;;  %v1482_v55 = vpop.f32.mrf.mxu0  ;;  %v1494_v57 = vadd.f32 %v1858_v50, %v1387_v52 }
  0xf8   : > { %v1493_v56 = vadd.f32 %v1482_v55, %v1386_v54  ;;  %1499 = vst.msk [vmem:[%s537_s29 + $0x18] sm:$0xff] %vm1495_vm1, %v1494_v57 }
  0xfa   : > { %1498 = vst.msk [vmem:[%s537_s29 + $0x10] sm:$0xff] %vm1495_vm1, %v1493_v56 }
  0xfb PF: > { %s20_s13 = sadd.s32 1, %s1877_s13  }
  0xfc   : > { %p17_p4 = scmp.ge.s32.totalorder %s20_s13, 4  }
  0xfe   :  { %19 = sbr.rel (!%p17_p4) target bundleno = 1 (0x1), region = 114 }

// kernel: _lambda_.21
= control target key start
LH: loop header
LB: loop body
LE: loop exit
PB: predicated region body
PF: predicated region fallthrough
CT: control target
= control target key end

     0   :  { %s501_s21 = smov 0   ;;  %s539_s0 = inlined_call_operand.vmem [shape: f32[16,20], index: 0, kind: input, shape index: {}]   ;;  %s540_s1 = inlined_call_operand.vmem [shape: f32[1,20], index: 1, kind: input, shape index: {}]   ;;  %s541_s2 = inlined_call_operand.vmem [shape: f32[1,20], index: 2, kind: input, shape index: {}]   ;;  %s542_s3 = inlined_call_operand.vmem [shape: f32[20,16], index: 3, kind: input, shape index: {}]   ;;  %s543_s4 = inlined_call_operand.vmem [shape: f32[1,16], index: 4, kind: input, shape index: {}]   ;;  %s544_s5 = inlined_call_operand.vmem [shape: f32[1,16], index: 5, kind: input, shape index: {}]   ;;  %s545_s6 = inlined_call_operand.vmem [shape: f32[16,16], index: 6, kind: output, shape index: {}]  }
   0x1 LB: > { %s418_s22 = sadd.s32 4294967295, %s462_s21   ;;  %p422_p0 = scmp.ge.s32.totalorder %s462_s21, 1  ;;  %s462_s21 = sphi %s501_s21, %s16_s21  }
   0x2   : > { %p211_p1 = scmp.lt.s32.totalorder %s462_s21, 3 }
   0x4   : > { %p212_p2 = pnand %p422_p0, %p211_p1 }
   0x5   : > { %p239_p3 = scmp.lt.s32.totalorder (!%p212_p2), %s418_s22, 1 }
   0x6   : > { %215 = sbr.rel (%p212_p2) target bundleno = 222 (0xde), region = 44 }
   0xb   : > { %v267_v0 = vld [vmem:[%s542_s3 + $0x10] sm:$0xf]  ;;  %vm272_vm0 = vcmask 1043456   ;;  %v464_v1 = vmov 0.0   ;;  %v266_v2 = vld [vmem:[%s542_s3 + $0x8] sm:$0xff]  ;;  %vm465_vm1 = vmmov 0  }
   0xc   : > { %437 = vmatprep.subr.mxu0 %v464_v1  ;;  %443 = vmatprep.mubr.msk.f32.mxu0 %vm465_vm1, %v464_v1  ;;  %v265_v3 = vld [vmem:[%s542_s3] sm:$0xff]  ;;  %s547_s22 = smov (!%p239_p3, %s418_s22), 1  ;;  %vm268_vm2 = vcmask 162816   ;;  %vm363_vm3 = vcmask 130048  }
   0xd   : > { %438 = vmatpush3.msk.msra.mxu0 %vm272_vm0, %v267_v0  ;;  %s423_s29 = sshll.u32 %s547_s22, 3  ;;  %v425_v4 = vld [vmem:[%s540_s1] ss:$0 sm:$0xff] }
   0xe   : > { %439 = vmatprep.subr.mxu0 %v464_v1  ;;  %s242_s10 = scalar_lea.vmem %s539_s0, %s423_s29  ;;  %v426_v6 = vld [vmem:[%s541_s2] ss:$0 sm:$0xff]  ;;  %s246_s19 = scalar_lea.vmem %s545_s6, %s423_s29 }
   0xf   : > { %440 = vmatpush3.msra.mxu0 %v266_v2  ;;  %v247_v5 = vld [vmem:[%s242_s10] sm:$0xff] }
  0x10   : > { %441 = vmatprep.subr.mxu0 %v464_v1  ;;  %v255_v7 = vmul.f32 %v425_v4, %v247_v5  ;;  %v429_v10 = vld [vmem:[%s543_s4] ss:$0 sm:$0xff] }
  0x11   : > { %442 = vmatpush3.msra.mxu0 %v265_v3  ;;  %v430_v12 = vld [vmem:[%s544_s5] ss:$0 sm:$0xff] }
  0x12   : > { %v263_v8 = vadd.f32 %v426_v6, %v255_v7 }
  0x14   : > { %v264_v9 = vmax.f32 %v263_v8, 0.0 }
  0x16   : > { %444 = vmatmul.mubr.msk.f32.vlgmr.msra.gmra.mxu0 %vm268_vm2, %v264_v9 }
  0xd6   : > { %v342_v11 = vpop.f32.mrf.mxu0 }
  0xd7   : > { %v353_v13 = vmul.f32 %v429_v10, %v342_v11 }
  0xd8   : > { %v445_v14 = vpop.f32.mrf.mxu0 }
  0xd9   : > { %v361_v15 = vadd.f32 %v430_v12, %v353_v13 }
  0xdb   : > { %v362_v16 = vmax.f32 %v361_v15, 0.0 }
  0xdd   : > { %364 = vst.msk [vmem:[%s246_s19] sm:$0xff] %vm363_vm3, %v362_v16 }
  0xde PF: > { %s16_s21 = sadd.s32 1, %s462_s21  }
  0xdf   : > { %p13_p4 = scmp.ge.s32.totalorder %s16_s21, 4  }
  0xe1   :  { %15 = sbr.rel (!%p13_p4) target bundleno = 1 (0x1), region = 74 }

// kernel: _lambda_.20
= control target key start
LH: loop header
LB: loop body
LE: loop exit
PB: predicated region body
PF: predicated region fallthrough
CT: control target
= control target key end

     0   :  { %s1525_s13 = smov 0   ;;  %s1677_s0 = inlined_call_operand.vmem [shape: f32[16,16], index: 0, kind: input, shape index: {}]   ;;  %s1678_s1 = inlined_call_operand.vmem [shape: f32[16,16], index: 1, kind: input, shape index: {}]   ;;  %s1679_s2 = inlined_call_operand.vmem [shape: f32[16,16], index: 2, kind: input, shape index: {}]   ;;  %s1680_s3 = inlined_call_operand.vmem [shape: f32[16,16], index: 3, kind: input, shape index: {}]   ;;  %s1681_s4 = inlined_call_operand.vmem [shape: f32[16,16], index: 4, kind: input, shape index: {}]   ;;  %s1682_s5 = inlined_call_operand.vmem [shape: f32[16,16], index: 5, kind: input, shape index: {}]   ;;  %s1683_s6 = inlined_call_operand.vmem [shape: f32[16,16], index: 6, kind: input, shape index: {}]   ;;  %s1684_s7 = inlined_call_operand.vmem [shape: f32[16,16], index: 7, kind: input, shape index: {}]   ;;  %s1685_s8 = inlined_call_operand.vmem [shape: f32[16,16], index: 8, kind: input, shape index: {}]   ;;  %s1686_s9 = inlined_call_operand.vmem [shape: f32[144,8], index: 9, kind: input, shape index: {}]   ;;  %s1687_s10 = inlined_call_operand.vmem [shape: f32[16,8], index: 10, kind: output, shape index: {}]  }
   0x1 LB: > { %s1334_s14 = sadd.s32 4294967295, %s1466_s13   ;;  %p1338_p0 = scmp.ge.s32.totalorder %s1466_s13, 1  ;;  %s1466_s13 = sphi %s1525_s13, %s20_s13  }
   0x2   : > { %p383_p1 = scmp.lt.s32.totalorder %s1466_s13, 3 }
   0x4   : > { %p384_p2 = pnand %p1338_p0, %p383_p1 }
   0x5   : > { %p451_p3 = scmp.lt.s32.totalorder (!%p384_p2), %s1334_s14, 1 }
   0x6   : > { %387 = sbr.rel (%p384_p2) target bundleno = 235 (0xeb), region = 60 }
   0xb   : > { %v496_v0 = vld [vmem:[%s1686_s9 + $0x18] sm:$0xff]  ;;  %v493_v1 = vld [vmem:[%s1686_s9 + $0x8] sm:$0xff]  ;;  %v1468_v2 = vmov 0.0   ;;  %v495_v3 = vld [vmem:[%s1686_s9 + $0x10] sm:$0xff]  ;;  %s1689_s14 = smov (!%p451_p3, %s1334_s14), 1  ;;  %vm1469_vm0 = vmmov 0  }
   0xc   : > { %1387 = vmatprep.subr.mxu0 %v1468_v2  ;;  %1394 = vmatprep.subr.mxu1 %v1468_v2  ;;  %v492_v4 = vld [vmem:[%s1686_s9] sm:$0xff]  ;;  %s1551_s23 = sshll.u32 %s1689_s14, 3  ;;  %vm497_vm1 = vcmask 130048   ;;  %v646_v5 = vld [vmem:[%s1686_s9 + $0x28] sm:$0xff]  ;;  %v723_v6 = vld [vmem:[%s1686_s9 + $0x38] sm:$0xff]  ;;  %vm1183_vm2 = vcmask 64512  }
   0xd   : > { %1388 = vmatpush3.msra.mxu0 %v496_v0  ;;  %1395 = vmatpush3.msra.mxu1 %v493_v1  ;;  %s458_s26 = scalar_lea.vmem %s1678_s1, %s1551_s23  ;;  %s454_s29 = scalar_lea.vmem %s1677_s0, %s1551_s23  ;;  %v645_v9 = vld [vmem:[%s1686_s9 + $0x20] sm:$0xff]  ;;  %v722_v10 = vld [vmem:[%s1686_s9 + $0x30] sm:$0xff]  ;;  %v800_v13 = vld [vmem:[%s1686_s9 + $0x48] sm:$0xff] }
   0xe   : > { %1389 = vmatprep.subr.mxu0 %v1468_v2  ;;  %1396 = vmatprep.subr.mxu1 %v1468_v2  ;;  %v494_v7 = vld [vmem:[%s458_s26] sm:$0xff]  ;;  %s462_s17 = scalar_lea.vmem %s1679_s2, %s1551_s23  ;;  %s466_s22 = scalar_lea.vmem %s1680_s3, %s1551_s23  ;;  %v877_v14 = vld [vmem:[%s1686_s9 + $0x58] sm:$0xff]  ;;  %v876_v16 = vld [vmem:[%s1686_s9 + $0x50] sm:$0xff] }
   0xf   : > { %1390 = vmatpush3.msra.mxu0 %v495_v3  ;;  %1391 = vmatprep.mubr.msk.f32.mxu0 %vm1469_vm0, %v1468_v2  ;;  %v491_v8 = vld [vmem:[%s454_s29] sm:$0xff]  ;;  %s470_s15 = scalar_lea.vmem %s1681_s4, %s1551_s23  ;;  %s474_s18 = scalar_lea.vmem %s1682_s5, %s1551_s23  ;;  %v954_v19 = vld [vmem:[%s1686_s9 + $0x68] sm:$0xff]  ;;  %v1031_v20 = vld [vmem:[%s1686_s9 + $0x78] sm:$0xff] }
  0x10   : > { %1397 = vmatpush3.msra.mxu1 %v492_v4  ;;  %1398 = vmatprep.mubr.msk.f32.mxu1 %vm1469_vm0, %v1468_v2  ;;  %v644_v11 = vld [vmem:[%s462_s17] sm:$0xff]  ;;  %s478_s30 = scalar_lea.vmem %s1683_s6, %s1551_s23  ;;  %s482_s14 = scalar_lea.vmem %s1684_s7, %s1551_s23  ;;  %v1030_v22 = vld [vmem:[%s1686_s9 + $0x70] sm:$0xff]  ;;  %v1108_v25 = vld [vmem:[%s1686_s9 + $0x88] sm:$0xff] }
  0x11   : > { %1401 = vmatprep.subr.mxu0 %v1468_v2  ;;  %1408 = vmatprep.subr.mxu1 %v1468_v2  ;;  %v721_v12 = vld [vmem:[%s466_s22] sm:$0xff]  ;;  %s486_s21 = scalar_lea.vmem %s1685_s8, %s1551_s23  ;;  %s490_s27 = scalar_lea.vmem %s1687_s10, %s1551_s23 }
  0x12   : > { %1392 = vmatmul.mubr.msk.f32.vlgmr.msra.gmra.mxu0 %vm497_vm1, %v494_v7  ;;  %1399 = vmatmul.mubr.msk.f32.vlgmr.msra.gmra.mxu1 %vm497_vm1, %v491_v8  ;;  %v799_v15 = vld [vmem:[%s1686_s9 + $0x40] sm:$0xff] }
  0x13   : > { %1402 = vmatpush3.msra.mxu0 %v646_v5  ;;  %1409 = vmatpush3.msra.mxu1 %v723_v6  ;;  %v798_v17 = vld [vmem:[%s470_s15] sm:$0xff] }
  0x14   : > { %1403 = vmatprep.subr.mxu0 %v1468_v2  ;;  %1410 = vmatprep.subr.mxu1 %v1468_v2  ;;  %v875_v18 = vld [vmem:[%s474_s18] sm:$0xff] }
  0x15   : > { %1404 = vmatpush3.msra.mxu0 %v645_v9  ;;  %1405 = vmatprep.mubr.msk.f32.mxu0 %vm1469_vm0, %v1468_v2  ;;  %v953_v21 = vld [vmem:[%s1686_s9 + $0x60] sm:$0xff] }
  0x16   : > { %1411 = vmatpush3.msra.mxu1 %v722_v10  ;;  %1412 = vmatprep.mubr.msk.f32.mxu1 %vm1469_vm0, %v1468_v2  ;;  %v952_v23 = vld [vmem:[%s478_s30] sm:$0xff] }
  0x17   : > { %1415 = vmatprep.subr.mxu0 %v1468_v2  ;;  %1406 = vmatmul.mubr.msk.f32.vlgmr.msra.gmra.mxu0 %vm497_vm1, %v644_v11  ;;  %v1029_v24 = vld [vmem:[%s482_s14] sm:$0xff] }
  0x18   : > { %1413 = vmatmul.mubr.msk.f32.vlgmr.msra.gmra.mxu1 %vm497_vm1, %v721_v12  ;;  %1416 = vmatpush3.msra.mxu0 %v800_v13  ;;  %v1107_v26 = vld [vmem:[%s1686_s9 + $0x80] sm:$0xff] }
  0x19   : > { %1422 = vmatprep.subr.mxu1 %v1468_v2  ;;  %1417 = vmatprep.subr.mxu0 %v1468_v2  ;;  %v1106_v27 = vld [vmem:[%s486_s21] sm:$0xff] }
  0x1a   : > { %1423 = vmatpush3.msra.mxu1 %v877_v14  ;;  %1418 = vmatpush3.msra.mxu0 %v799_v15 }
  0x1b   : > { %1424 = vmatprep.subr.mxu1 %v1468_v2  ;;  %1419 = vmatprep.mubr.msk.f32.mxu0 %vm1469_vm0, %v1468_v2 }
  0x1c   : > { %1425 = vmatpush3.msra.mxu1 %v876_v16  ;;  %1426 = vmatprep.mubr.msk.f32.mxu1 %vm1469_vm0, %v1468_v2 }
  0x1d   : > { %1429 = vmatprep.subr.mxu0 %v1468_v2  ;;  %1420 = vmatmul.mubr.msk.f32.vlgmr.msra.gmra.mxu0 %vm497_vm1, %v798_v17 }
  0x1e   : > { %1427 = vmatmul.mubr.msk.f32.vlgmr.msra.gmra.mxu1 %vm497_vm1, %v875_v18  ;;  %1430 = vmatpush3.msra.mxu0 %v954_v19 }
  0x1f   : > { %1436 = vmatprep.subr.mxu1 %v1468_v2  ;;  %1431 = vmatprep.subr.mxu0 %v1468_v2 }
  0x20   : > { %1437 = vmatpush3.msra.mxu1 %v1031_v20  ;;  %1432 = vmatpush3.msra.mxu0 %v953_v21 }
  0x21   : > { %1438 = vmatprep.subr.mxu1 %v1468_v2  ;;  %1433 = vmatprep.mubr.msk.f32.mxu0 %vm1469_vm0, %v1468_v2 }
  0x22   : > { %1439 = vmatpush3.msra.mxu1 %v1030_v22  ;;  %1440 = vmatprep.mubr.msk.f32.mxu1 %vm1469_vm0, %v1468_v2 }
  0x23   : > { %1443 = vmatprep.subr.mxu0 %v1468_v2  ;;  %1434 = vmatmul.mubr.msk.f32.vlgmr.msra.gmra.mxu0 %vm497_vm1, %v952_v23 }
  0x24   : > { %1441 = vmatmul.mubr.msk.f32.vlgmr.msra.gmra.mxu1 %vm497_vm1, %v1029_v24  ;;  %1444 = vmatpush3.msra.mxu0 %v1108_v25 }
  0x25   : > { %1445 = vmatprep.subr.mxu0 %v1468_v2  ;;  %1447 = vmatprep.mubr.msk.f32.mxu0 %vm1469_vm0, %v1468_v2 }
  0x26   : > { %1446 = vmatpush3.msra.mxu0 %v1107_v26 }
  0x27   : > { %1448 = vmatmul.mubr.msk.f32.vlgmr.msra.gmra.mxu0 %vm497_vm1, %v1106_v27 }
  0xd2   : > { %v567_v28 = vpop.f32.mrf.mxu0  ;;  %v640_v29 = vpop.f32.mrf.mxu1 }
  0xd3   : > { %v641_v32 = vadd.f32 %v640_v29, %v567_v28 }
  0xd4   : > { %v1393_v30 = vpop.f32.mrf.mxu0  ;;  %v1400_v31 = vpop.f32.mrf.mxu1 }
  0xd7   : > { %v716_v33 = vpop.f32.mrf.mxu0 }
  0xd8   : > { %v720_v34 = vadd.f32 %v716_v33, %v641_v32  ;;  %v793_v35 = vpop.f32.mrf.mxu1 }
  0xd9   : > { %v1407_v36 = vpop.f32.mrf.mxu0 }
  0xda   : > { %v797_v37 = vadd.f32 %v793_v35, %v720_v34  ;;  %v1414_v38 = vpop.f32.mrf.mxu1 }
  0xdd   : > { %v870_v39 = vpop.f32.mrf.mxu0 }
  0xde   : > { %v874_v40 = vadd.f32 %v870_v39, %v797_v37  ;;  %v947_v41 = vpop.f32.mrf.mxu1 }
  0xdf   : > { %v1421_v42 = vpop.f32.mrf.mxu0 }
  0xe0   : > { %v951_v43 = vadd.f32 %v947_v41, %v874_v40  ;;  %v1428_v44 = vpop.f32.mrf.mxu1 }
  0xe3   : > { %v1024_v45 = vpop.f32.mrf.mxu0 }
  0xe4   : > { %v1028_v46 = vadd.f32 %v1024_v45, %v951_v43  ;;  %v1101_v47 = vpop.f32.mrf.mxu1 }
  0xe5   : > { %v1435_v48 = vpop.f32.mrf.mxu0 }
  0xe6   : > { %v1105_v49 = vadd.f32 %v1101_v47, %v1028_v46  ;;  %v1442_v50 = vpop.f32.mrf.mxu1 }
  0xe7   : > { %v1178_v51 = vpop.f32.mrf.mxu0 }
  0xe8   : > { %v1182_v52 = vadd.f32 %v1178_v51, %v1105_v49 }
  0xe9   : > { %v1449_v53 = vpop.f32.mrf.mxu0 }
  0xea   : > { %1184 = vst.msk [vmem:[%s490_s27] sm:$0xff] %vm1183_vm2, %v1182_v52 }
  0xeb PF: > { %s20_s13 = sadd.s32 1, %s1466_s13  }
  0xec   : > { %p17_p4 = scmp.ge.s32.totalorder %s20_s13, 4  }
  0xee   :  { %19 = sbr.rel (!%p17_p4) target bundleno = 1 (0x1), region = 114 }

// kernel: _lambda_.23
= control target key start
LH: loop header
LB: loop body
LE: loop exit
PB: predicated region body
PF: predicated region fallthrough
CT: control target
= control target key end

     0   :  { %10 = vsyncpa [#allocation3], 0  ;;  %s677_s0 = inlined_call_operand.vmem [shape: f32[2,8,28], index: 0, kind: input, shape index: {}]   ;;  %s678_s1 = inlined_call_operand.vmem [shape: f32[1,28], index: 1, kind: input, shape index: {}]   ;;  %s679_s2 = inlined_call_operand.vmem [shape: f32[1,28], index: 2, kind: input, shape index: {}]   ;;  %s680_s3 = inlined_call_operand.vmem [shape: f32[28,10], index: 3, kind: input, shape index: {}]   ;;  %s681_s4 = inlined_call_operand.vmem [shape: f32[1,10], index: 4, kind: input, shape index: {}]   ;;  %s682_s5 = inlined_call_operand.hbm [shape: f32[2,1,10], index: 5, kind: output, shape index: {}]  }
   0x1   :  { %12 = vsyncpa [#allocation3 + $0x1], 0  ;;  %s563_s18 = smov 0   ;;  %s565_s19 = smov 0  }
   0x2   :  { %s567_s20 = smov 0   ;;  %s569_s21 = smov 0  }
   0x3 LB: > { %s584_s22 = sadd.s32 4294967295, %s528_s21   ;;  %s399_s23 = sadd.s32 4294967294, %s528_s21   ;;  %s528_s21 = sphi %s569_s21, %s688_s21   ;;  %s524_s20 = sphi %s567_s20, %s687_s20   ;;  %s520_s19 = sphi %s565_s19, %s686_s19   ;;  %s516_s18 = sphi %s563_s18, %s685_s18  }
   0x4   : > { %s588_s24 = sadd.s32 1, %s528_s21   ;;  %s135_s25 = sadd.s32 1, %s524_s20 }
   0x5   : > { %s132_s26 = ssub.s32 %s528_s21, %s588_s24  ;;  %p145_p0 = scmp.ne.s32.totalorder %s524_s20, %s520_s19 }
   0x6   : > { %p133_p1 = scmp.eq.s32.totalorder %s132_s26, 0  ;;  %p146_p2 = scmp.eq.s32.totalorder %s584_s22, 1 }
   0x7   : > { %p151_p3 = scmp.ne.s32.totalorder %s520_s19, %s516_s18  ;;  %p152_p4 = scmp.eq.s32.totalorder %s399_s23, 1 }
   0x8   : > { %s599_s27 = scalar_select %p133_p1, %s524_s20, %s135_s25  }
   0x9   : > { %p601_p5 = por %p146_p2, %p145_p0  ;;  %p605_p6 = por %p152_p4, %p151_p3 }
   0xa   : > { %p402_p7 = scmp.ge.s32.totalorder %s528_s21, 1  ;;  %p189_p8 = scmp.lt.s32.totalorder %s528_s21, 3 }
   0xc   : > { %p190_p9 = pnand %p402_p7, %p189_p8 }
   0xd   : > { %p215_p10 = scmp.lt.s32.totalorder (!%p190_p9), %s584_s22, 1  ;;  %s213_s6 = sand.u32 (!%p190_p9), 1, %s520_s19  }
   0xe   : > { %193 = sbr.rel (%p190_p9) target bundleno = 254 (0xfe), region = 40  ;;  %s408_s9 = sshll.u32 (!%p190_p9), %s584_s22, 4 }
   0xf   : > { %s214_s10 = scalar_lea.vmem (!%p190_p9), [#allocation2], %s213_s6  ;;  %s332_s15 = scalar_lea.sflag (!%p190_p9), [#allocation3], %s213_s6 }
  0x13   : > { %v250_v0 = vld [vmem:[%s680_s3 + $0x18] sm:$0xf]  ;;  %vm255_vm0 = vcmask 1043456   ;;  %v530_v1 = vmov 0.0   ;;  %v249_v2 = vld [vmem:[%s680_s3 + $0x10] sm:$0xff]  ;;  %vm531_vm1 = vmmov 0  }
  0x14   : > { %416 = vmatprep.subr.mxu0 %v530_v1  ;;  %424 = vmatprep.mubr.msk.f32.mxu0 %vm531_vm1, %v530_v1  ;;  %v248_v3 = vld [vmem:[%s680_s3 + $0x8] sm:$0xff]  ;;  %s216_s11 = scalar_select %p215_p10, %s584_s22, 1  ;;  %v247_v4 = vld [vmem:[%s680_s3] sm:$0xff]  ;;  %vm237_vm2 = vcmask 228352   ;;  %vm329_vm3 = vcmask 73728  }
  0x15   : > { %417 = vmatpush3.msk.msra.mxu0 %vm255_vm0, %v250_v0  ;;  %v404_v5 = vld [vmem:[%s678_s1] ss:$0 sm:$0xff]  ;;  %s532_s22 = smov [#allocation2]  }
  0x16   : > { %418 = vmatprep.subr.mxu0 %v530_v1  ;;  %s403_s14 = sshll.u32 %s216_s11, 3  ;;  %v405_v7 = vld [vmem:[%s679_s2] ss:$0 sm:$0xff]  ;;  %s344_s11 = sshll.u32 %s214_s10, 4  ;;  %s345_s11 = int_to_ptr.vmem [resolvable:$true] %s344_s11 }
  0x17   : > { %419 = vmatpush3.msra.mxu0 %v249_v2  ;;  %s218_s25 = scalar_lea.vmem %s677_s0, %s403_s14  ;;  %v251_v19 = vld [vmem:[%s681_s4] sm:$0x1]  ;;  %s642_s14 = scalar_lea.hbm %s682_s5, %s408_s9 }
  0x18   : > { %420 = vmatprep.subr.mxu0 %v530_v1  ;;  %v219_v6 = vld [vmem:[%s218_s25] sm:$0xff]  ;;  %s468_s16 = scalar_lea.vmem %s345_s11, 16  ;;  %s472_s17 = sshll.u32 %s532_s22, 4  ;;  %s473_s17 = int_to_ptr.vmem [resolvable:$false] %s472_s17 }
  0x19   : > { %421 = vmatpush3.msra.mxu0 %v248_v3  ;;  %v227_v8 = vmul.f32 %v404_v5, %v219_v6  ;;  %p469_p11 = scmp.ne.s32.totalorder %s345_s11, %s468_s16  ;;  %s474_s23 = scalar_lea.vmem %s473_s17, 32 }
  0x1a   : > { %422 = vmatprep.subr.mxu0 %v530_v1  ;;  %p475_p0 = scmp.lt.s32.totalorder %s345_s11, %s473_s17  ;;  %p476_p1 = scmp.lt.s32.totalorder %s474_s23, %s468_s16 }
  0x1b   : > { %423 = vmatpush3.msra.mxu0 %v247_v4  ;;  %v235_v9 = vadd.f32 %v405_v7, %v227_v8  ;;  %p470_p12 = pnand %p469_p11, %p601_p5 }
  0x1c   : > { %p477_p2 = por %p476_p1, %p475_p0 }
  0x1d   : > { %v236_v10 = vmax.f32 %v235_v9, 0.0  ;;  %p471_p13 = pneg %p470_p12 }
  0x1f   : > { %v238_v11 = vsel %vm237_vm2, %v236_v10, 0.0  ;;  %p478_p3 = pnand %p477_p2, %p471_p13 }
  0x20   : > { %v239_v12 = vrot.slane %v238_v11, 4 }
  0x22   : > { %v240_v13 = vadd.f32 %v239_v12, %v238_v11 }
  0x24   : > { %v241_v14 = vrot.slane %v240_v13, 2 }
  0x26   : > { %v242_v15 = vadd.f32 %v241_v14, %v240_v13 }
  0x28   : > { %v243_v16 = vrot.slane %v242_v15, 1 }
  0x2a   : > { %v244_v17 = vadd.f32 %v243_v16, %v242_v15 }
  0x2c   : > { %v246_v18 = vmul.f32 0.125, %v244_v17 }
  0x2e   : > { %425 = vmatmul.mubr.msk.f32.vlgmr.msra.gmra.mxu0 %vm237_vm2, %v246_v18 }
  0xee   : > { %v325_v20 = vpop.f32.mrf.mxu0 }
  0xef   : > { %v326_v21 = vadd.f32 %v325_v20, %v251_v19 }
  0xf0   : > { %v426_v22 = vpop.f32.mrf.mxu0 }
  0xf1   : > { %330 = vst.msk [vmem:[%s214_s10] sm:$0x1] %vm329_vm3, %v326_v21 }
  0xf2   : > { %481 = shalt.err (!%p478_p3)
}
  0xf3   : > { %s482_s25 = scalar_lea.hbm %s642_s14, 16  ;;  %s486_s6 = scalar_lea.hbm %s682_s5, 32 }
  0xf4   : > { %p483_p4 = scmp.ne.s32.totalorder %s642_s14, %s482_s25  ;;  %p487_p9 = scmp.lt.s32.totalorder %s642_s14, %s682_s5 }
  0xf5   : > { %p488_p10 = scmp.lt.s32.totalorder %s486_s6, %s482_s25 }
  0xf6   : > { %p484_p7 = pnand %p483_p4, %p601_p5 }
  0xf7   : > { %p489_p11 = por %p488_p10, %p487_p9 }
  0xf8   : > { %p485_p8 = pneg %p484_p7 }
  0xfa   : > { %p490_p12 = pnand %p489_p11, %p485_p8 }
  0xfc   : > { %493 = shalt.err (!%p490_p12)
}
  0xfd   : > { %427 = dma.vmem_to_hbm [thread:$0]  (%p601_p5), %s345_s11, 16, %s642_s14, %s332_s15  }
  0xfe PF: > { %p433_p13 = scmp.ge.s32.totalorder %s528_s21, 2  ;;  %s356_s9 = sand.u32 1, %s516_s18  }
  0xff   : > { %s357_s10 = scalar_lea.sflag [#allocation3], %s356_s9 }
 0x100   : > { %p430_p0 = pnand %p433_p13, %p605_p6 }
 0x102   : > { %p431_p1 = pneg %p430_p0 }
 0x104   : > { %511 = dma.done.wait (%p431_p1), %s357_s10, 16  }
 0x105   : > { %513 = vsyncadd (%p431_p1), %s357_s10, 4294967280  ;;  %p15_p2 = scmp.ge.s32.totalorder %s588_s24, 4   ;;  %s685_s18 = smov %s520_s19 }
 0x106   : > { %s686_s19 = smov %s524_s20  ;;  %s687_s20 = smov %s599_s27 }
 0x107   : > { %s688_s21 = smov %s588_s24  ;;  %17 = sbr.rel (!%p15_p2) target bundleno = 3 (0x3), region = 75 }
 0x10c   :  { %361 = vsyncpa [#allocation3], 1 }
 0x10d   :  { %363 = vsyncpa [#allocation3 + $0x1], 1 }

</bundles_post_ra>
